<compile_context>
chip_gen: v7x
topology: tpu7x:2x2x1
jax: 0.10.0
libtpu: 0.0.40
codegen_flags: <defaults>
</compile_context>

<pallas_src>
import jax
import jax.numpy as jnp
from jax.experimental import pallas as pl
from jax.experimental.pallas import tpu as pltpu

EPS = 1e-5
LANE = 128
VMEM_LIMIT = 32 * 1024 * 1024


def _round_up(x, m):
    return (x + m - 1) // m * m


def _row_tile(rows, cap=256):
    t = min(rows, cap)
    while t > 8 and rows % t != 0:
        t -= 8
    return t if rows % t == 0 else rows


# ---------------------------------------------------------------------------
# Stage A: fused conv1(1x1) + shortcut conv(1x1) as ONE matmul, + BN stats.
# Grid over row tiles ("arbitrary": stats accumulate across the axis).
# ---------------------------------------------------------------------------
def _stage_a_kernel(x_ref, w_ref, y1_ref, res_ref, s1_ref, q1_ref, sd_ref, qd_ref):
    pp = y1_ref.shape[1]

    @pl.when(pl.program_id(0) == 0)
    def _():
        s1_ref[...] = jnp.zeros_like(s1_ref)
        q1_ref[...] = jnp.zeros_like(q1_ref)
        sd_ref[...] = jnp.zeros_like(sd_ref)
        qd_ref[...] = jnp.zeros_like(qd_ref)

    y = jnp.dot(x_ref[...].astype(jnp.bfloat16), w_ref[...],
                preferred_element_type=jnp.float32)
    y1 = y[:, :pp]
    rs = y[:, pp:]
    y1_ref[...] = y1
    res_ref[...] = rs
    s1_ref[...] += jnp.sum(y1, axis=0, keepdims=True)
    q1_ref[...] += jnp.sum(y1 * y1, axis=0, keepdims=True)
    sd_ref[...] += jnp.sum(rs, axis=0, keepdims=True)
    qd_ref[...] += jnp.sum(rs * rs, axis=0, keepdims=True)


# ---------------------------------------------------------------------------
# Stage B: BN1 + ReLU + conv2 (3x3, stride 1, pad 1) via im2col, + BN stats.
# Grid over batch images (no spatial halo across grid steps).
# ---------------------------------------------------------------------------
def _stage_b_kernel(y1_ref, s_ref, t_ref, w_ref, y2_ref, sum_ref, sq_ref,
                    pad_ref, col_ref):
    _, h, w, cp = y1_ref.shape

    @pl.when(pl.program_id(0) == 0)
    def _():
        sum_ref[...] = jnp.zeros_like(sum_ref)
        sq_ref[...] = jnp.zeros_like(sq_ref)
        # Zero the halo scratch ONCE: the 1-pixel border stays zero across grid
        # steps; the interior is fully overwritten every step.
        pad_ref[...] = jnp.zeros_like(pad_ref)

    scale = s_ref[...].reshape(1, 1, 1, cp)
    shift = t_ref[...].reshape(1, 1, 1, cp)
    y1n = jnp.maximum(y1_ref[...] * scale + shift, 0.0)
    pad_ref[1:h + 1, 1:w + 1, :] = y1n[0]

    # im2col: one (h*w, 9*cp) bf16 buffer -> a single MXU matmul with K = 9*cp.
    for kh in range(3):
        for kw in range(3):
            tap = kh * 3 + kw
            win = pad_ref[kh:kh + h, kw:kw + w, :].reshape(h * w, cp)
            col_ref[:, tap * cp:(tap + 1) * cp] = win.astype(col_ref.dtype)

    y2 = jnp.dot(col_ref[...], w_ref[...], preferred_element_type=jnp.float32)
    y2_ref[...] = y2.reshape(1, h, w, cp)
    sum_ref[...] += jnp.sum(y2, axis=0, keepdims=True)
    sq_ref[...] += jnp.sum(y2 * y2, axis=0, keepdims=True)


# ---------------------------------------------------------------------------
# Stage C: BN2 + ReLU + conv3 (1x1), + BN stats.  Grid over row tiles.
# ---------------------------------------------------------------------------
def _stage_c_kernel(y2_ref, s_ref, t_ref, w_ref, y3_ref, sum_ref, sq_ref):
    @pl.when(pl.program_id(0) == 0)
    def _():
        sum_ref[...] = jnp.zeros_like(sum_ref)
        sq_ref[...] = jnp.zeros_like(sq_ref)

    a = jnp.maximum(y2_ref[...] * s_ref[...] + t_ref[...], 0.0)
    y3 = jnp.dot(a.astype(jnp.bfloat16), w_ref[...],
                 preferred_element_type=jnp.float32)
    y3_ref[...] = y3
    sum_ref[...] += jnp.sum(y3, axis=0, keepdims=True)
    sq_ref[...] += jnp.sum(y3 * y3, axis=0, keepdims=True)


# ---------------------------------------------------------------------------
# Stage D: out = ReLU(BN3(y3) + BNd(res))  — pure elementwise, "parallel" grid.
# ---------------------------------------------------------------------------
def _stage_d_kernel(y3_ref, res_ref, s3_ref, t3_ref, sd_ref, td_ref, out_ref):
    out_ref[...] = jnp.maximum(
        y3_ref[...] * s3_ref[...] + t3_ref[...]
        + res_ref[...] * sd_ref[...] + td_ref[...], 0.0)


def _bn_fold(ssum, ssq, gamma, beta, count, cpad):
    """Fold batch statistics + affine params into per-channel scale/shift."""
    mean = ssum / count
    var = jnp.maximum(ssq / count - mean * mean, 0.0)   # biased variance
    g = jnp.zeros((1, cpad), jnp.float32).at[0, :gamma.shape[0]].set(gamma)
    b = jnp.zeros((1, cpad), jnp.float32).at[0, :beta.shape[0]].set(beta)
    scale = g * jax.lax.rsqrt(var + EPS)
    shift = b - mean * scale
    return scale, shift


def _pad2(a, rows, cols):
    r, c = a.shape
    return jnp.pad(a, ((0, rows - r), (0, cols - c)))


@jax.jit
def bottleneck_pallas(x_nchw, p):
    n, cin, h, w = x_nchw.shape
    pch = p["w1"].shape[0]          # `places`
    co = p["w3"].shape[0]           # places // expansion
    rows = n * h * w

    cip = _round_up(cin, LANE)
    pp = _round_up(pch, LANE)
    cop = _round_up(co, LANE)
    tr = _row_tile(rows)
    grid_r = rows // tr

    # NCHW -> flattened, lane-padded NHWC rows.
    x2d = jnp.transpose(x_nchw, (0, 2, 3, 1)).reshape(rows, cin).astype(jnp.float32)
    x2d = jnp.pad(x2d, ((0, 0), (0, cip - cin)))

    # Torch OIHW weights -> lane-padded bf16 matmul layouts.
    w1 = _pad2(p["w1"][:, :, 0, 0].T, cip, pp)                      # (cip, pp)
    wd = _pad2(p["wd"][:, :, 0, 0].T, cip, cop)                     # (cip, cop)
    w_a = jnp.concatenate([w1, wd], axis=1).astype(jnp.bfloat16)    # [w1 | wd]

    w2t = jnp.transpose(p["w2"], (2, 3, 1, 0))                      # (3,3,in,out)
    w2p = jnp.zeros((3, 3, pp, pp), jnp.float32).at[:, :, :pch, :pch].set(w2t)
    w2k = w2p.reshape(9 * pp, pp).astype(jnp.bfloat16)

    w3 = _pad2(p["w3"][:, :, 0, 0].T, pp, cop).astype(jnp.bfloat16)

    f32 = jnp.float32
    row_spec = lambda c: pl.BlockSpec((tr, c), lambda i: (i, 0))
    vec_spec = lambda c: pl.BlockSpec((1, c), lambda i: (0, 0))
    full_spec = lambda shape: pl.BlockSpec(shape, lambda i: (0,) * len(shape))
    cp_arb = pltpu.CompilerParams(dimension_semantics=("arbitrary",),
                                  vmem_limit_bytes=VMEM_LIMIT)
    cp_par = pltpu.CompilerParams(dimension_semantics=("parallel",),
                                  vmem_limit_bytes=VMEM_LIMIT)

    # ---- Stage A: [conv1 | shortcut] fused matmul + stats --------------------
    y1_raw, res_raw, s1, q1, sds, qds = pl.pallas_call(
        _stage_a_kernel,
        grid=(grid_r,),
        in_specs=[row_spec(cip), full_spec((cip, pp + cop))],
        out_specs=[row_spec(pp), row_spec(cop),
                   vec_spec(pp), vec_spec(pp), vec_spec(cop), vec_spec(cop)],
        out_shape=(jax.ShapeDtypeStruct((rows, pp), f32),
                   jax.ShapeDtypeStruct((rows, cop), f32),
                   jax.ShapeDtypeStruct((1, pp), f32),
                   jax.ShapeDtypeStruct((1, pp), f32),
                   jax.ShapeDtypeStruct((1, cop), f32),
                   jax.ShapeDtypeStruct((1, cop), f32)),
        compiler_params=cp_arb,
        cost_estimate=pl.CostEstimate(
            flops=2 * rows * cip * (pp + cop), transcendentals=0,
            bytes_accessed=4 * rows * (cip + pp + cop) + 2 * cip * (pp + cop)),
    )(x2d, w_a)

    sc1, sh1 = _bn_fold(s1, q1, p["g1"], p["b1"], rows, pp)
    scd, shd = _bn_fold(sds, qds, p["gd"], p["bd"], rows, cop)

    # ---- Stage B: BN1 + ReLU + 3x3 conv (im2col, one matmul) + stats ----------
    y2_4d, s2, q2 = pl.pallas_call(
        _stage_b_kernel,
        grid=(n,),
        in_specs=[pl.BlockSpec((1, h, w, pp), lambda b: (b, 0, 0, 0)),
                  vec_spec(pp), vec_spec(pp),
                  full_spec((9 * pp, pp))],
        out_specs=[pl.BlockSpec((1, h, w, pp), lambda b: (b, 0, 0, 0)),
                   vec_spec(pp), vec_spec(pp)],
        out_shape=(jax.ShapeDtypeStruct((n, h, w, pp), f32),
                   jax.ShapeDtypeStruct((1, pp), f32),
                   jax.ShapeDtypeStruct((1, pp), f32)),
        scratch_shapes=[pltpu.VMEM((h + 2, w + 2, pp), f32),
                        pltpu.VMEM((h * w, 9 * pp), jnp.bfloat16)],
        compiler_params=cp_arb,
        cost_estimate=pl.CostEstimate(
            flops=2 * rows * 9 * pp * pp, transcendentals=0,
            bytes_accessed=8 * rows * pp + 2 * 9 * pp * pp),
    )(y1_raw.reshape(n, h, w, pp), sc1, sh1, w2k)
    y2_raw = y2_4d.reshape(rows, pp)

    sc2, sh2 = _bn_fold(s2, q2, p["g2"], p["b2"], rows, pp)

    # ---- Stage C: BN2 + ReLU + conv3 (1x1) + stats ----------------------------
    y3_raw, s3, q3 = pl.pallas_call(
        _stage_c_kernel,
        grid=(grid_r,),
        in_specs=[row_spec(pp), vec_spec(pp), vec_spec(pp), full_spec((pp, cop))],
        out_specs=[row_spec(cop), vec_spec(cop), vec_spec(cop)],
        out_shape=(jax.ShapeDtypeStruct((rows, cop), f32),
                   jax.ShapeDtypeStruct((1, cop), f32),
                   jax.ShapeDtypeStruct((1, cop), f32)),
        compiler_params=cp_arb,
        cost_estimate=pl.CostEstimate(
            flops=2 * rows * pp * cop, transcendentals=0,
            bytes_accessed=4 * rows * (pp + cop) + 2 * pp * cop),
    )(y2_raw, sc2, sh2, w3)

    sc3, sh3 = _bn_fold(s3, q3, p["g3"], p["b3"], rows, cop)

    # ---- Stage D: out = ReLU(BN3(y3) + BNd(res)) ------------------------------
    out2d = pl.pallas_call(
        _stage_d_kernel,
        grid=(grid_r,),
        in_specs=[row_spec(cop), row_spec(cop),
                  vec_spec(cop), vec_spec(cop), vec_spec(cop), vec_spec(cop)],
        out_specs=row_spec(cop),
        out_shape=jax.ShapeDtypeStruct((rows, cop), f32),
        compiler_params=cp_par,
        cost_estimate=pl.CostEstimate(
            flops=5 * rows * cop, transcendentals=0,
            bytes_accessed=12 * rows * cop),
    )(y3_raw, res_raw, sc3, sh3, scd, shd)

    out = out2d[:, :co].reshape(n, h, w, co)
    return jnp.transpose(out, (0, 3, 1, 2))   # NHWC -> NCHW (PyTorch interface)


def init_params(key, in_places, places, expansion=2):
    """Deterministic synthetic parameters in PyTorch (OIHW) layout."""
    out_c = places // expansion
    k1, k2, k3, kd = jax.random.split(key, 4)

    def conv_w(k, o, i, kh, kw):
        fan_in = i * kh * kw
        return jax.random.normal(k, (o, i, kh, kw), jnp.float32) / jnp.sqrt(
            jnp.float32(fan_in))

    ones = lambda c: jnp.ones((c,), jnp.float32)
    zeros = lambda c: jnp.zeros((c,), jnp.float32)
    return {
        "w1": conv_w(k1, places, in_places, 1, 1), "g1": ones(places), "b1": zeros(places),
        "w2": conv_w(k2, places, places, 3, 3),    "g2": ones(places), "b2": zeros(places),
        "w3": conv_w(k3, out_c, places, 1, 1),     "g3": ones(out_c),  "b3": zeros(out_c),
        "wd": conv_w(kd, out_c, in_places, 1, 1),  "gd": ones(out_c),  "bd": zeros(out_c),
    }


def bottleneck_ref(x, p):
    """Pure-JAX reference of the PyTorch forward (NCHW, training-mode BN)."""
    conv = lambda a, wgt, pad: jax.lax.conv_general_dilated(
        a, wgt, (1, 1), [(pad, pad), (pad, pad)],
        dimension_numbers=("NCHW", "OIHW", "NCHW"))

    def bn(y, g, b):
        mean = jnp.mean(y, axis=(0, 2, 3), keepdims=True)
        var = jnp.mean((y - mean) ** 2, axis=(0, 2, 3), keepdims=True)
        return ((y - mean) * jax.lax.rsqrt(var + EPS) * g.reshape(1, -1, 1, 1)
                + b.reshape(1, -1, 1, 1))

    out = jax.nn.relu(bn(conv(x, p["w1"], 0), p["g1"], p["b1"]))
    out = jax.nn.relu(bn(conv(out, p["w2"], 1), p["g2"], p["b2"]))
    out = bn(conv(out, p["w3"], 0), p["g3"], p["b3"])
    res = bn(conv(x, p["wd"], 0), p["gd"], p["bd"])
    return jax.nn.relu(out + res)


if __name__ == "__main__":
    key = jax.random.PRNGKey(0)
    kx, kp = jax.random.split(key)

    N, Cin, H, W = 2, 4, 16, 16        # NCHW input, matches Conv2d convention
    places = 8                          # -> output channels = places // 2 = 4

    x = jax.random.normal(kx, (N, Cin, H, W), jnp.float32)
    params = init_params(kp, Cin, places)

    out = jax.block_until_ready(bottleneck_pallas(x, params))
    ref = bottleneck_ref(x, params)

    assert out.shape == (N, places // 2, H, W), out.shape
    max_err = float(jnp.max(jnp.abs(out - ref)))
    assert max_err < 5e-2, f"mismatch vs reference: max_err={max_err}"
    print("KERNEL_OK")
</pallas_src>

<mosaic_0001>
module attributes {stable_mosaic.version = 11 : i64} {
  func.func @_stage_a_kernel(%arg0: i32, %arg1: memref<256x128xf32, #tpu.memory_space<vmem>>, %arg2: memref<128x256xbf16, #tpu.memory_space<vmem>>, %arg3: memref<256x128xf32, #tpu.memory_space<vmem>>, %arg4: memref<256x128xf32, #tpu.memory_space<vmem>>, %arg5: memref<1x128xf32, #tpu.memory_space<vmem>>, %arg6: memref<1x128xf32, #tpu.memory_space<vmem>>, %arg7: memref<1x128xf32, #tpu.memory_space<vmem>>, %arg8: memref<1x128xf32, #tpu.memory_space<vmem>>) attributes {dimension_semantics = [#tpu.dimension_semantics<arbitrary>], iteration_bounds = array<i64: 2>, scalar_prefetch = 0 : i64, scratch_operands = 0 : i64, tpu.core_type = #tpu.core_type<tc>, window_params = [{transform_indices = @transform_0, window_bounds = array<i64: 256, 128>}, {pipeline_mode = #tpu.pipeline_mode<synchronous>, transform_indices = @transform_1, window_bounds = array<i64: 128, 256>}, {transform_indices = @transform_2, window_bounds = array<i64: 256, 128>}, {transform_indices = @transform_3, window_bounds = array<i64: 256, 128>}, {pipeline_mode = #tpu.pipeline_mode<synchronous>, transform_indices = @transform_4, window_bounds = array<i64: 1, 128>}, {pipeline_mode = #tpu.pipeline_mode<synchronous>, transform_indices = @transform_5, window_bounds = array<i64: 1, 128>}, {pipeline_mode = #tpu.pipeline_mode<synchronous>, transform_indices = @transform_6, window_bounds = array<i64: 1, 128>}, {pipeline_mode = #tpu.pipeline_mode<synchronous>, transform_indices = @transform_7, window_bounds = array<i64: 1, 128>}]} {
    %c0_i32 = arith.constant 0 : i32
    %0 = arith.cmpi eq, %arg0, %c0_i32 : i32
    %1 = arith.extui %0 : i1 to i32
    %c0_i32_0 = arith.constant 0 : i32
    %2 = arith.cmpi ne, %1, %c0_i32_0 : i32
    scf.if %2 {
      %cst_28 = arith.constant 0.000000e+00 : f32
      %33 = vector.broadcast %cst_28 : f32 to vector<1x128xf32>
      %c0_29 = arith.constant 0 : index
      %c0_30 = arith.constant 0 : index
      %34 = vector.load %arg5[%c0_29, %c0_30] : memref<1x128xf32, #tpu.memory_space<vmem>>, vector<1x128xf32>
      tpu.vector_store %arg5[%c0_29, %c0_30], %33 {strides = array<i32>} : memref<1x128xf32, #tpu.memory_space<vmem>>, vector<1x128xf32>,
      %cst_31 = arith.constant 0.000000e+00 : f32
      %35 = vector.broadcast %cst_31 : f32 to vector<1x128xf32>
      %c0_32 = arith.constant 0 : index
      %c0_33 = arith.constant 0 : index
      %36 = vector.load %arg6[%c0_32, %c0_33] : memref<1x128xf32, #tpu.memory_space<vmem>>, vector<1x128xf32>
      tpu.vector_store %arg6[%c0_32, %c0_33], %35 {strides = array<i32>} : memref<1x128xf32, #tpu.memory_space<vmem>>, vector<1x128xf32>,
      %cst_34 = arith.constant 0.000000e+00 : f32
      %37 = vector.broadcast %cst_34 : f32 to vector<1x128xf32>
      %c0_35 = arith.constant 0 : index
      %c0_36 = arith.constant 0 : index
      %38 = vector.load %arg7[%c0_35, %c0_36] : memref<1x128xf32, #tpu.memory_space<vmem>>, vector<1x128xf32>
      tpu.vector_store %arg7[%c0_35, %c0_36], %37 {strides = array<i32>} : memref<1x128xf32, #tpu.memory_space<vmem>>, vector<1x128xf32>,
      %cst_37 = arith.constant 0.000000e+00 : f32
      %39 = vector.broadcast %cst_37 : f32 to vector<1x128xf32>
      %c0_38 = arith.constant 0 : index
      %c0_39 = arith.constant 0 : index
      %40 = vector.load %arg8[%c0_38, %c0_39] : memref<1x128xf32, #tpu.memory_space<vmem>>, vector<1x128xf32>
      tpu.vector_store %arg8[%c0_38, %c0_39], %39 {strides = array<i32>} : memref<1x128xf32, #tpu.memory_space<vmem>>, vector<1x128xf32>,
    } else {
    }
    %c0 = arith.constant 0 : index
    %c0_1 = arith.constant 0 : index
    %3 = vector.load %arg1[%c0, %c0_1] : memref<256x128xf32, #tpu.memory_space<vmem>>, vector<256x128xf32>
    %4 = arith.truncf %3 : vector<256x128xf32> to vector<256x128xbf16>
    %c0_2 = arith.constant 0 : index
    %c0_3 = arith.constant 0 : index
    %5 = vector.load %arg2[%c0_2, %c0_3] : memref<128x256xbf16, #tpu.memory_space<vmem>>, vector<128x256xbf16>
    %cst = arith.constant dense<0.000000e+00> : vector<256x256xf32>
    %6 = tpu.matmul %4, %5, %cst {dimension_numbers = #tpu.dot_dimension_numbers<[1], [0], [0], [1], [0, 0, 1, 1], [], []>} : vector<256x128xbf16>, vector<128x256xbf16>, vector<256x256xf32> -> vector<256x256xf32>
    %7 = vector.extract_strided_slice %6 {offsets = [0, 0], sizes = [256, 128], strides = [1, 1]} : vector<256x256xf32> to vector<256x128xf32>
    %8 = vector.extract_strided_slice %6 {offsets = [0, 128], sizes = [256, 128], strides = [1, 1]} : vector<256x256xf32> to vector<256x128xf32>
    %c0_4 = arith.constant 0 : index
    %c0_5 = arith.constant 0 : index
    %9 = vector.load %arg3[%c0_4, %c0_5] : memref<256x128xf32, #tpu.memory_space<vmem>>, vector<256x128xf32>
    tpu.vector_store %arg3[%c0_4, %c0_5], %7 {strides = array<i32>} : memref<256x128xf32, #tpu.memory_space<vmem>>, vector<256x128xf32>,
    %c0_6 = arith.constant 0 : index
    %c0_7 = arith.constant 0 : index
    %10 = vector.load %arg4[%c0_6, %c0_7] : memref<256x128xf32, #tpu.memory_space<vmem>>, vector<256x128xf32>
    tpu.vector_store %arg4[%c0_6, %c0_7], %8 {strides = array<i32>} : memref<256x128xf32, #tpu.memory_space<vmem>>, vector<256x128xf32>,
    %c0_8 = arith.constant 0 : index
    %c0_9 = arith.constant 0 : index
    %11 = vector.load %arg5[%c0_8, %c0_9] : memref<1x128xf32, #tpu.memory_space<vmem>>, vector<1x128xf32>
    %cst_10 = arith.constant dense<0.000000e+00> : vector<128xf32>
    %12 = vector.multi_reduction <add>, %7, %cst_10 [0] : vector<256x128xf32> to vector<128xf32>
    %13 = vector.shape_cast %12 : vector<128xf32> to vector<1x128xf32>
    %14 = arith.addf %11, %13 : vector<1x128xf32>
    %c0_11 = arith.constant 0 : index
    %c0_12 = arith.constant 0 : index
    %15 = vector.load %arg5[%c0_11, %c0_12] : memref<1x128xf32, #tpu.memory_space<vmem>>, vector<1x128xf32>
    tpu.vector_store %arg5[%c0_11, %c0_12], %14 {strides = array<i32>} : memref<1x128xf32, #tpu.memory_space<vmem>>, vector<1x128xf32>,
    %c0_13 = arith.constant 0 : index
    %c0_14 = arith.constant 0 : index
    %16 = vector.load %arg6[%c0_13, %c0_14] : memref<1x128xf32, #tpu.memory_space<vmem>>, vector<1x128xf32>
    %17 = arith.mulf %7, %7 : vector<256x128xf32>
    %cst_15 = arith.constant dense<0.000000e+00> : vector<128xf32>
    %18 = vector.multi_reduction <add>, %17, %cst_15 [0] : vector<256x128xf32> to vector<128xf32>
    %19 = vector.shape_cast %18 : vector<128xf32> to vector<1x128xf32>
    %20 = arith.addf %16, %19 : vector<1x128xf32>
    %c0_16 = arith.constant 0 : index
    %c0_17 = arith.constant 0 : index
    %21 = vector.load %arg6[%c0_16, %c0_17] : memref<1x128xf32, #tpu.memory_space<vmem>>, vector<1x128xf32>
    tpu.vector_store %arg6[%c0_16, %c0_17], %20 {strides = array<i32>} : memref<1x128xf32, #tpu.memory_space<vmem>>, vector<1x128xf32>,
    %c0_18 = arith.constant 0 : index
    %c0_19 = arith.constant 0 : index
    %22 = vector.load %arg7[%c0_18, %c0_19] : memref<1x128xf32, #tpu.memory_space<vmem>>, vector<1x128xf32>
    %cst_20 = arith.constant dense<0.000000e+00> : vector<128xf32>
    %23 = vector.multi_reduction <add>, %8, %cst_20 [0] : vector<256x128xf32> to vector<128xf32>
    %24 = vector.shape_cast %23 : vector<128xf32> to vector<1x128xf32>
    %25 = arith.addf %22, %24 : vector<1x128xf32>
    %c0_21 = arith.constant 0 : index
    %c0_22 = arith.constant 0 : index
    %26 = vector.load %arg7[%c0_21, %c0_22] : memref<1x128xf32, #tpu.memory_space<vmem>>, vector<1x128xf32>
    tpu.vector_store %arg7[%c0_21, %c0_22], %25 {strides = array<i32>} : memref<1x128xf32, #tpu.memory_space<vmem>>, vector<1x128xf32>,
    %c0_23 = arith.constant 0 : index
    %c0_24 = arith.constant 0 : index
    %27 = vector.load %arg8[%c0_23, %c0_24] : memref<1x128xf32, #tpu.memory_space<vmem>>, vector<1x128xf32>
    %28 = arith.mulf %8, %8 : vector<256x128xf32>
    %cst_25 = arith.constant dense<0.000000e+00> : vector<128xf32>
    %29 = vector.multi_reduction <add>, %28, %cst_25 [0] : vector<256x128xf32> to vector<128xf32>
    %30 = vector.shape_cast %29 : vector<128xf32> to vector<1x128xf32>
    %31 = arith.addf %27, %30 : vector<1x128xf32>
    %c0_26 = arith.constant 0 : index
    %c0_27 = arith.constant 0 : index
    %32 = vector.load %arg8[%c0_26, %c0_27] : memref<1x128xf32, #tpu.memory_space<vmem>>, vector<1x128xf32>
    tpu.vector_store %arg8[%c0_26, %c0_27], %31 {strides = array<i32>} : memref<1x128xf32, #tpu.memory_space<vmem>>, vector<1x128xf32>,
    return
  }
  func.func @transform_0(%arg0: i32) -> (i32, i32) {
    %c0_i32 = arith.constant 0 : i32
    %c0_i32_0 = arith.constant 0 : i32
    return %arg0, %c0_i32 : i32, i32
  }
  func.func @transform_1(%arg0: i32) -> (i32, i32) {
    %c0_i32 = arith.constant 0 : i32
    %c0_i32_0 = arith.constant 0 : i32
    %c0_i32_1 = arith.constant 0 : i32
    return %c0_i32, %c0_i32_0 : i32, i32
  }
  func.func @transform_2(%arg0: i32) -> (i32, i32) {
    %c0_i32 = arith.constant 0 : i32
    %c0_i32_0 = arith.constant 0 : i32
    return %arg0, %c0_i32 : i32, i32
  }
  func.func @transform_3(%arg0: i32) -> (i32, i32) {
    %c0_i32 = arith.constant 0 : i32
    %c0_i32_0 = arith.constant 0 : i32
    return %arg0, %c0_i32 : i32, i32
  }
  func.func @transform_4(%arg0: i32) -> (i32, i32) {
    %c0_i32 = arith.constant 0 : i32
    %c0_i32_0 = arith.constant 0 : i32
    %c0_i32_1 = arith.constant 0 : i32
    return %c0_i32, %c0_i32_0 : i32, i32
  }
  func.func @transform_5(%arg0: i32) -> (i32, i32) {
    %c0_i32 = arith.constant 0 : i32
    %c0_i32_0 = arith.constant 0 : i32
    %c0_i32_1 = arith.constant 0 : i32
    return %c0_i32, %c0_i32_0 : i32, i32
  }
  func.func @transform_6(%arg0: i32) -> (i32, i32) {
    %c0_i32 = arith.constant 0 : i32
    %c0_i32_0 = arith.constant 0 : i32
    %c0_i32_1 = arith.constant 0 : i32
    return %c0_i32, %c0_i32_0 : i32, i32
  }
  func.func @transform_7(%arg0: i32) -> (i32, i32) {
    %c0_i32 = arith.constant 0 : i32
    %c0_i32_0 = arith.constant 0 : i32
    %c0_i32_1 = arith.constant 0 : i32
    return %c0_i32, %c0_i32_0 : i32, i32
  }
}

module attributes {stable_mosaic.version = 11 : i64} {
  func.func @_stage_c_kernel(%arg0: i32, %arg1: memref<256x128xf32, #tpu.memory_space<vmem>>, %arg2: memref<1x128xf32, #tpu.memory_space<vmem>>, %arg3: memref<1x128xf32, #tpu.memory_space<vmem>>, %arg4: memref<128x128xbf16, #tpu.memory_space<vmem>>, %arg5: memref<256x128xf32, #tpu.memory_space<vmem>>, %arg6: memref<1x128xf32, #tpu.memory_space<vmem>>, %arg7: memref<1x128xf32, #tpu.memory_space<vmem>>) attributes {dimension_semantics = [#tpu.dimension_semantics<arbitrary>], iteration_bounds = array<i64: 2>, scalar_prefetch = 0 : i64, scratch_operands = 0 : i64, tpu.core_type = #tpu.core_type<tc>, window_params = [{transform_indices = @transform_0, window_bounds = array<i64: 256, 128>}, {pipeline_mode = #tpu.pipeline_mode<synchronous>, transform_indices = @transform_1, window_bounds = array<i64: 1, 128>}, {pipeline_mode = #tpu.pipeline_mode<synchronous>, transform_indices = @transform_2, window_bounds = array<i64: 1, 128>}, {pipeline_mode = #tpu.pipeline_mode<synchronous>, transform_indices = @transform_3, window_bounds = array<i64: 128, 128>}, {transform_indices = @transform_4, window_bounds = array<i64: 256, 128>}, {pipeline_mode = #tpu.pipeline_mode<synchronous>, transform_indices = @transform_5, window_bounds = array<i64: 1, 128>}, {pipeline_mode = #tpu.pipeline_mode<synchronous>, transform_indices = @transform_6, window_bounds = array<i64: 1, 128>}]} {
    %c0_i32 = arith.constant 0 : i32
    %0 = arith.cmpi eq, %arg0, %c0_i32 : i32
    %1 = arith.extui %0 : i1 to i32
    %c0_i32_0 = arith.constant 0 : i32
    %2 = arith.cmpi ne, %1, %c0_i32_0 : i32
    scf.if %2 {
      %cst_21 = arith.constant 0.000000e+00 : f32
      %27 = vector.broadcast %cst_21 : f32 to vector<1x128xf32>
      %c0_22 = arith.constant 0 : index
      %c0_23 = arith.constant 0 : index
      %28 = vector.load %arg6[%c0_22, %c0_23] : memref<1x128xf32, #tpu.memory_space<vmem>>, vector<1x128xf32>
      tpu.vector_store %arg6[%c0_22, %c0_23], %27 {strides = array<i32>} : memref<1x128xf32, #tpu.memory_space<vmem>>, vector<1x128xf32>,
      %cst_24 = arith.constant 0.000000e+00 : f32
      %29 = vector.broadcast %cst_24 : f32 to vector<1x128xf32>
      %c0_25 = arith.constant 0 : index
      %c0_26 = arith.constant 0 : index
      %30 = vector.load %arg7[%c0_25, %c0_26] : memref<1x128xf32, #tpu.memory_space<vmem>>, vector<1x128xf32>
      tpu.vector_store %arg7[%c0_25, %c0_26], %29 {strides = array<i32>} : memref<1x128xf32, #tpu.memory_space<vmem>>, vector<1x128xf32>,
    } else {
    }
    %c0 = arith.constant 0 : index
    %c0_1 = arith.constant 0 : index
    %3 = vector.load %arg1[%c0, %c0_1] : memref<256x128xf32, #tpu.memory_space<vmem>>, vector<256x128xf32>
    %c0_2 = arith.constant 0 : index
    %c0_3 = arith.constant 0 : index
    %4 = vector.load %arg2[%c0_2, %c0_3] : memref<1x128xf32, #tpu.memory_space<vmem>>, vector<1x128xf32>
    %5 = vector.broadcast %4 : vector<1x128xf32> to vector<256x128xf32>
    %6 = arith.mulf %3, %5 : vector<256x128xf32>
    %c0_4 = arith.constant 0 : index
    %c0_5 = arith.constant 0 : index
    %7 = vector.load %arg3[%c0_4, %c0_5] : memref<1x128xf32, #tpu.memory_space<vmem>>, vector<1x128xf32>
    %8 = vector.broadcast %7 : vector<1x128xf32> to vector<256x128xf32>
    %9 = arith.addf %6, %8 : vector<256x128xf32>
    %cst = arith.constant 0.000000e+00 : f32
    %10 = vector.broadcast %cst : f32 to vector<256x128xf32>
    %11 = arith.maximumf %9, %10 : vector<256x128xf32>
    %12 = arith.truncf %11 : vector<256x128xf32> to vector<256x128xbf16>
    %c0_6 = arith.constant 0 : index
    %c0_7 = arith.constant 0 : index
    %13 = vector.load %arg4[%c0_6, %c0_7] : memref<128x128xbf16, #tpu.memory_space<vmem>>, vector<128x128xbf16>
    %cst_8 = arith.constant dense<0.000000e+00> : vector<256x128xf32>
    %14 = tpu.matmul %12, %13, %cst_8 {dimension_numbers = #tpu.dot_dimension_numbers<[1], [0], [0], [1], [0, 0, 1, 1], [], []>} : vector<256x128xbf16>, vector<128x128xbf16>, vector<256x128xf32> -> vector<256x128xf32>
    %c0_9 = arith.constant 0 : index
    %c0_10 = arith.constant 0 : index
    %15 = vector.load %arg5[%c0_9, %c0_10] : memref<256x128xf32, #tpu.memory_space<vmem>>, vector<256x128xf32>
    tpu.vector_store %arg5[%c0_9, %c0_10], %14 {strides = array<i32>} : memref<256x128xf32, #tpu.memory_space<vmem>>, vector<256x128xf32>,
    %c0_11 = arith.constant 0 : index
    %c0_12 = arith.constant 0 : index
    %16 = vector.load %arg6[%c0_11, %c0_12] : memref<1x128xf32, #tpu.memory_space<vmem>>, vector<1x128xf32>
    %cst_13 = arith.constant dense<0.000000e+00> : vector<128xf32>
    %17 = vector.multi_reduction <add>, %14, %cst_13 [0] : vector<256x128xf32> to vector<128xf32>
    %18 = vector.shape_cast %17 : vector<128xf32> to vector<1x128xf32>
    %19 = arith.addf %16, %18 : vector<1x128xf32>
    %c0_14 = arith.constant 0 : index
    %c0_15 = arith.constant 0 : index
    %20 = vector.load %arg6[%c0_14, %c0_15] : memref<1x128xf32, #tpu.memory_space<vmem>>, vector<1x128xf32>
    tpu.vector_store %arg6[%c0_14, %c0_15], %19 {strides = array<i32>} : memref<1x128xf32, #tpu.memory_space<vmem>>, vector<1x128xf32>,
    %c0_16 = arith.constant 0 : index
    %c0_17 = arith.constant 0 : index
    %21 = vector.load %arg7[%c0_16, %c0_17] : memref<1x128xf32, #tpu.memory_space<vmem>>, vector<1x128xf32>
    %22 = arith.mulf %14, %14 : vector<256x128xf32>
    %cst_18 = arith.constant dense<0.000000e+00> : vector<128xf32>
    %23 = vector.multi_reduction <add>, %22, %cst_18 [0] : vector<256x128xf32> to vector<128xf32>
    %24 = vector.shape_cast %23 : vector<128xf32> to vector<1x128xf32>
    %25 = arith.addf %21, %24 : vector<1x128xf32>
    %c0_19 = arith.constant 0 : index
    %c0_20 = arith.constant 0 : index
    %26 = vector.load %arg7[%c0_19, %c0_20] : memref<1x128xf32, #tpu.memory_space<vmem>>, vector<1x128xf32>
    tpu.vector_store %arg7[%c0_19, %c0_20], %25 {strides = array<i32>} : memref<1x128xf32, #tpu.memory_space<vmem>>, vector<1x128xf32>,
    return
  }
  func.func @transform_0(%arg0: i32) -> (i32, i32) {
    %c0_i32 = arith.constant 0 : i32
    %c0_i32_0 = arith.constant 0 : i32
    return %arg0, %c0_i32 : i32, i32
  }
  func.func @transform_1(%arg0: i32) -> (i32, i32) {
    %c0_i32 = arith.constant 0 : i32
    %c0_i32_0 = arith.constant 0 : i32
    %c0_i32_1 = arith.constant 0 : i32
    return %c0_i32, %c0_i32_0 : i32, i32
  }
  func.func @transform_2(%arg0: i32) -> (i32, i32) {
    %c0_i32 = arith.constant 0 : i32
    %c0_i32_0 = arith.constant 0 : i32
    %c0_i32_1 = arith.constant 0 : i32
    return %c0_i32, %c0_i32_0 : i32, i32
  }
  func.func @transform_3(%arg0: i32) -> (i32, i32) {
    %c0_i32 = arith.constant 0 : i32
    %c0_i32_0 = arith.constant 0 : i32
    %c0_i32_1 = arith.constant 0 : i32
    return %c0_i32, %c0_i32_0 : i32, i32
  }
  func.func @transform_4(%arg0: i32) -> (i32, i32) {
    %c0_i32 = arith.constant 0 : i32
    %c0_i32_0 = arith.constant 0 : i32
    return %arg0, %c0_i32 : i32, i32
  }
  func.func @transform_5(%arg0: i32) -> (i32, i32) {
    %c0_i32 = arith.constant 0 : i32
    %c0_i32_0 = arith.constant 0 : i32
    %c0_i32_1 = arith.constant 0 : i32
    return %c0_i32, %c0_i32_0 : i32, i32
  }
  func.func @transform_6(%arg0: i32) -> (i32, i32) {
    %c0_i32 = arith.constant 0 : i32
    %c0_i32_0 = arith.constant 0 : i32
    %c0_i32_1 = arith.constant 0 : i32
    return %c0_i32, %c0_i32_0 : i32, i32
  }
}

module attributes {stable_mosaic.version = 11 : i64} {
  func.func @_stage_b_kernel(%arg0: i32, %arg1: memref<1x16x16x128xf32, #tpu.memory_space<vmem>>, %arg2: memref<1x128xf32, #tpu.memory_space<vmem>>, %arg3: memref<1x128xf32, #tpu.memory_space<vmem>>, %arg4: memref<1152x128xbf16, #tpu.memory_space<vmem>>, %arg5: memref<1x16x16x128xf32, #tpu.memory_space<vmem>>, %arg6: memref<1x128xf32, #tpu.memory_space<vmem>>, %arg7: memref<1x128xf32, #tpu.memory_space<vmem>>, %arg8: memref<18x18x128xf32, #tpu.memory_space<vmem>>, %arg9: memref<256x1152xbf16, #tpu.memory_space<vmem>>) attributes {dimension_semantics = [#tpu.dimension_semantics<arbitrary>], iteration_bounds = array<i64: 2>, scalar_prefetch = 0 : i64, scratch_operands = 2 : i64, tpu.core_type = #tpu.core_type<tc>, window_params = [{transform_indices = @transform_0, window_bounds = array<i64: 1, 16, 16, 128>}, {pipeline_mode = #tpu.pipeline_mode<synchronous>, transform_indices = @transform_1, window_bounds = array<i64: 1, 128>}, {pipeline_mode = #tpu.pipeline_mode<synchronous>, transform_indices = @transform_2, window_bounds = array<i64: 1, 128>}, {pipeline_mode = #tpu.pipeline_mode<synchronous>, transform_indices = @transform_3, window_bounds = array<i64: 1152, 128>}, {transform_indices = @transform_4, window_bounds = array<i64: 1, 16, 16, 128>}, {pipeline_mode = #tpu.pipeline_mode<synchronous>, transform_indices = @transform_5, window_bounds = array<i64: 1, 128>}, {pipeline_mode = #tpu.pipeline_mode<synchronous>, transform_indices = @transform_6, window_bounds = array<i64: 1, 128>}]} {
    %c0_i32 = arith.constant 0 : i32
    %0 = arith.cmpi eq, %arg0, %c0_i32 : i32
    %1 = arith.extui %0 : i1 to i32
    %c0_i32_0 = arith.constant 0 : i32
    %2 = arith.cmpi ne, %1, %c0_i32_0 : i32
    scf.if %2 {
      %cst_65 = arith.constant 0.000000e+00 : f32
      %68 = vector.broadcast %cst_65 : f32 to vector<1x128xf32>
      %c0_66 = arith.constant 0 : index
      %c0_67 = arith.constant 0 : index
      %69 = vector.load %arg6[%c0_66, %c0_67] : memref<1x128xf32, #tpu.memory_space<vmem>>, vector<1x128xf32>
      tpu.vector_store %arg6[%c0_66, %c0_67], %68 {strides = array<i32>} : memref<1x128xf32, #tpu.memory_space<vmem>>, vector<1x128xf32>,
      %cst_68 = arith.constant 0.000000e+00 : f32
      %70 = vector.broadcast %cst_68 : f32 to vector<1x128xf32>
      %c0_69 = arith.constant 0 : index
      %c0_70 = arith.constant 0 : index
      %71 = vector.load %arg7[%c0_69, %c0_70] : memref<1x128xf32, #tpu.memory_space<vmem>>, vector<1x128xf32>
      tpu.vector_store %arg7[%c0_69, %c0_70], %70 {strides = array<i32>} : memref<1x128xf32, #tpu.memory_space<vmem>>, vector<1x128xf32>,
      %cst_71 = arith.constant 0.000000e+00 : f32
      %72 = vector.broadcast %cst_71 : f32 to vector<18x18x128xf32>
      %c0_72 = arith.constant 0 : index
      %c0_73 = arith.constant 0 : index
      %c0_74 = arith.constant 0 : index
      %73 = vector.load %arg8[%c0_72, %c0_73, %c0_74] : memref<18x18x128xf32, #tpu.memory_space<vmem>>, vector<18x18x128xf32>
      tpu.vector_store %arg8[%c0_72, %c0_73, %c0_74], %72 {strides = array<i32>} : memref<18x18x128xf32, #tpu.memory_space<vmem>>, vector<18x18x128xf32>,
    } else {
    }
    %c0 = arith.constant 0 : index
    %c0_1 = arith.constant 0 : index
    %3 = vector.load %arg2[%c0, %c0_1] : memref<1x128xf32, #tpu.memory_space<vmem>>, vector<1x128xf32>
    %4 = vector.shape_cast %3 : vector<1x128xf32> to vector<1x1x1x128xf32>
    %c0_2 = arith.constant 0 : index
    %c0_3 = arith.constant 0 : index
    %5 = vector.load %arg3[%c0_2, %c0_3] : memref<1x128xf32, #tpu.memory_space<vmem>>, vector<1x128xf32>
    %6 = vector.shape_cast %5 : vector<1x128xf32> to vector<1x1x1x128xf32>
    %c0_4 = arith.constant 0 : index
    %c0_5 = arith.constant 0 : index
    %c0_6 = arith.constant 0 : index
    %c0_7 = arith.constant 0 : index
    %7 = vector.load %arg1[%c0_4, %c0_5, %c0_6, %c0_7] : memref<1x16x16x128xf32, #tpu.memory_space<vmem>>, vector<1x16x16x128xf32>
    %8 = vector.broadcast %4 : vector<1x1x1x128xf32> to vector<1x16x16x128xf32>
    %9 = arith.mulf %7, %8 : vector<1x16x16x128xf32>
    %10 = vector.broadcast %6 : vector<1x1x1x128xf32> to vector<1x16x16x128xf32>
    %11 = arith.addf %9, %10 : vector<1x16x16x128xf32>
    %cst = arith.constant 0.000000e+00 : f32
    %12 = vector.broadcast %cst : f32 to vector<1x16x16x128xf32>
    %13 = arith.maximumf %11, %12 : vector<1x16x16x128xf32>
    %14 = vector.shape_cast %13 : vector<1x16x16x128xf32> to vector<16x16x128xf32>
    %c1 = arith.constant 1 : index
    %c1_8 = arith.constant 1 : index
    %c0_9 = arith.constant 0 : index
    %15 = vector.load %arg8[%c1, %c1_8, %c0_9] : memref<18x18x128xf32, #tpu.memory_space<vmem>>, vector<16x16x128xf32>
    tpu.vector_store %arg8[%c1, %c1_8, %c0_9], %14 {strides = array<i32>} : memref<18x18x128xf32, #tpu.memory_space<vmem>>, vector<16x16x128xf32>,
    %c0_10 = arith.constant 0 : index
    %c0_11 = arith.constant 0 : index
    %c0_12 = arith.constant 0 : index
    %16 = vector.load %arg8[%c0_10, %c0_11, %c0_12] : memref<18x18x128xf32, #tpu.memory_space<vmem>>, vector<16x16x128xf32>
    %17 = vector.shape_cast %16 : vector<16x16x128xf32> to vector<256x128xf32>
    %18 = arith.truncf %17 : vector<256x128xf32> to vector<256x128xbf16>
    %c0_13 = arith.constant 0 : index
    %c0_14 = arith.constant 0 : index
    %19 = vector.load %arg9[%c0_13, %c0_14] : memref<256x1152xbf16, #tpu.memory_space<vmem>>, vector<256x128xbf16>
    tpu.vector_store %arg9[%c0_13, %c0_14], %18 {strides = array<i32>} : memref<256x1152xbf16, #tpu.memory_space<vmem>>, vector<256x128xbf16>,
    %c0_15 = arith.constant 0 : index
    %c1_16 = arith.constant 1 : index
    %c0_17 = arith.constant 0 : index
    %20 = vector.load %arg8[%c0_15, %c1_16, %c0_17] : memref<18x18x128xf32, #tpu.memory_space<vmem>>, vector<16x16x128xf32>
    %21 = vector.shape_cast %20 : vector<16x16x128xf32> to vector<256x128xf32>
    %22 = arith.truncf %21 : vector<256x128xf32> to vector<256x128xbf16>
    %c0_18 = arith.constant 0 : index
    %c128 = arith.constant 128 : index
    %23 = vector.load %arg9[%c0_18, %c128] : memref<256x1152xbf16, #tpu.memory_space<vmem>>, vector<256x128xbf16>
    tpu.vector_store %arg9[%c0_18, %c128], %22 {strides = array<i32>} : memref<256x1152xbf16, #tpu.memory_space<vmem>>, vector<256x128xbf16>,
    %c0_19 = arith.constant 0 : index
    %c2 = arith.constant 2 : index
    %c0_20 = arith.constant 0 : index
    %24 = vector.load %arg8[%c0_19, %c2, %c0_20] : memref<18x18x128xf32, #tpu.memory_space<vmem>>, vector<16x16x128xf32>
    %25 = vector.shape_cast %24 : vector<16x16x128xf32> to vector<256x128xf32>
    %26 = arith.truncf %25 : vector<256x128xf32> to vector<256x128xbf16>
    %c0_21 = arith.constant 0 : index
    %c256 = arith.constant 256 : index
    %27 = vector.load %arg9[%c0_21, %c256] : memref<256x1152xbf16, #tpu.memory_space<vmem>>, vector<256x128xbf16>
    tpu.vector_store %arg9[%c0_21, %c256], %26 {strides = array<i32>} : memref<256x1152xbf16, #tpu.memory_space<vmem>>, vector<256x128xbf16>,
    %c1_22 = arith.constant 1 : index
    %c0_23 = arith.constant 0 : index
    %c0_24 = arith.constant 0 : index
    %28 = vector.load %arg8[%c1_22, %c0_23, %c0_24] : memref<18x18x128xf32, #tpu.memory_space<vmem>>, vector<16x16x128xf32>
    %29 = vector.shape_cast %28 : vector<16x16x128xf32> to vector<256x128xf32>
    %30 = arith.truncf %29 : vector<256x128xf32> to vector<256x128xbf16>
    %c0_25 = arith.constant 0 : index
    %c384 = arith.constant 384 : index
    %31 = vector.load %arg9[%c0_25, %c384] : memref<256x1152xbf16, #tpu.memory_space<vmem>>, vector<256x128xbf16>
    tpu.vector_store %arg9[%c0_25, %c384], %30 {strides = array<i32>} : memref<256x1152xbf16, #tpu.memory_space<vmem>>, vector<256x128xbf16>,
    %c1_26 = arith.constant 1 : index
    %c1_27 = arith.constant 1 : index
    %c0_28 = arith.constant 0 : index
    %32 = vector.load %arg8[%c1_26, %c1_27, %c0_28] : memref<18x18x128xf32, #tpu.memory_space<vmem>>, vector<16x16x128xf32>
    %33 = vector.shape_cast %32 : vector<16x16x128xf32> to vector<256x128xf32>
    %34 = arith.truncf %33 : vector<256x128xf32> to vector<256x128xbf16>
    %c0_29 = arith.constant 0 : index
    %c512 = arith.constant 512 : index
    %35 = vector.load %arg9[%c0_29, %c512] : memref<256x1152xbf16, #tpu.memory_space<vmem>>, vector<256x128xbf16>
    tpu.vector_store %arg9[%c0_29, %c512], %34 {strides = array<i32>} : memref<256x1152xbf16, #tpu.memory_space<vmem>>, vector<256x128xbf16>,
    %c1_30 = arith.constant 1 : index
    %c2_31 = arith.constant 2 : index
    %c0_32 = arith.constant 0 : index
    %36 = vector.load %arg8[%c1_30, %c2_31, %c0_32] : memref<18x18x128xf32, #tpu.memory_space<vmem>>, vector<16x16x128xf32>
    %37 = vector.shape_cast %36 : vector<16x16x128xf32> to vector<256x128xf32>
    %38 = arith.truncf %37 : vector<256x128xf32> to vector<256x128xbf16>
    %c0_33 = arith.constant 0 : index
    %c640 = arith.constant 640 : index
    %39 = vector.load %arg9[%c0_33, %c640] : memref<256x1152xbf16, #tpu.memory_space<vmem>>, vector<256x128xbf16>
    tpu.vector_store %arg9[%c0_33, %c640], %38 {strides = array<i32>} : memref<256x1152xbf16, #tpu.memory_space<vmem>>, vector<256x128xbf16>,
    %c2_34 = arith.constant 2 : index
    %c0_35 = arith.constant 0 : index
    %c0_36 = arith.constant 0 : index
    %40 = vector.load %arg8[%c2_34, %c0_35, %c0_36] : memref<18x18x128xf32, #tpu.memory_space<vmem>>, vector<16x16x128xf32>
    %41 = vector.shape_cast %40 : vector<16x16x128xf32> to vector<256x128xf32>
    %42 = arith.truncf %41 : vector<256x128xf32> to vector<256x128xbf16>
    %c0_37 = arith.constant 0 : index
    %c768 = arith.constant 768 : index
    %43 = vector.load %arg9[%c0_37, %c768] : memref<256x1152xbf16, #tpu.memory_space<vmem>>, vector<256x128xbf16>
    tpu.vector_store %arg9[%c0_37, %c768], %42 {strides = array<i32>} : memref<256x1152xbf16, #tpu.memory_space<vmem>>, vector<256x128xbf16>,
    %c2_38 = arith.constant 2 : index
    %c1_39 = arith.constant 1 : index
    %c0_40 = arith.constant 0 : index
    %44 = vector.load %arg8[%c2_38, %c1_39, %c0_40] : memref<18x18x128xf32, #tpu.memory_space<vmem>>, vector<16x16x128xf32>
    %45 = vector.shape_cast %44 : vector<16x16x128xf32> to vector<256x128xf32>
    %46 = arith.truncf %45 : vector<256x128xf32> to vector<256x128xbf16>
    %c0_41 = arith.constant 0 : index
    %c896 = arith.constant 896 : index
    %47 = vector.load %arg9[%c0_41, %c896] : memref<256x1152xbf16, #tpu.memory_space<vmem>>, vector<256x128xbf16>
    tpu.vector_store %arg9[%c0_41, %c896], %46 {strides = array<i32>} : memref<256x1152xbf16, #tpu.memory_space<vmem>>, vector<256x128xbf16>,
    %c2_42 = arith.constant 2 : index
    %c2_43 = arith.constant 2 : index
    %c0_44 = arith.constant 0 : index
    %48 = vector.load %arg8[%c2_42, %c2_43, %c0_44] : memref<18x18x128xf32, #tpu.memory_space<vmem>>, vector<16x16x128xf32>
    %49 = vector.shape_cast %48 : vector<16x16x128xf32> to vector<256x128xf32>
    %50 = arith.truncf %49 : vector<256x128xf32> to vector<256x128xbf16>
    %c0_45 = arith.constant 0 : index
    %c1024 = arith.constant 1024 : index
    %51 = vector.load %arg9[%c0_45, %c1024] : memref<256x1152xbf16, #tpu.memory_space<vmem>>, vector<256x128xbf16>
    tpu.vector_store %arg9[%c0_45, %c1024], %50 {strides = array<i32>} : memref<256x1152xbf16, #tpu.memory_space<vmem>>, vector<256x128xbf16>,
    %c0_46 = arith.constant 0 : index
    %c0_47 = arith.constant 0 : index
    %52 = vector.load %arg9[%c0_46, %c0_47] : memref<256x1152xbf16, #tpu.memory_space<vmem>>, vector<256x1152xbf16>
    %c0_48 = arith.constant 0 : index
    %c0_49 = arith.constant 0 : index
    %53 = vector.load %arg4[%c0_48, %c0_49] : memref<1152x128xbf16, #tpu.memory_space<vmem>>, vector<1152x128xbf16>
    %cst_50 = arith.constant dense<0.000000e+00> : vector<256x128xf32>
    %54 = tpu.matmul %52, %53, %cst_50 {dimension_numbers = #tpu.dot_dimension_numbers<[1], [0], [0], [1], [0, 0, 1, 1], [], []>} : vector<256x1152xbf16>, vector<1152x128xbf16>, vector<256x128xf32> -> vector<256x128xf32>
    %55 = vector.shape_cast %54 : vector<256x128xf32> to vector<1x16x16x128xf32>
    %c0_51 = arith.constant 0 : index
    %c0_52 = arith.constant 0 : index
    %c0_53 = arith.constant 0 : index
    %c0_54 = arith.constant 0 : index
    %56 = vector.load %arg5[%c0_51, %c0_52, %c0_53, %c0_54] : memref<1x16x16x128xf32, #tpu.memory_space<vmem>>, vector<1x16x16x128xf32>
    tpu.vector_store %arg5[%c0_51, %c0_52, %c0_53, %c0_54], %55 {strides = array<i32>} : memref<1x16x16x128xf32, #tpu.memory_space<vmem>>, vector<1x16x16x128xf32>,
    %c0_55 = arith.constant 0 : index
    %c0_56 = arith.constant 0 : index
    %57 = vector.load %arg6[%c0_55, %c0_56] : memref<1x128xf32, #tpu.memory_space<vmem>>, vector<1x128xf32>
    %cst_57 = arith.constant dense<0.000000e+00> : vector<128xf32>
    %58 = vector.multi_reduction <add>, %54, %cst_57 [0] : vector<256x128xf32> to vector<128xf32>
    %59 = vector.shape_cast %58 : vector<128xf32> to vector<1x128xf32>
    %60 = arith.addf %57, %59 : vector<1x128xf32>
    %c0_58 = arith.constant 0 : index
    %c0_59 = arith.constant 0 : index
    %61 = vector.load %arg6[%c0_58, %c0_59] : memref<1x128xf32, #tpu.memory_space<vmem>>, vector<1x128xf32>
    tpu.vector_store %arg6[%c0_58, %c0_59], %60 {strides = array<i32>} : memref<1x128xf32, #tpu.memory_space<vmem>>, vector<1x128xf32>,
    %c0_60 = arith.constant 0 : index
    %c0_61 = arith.constant 0 : index
    %62 = vector.load %arg7[%c0_60, %c0_61] : memref<1x128xf32, #tpu.memory_space<vmem>>, vector<1x128xf32>
    %63 = arith.mulf %54, %54 : vector<256x128xf32>
    %cst_62 = arith.constant dense<0.000000e+00> : vector<128xf32>
    %64 = vector.multi_reduction <add>, %63, %cst_62 [0] : vector<256x128xf32> to vector<128xf32>
    %65 = vector.shape_cast %64 : vector<128xf32> to vector<1x128xf32>
    %66 = arith.addf %62, %65 : vector<1x128xf32>
    %c0_63 = arith.constant 0 : index
    %c0_64 = arith.constant 0 : index
    %67 = vector.load %arg7[%c0_63, %c0_64] : memref<1x128xf32, #tpu.memory_space<vmem>>, vector<1x128xf32>
    tpu.vector_store %arg7[%c0_63, %c0_64], %66 {strides = array<i32>} : memref<1x128xf32, #tpu.memory_space<vmem>>, vector<1x128xf32>,
    return
  }
  func.func @transform_0(%arg0: i32) -> (i32, i32, i32, i32) {
    %c0_i32 = arith.constant 0 : i32
    %c0_i32_0 = arith.constant 0 : i32
    %c0_i32_1 = arith.constant 0 : i32
    %c0_i32_2 = arith.constant 0 : i32
    return %arg0, %c0_i32, %c0_i32_0, %c0_i32_1 : i32, i32, i32, i32
  }
  func.func @transform_1(%arg0: i32) -> (i32, i32) {
    %c0_i32 = arith.constant 0 : i32
    %c0_i32_0 = arith.constant 0 : i32
    %c0_i32_1 = arith.constant 0 : i32
    return %c0_i32, %c0_i32_0 : i32, i32
  }
  func.func @transform_2(%arg0: i32) -> (i32, i32) {
    %c0_i32 = arith.constant 0 : i32
    %c0_i32_0 = arith.constant 0 : i32
    %c0_i32_1 = arith.constant 0 : i32
    return %c0_i32, %c0_i32_0 : i32, i32
  }
  func.func @transform_3(%arg0: i32) -> (i32, i32) {
    %c0_i32 = arith.constant 0 : i32
    %c0_i32_0 = arith.constant 0 : i32
    %c0_i32_1 = arith.constant 0 : i32
    return %c0_i32, %c0_i32_0 : i32, i32
  }
  func.func @transform_4(%arg0: i32) -> (i32, i32, i32, i32) {
    %c0_i32 = arith.constant 0 : i32
    %c0_i32_0 = arith.constant 0 : i32
    %c0_i32_1 = arith.constant 0 : i32
    %c0_i32_2 = arith.constant 0 : i32
    return %arg0, %c0_i32, %c0_i32_0, %c0_i32_1 : i32, i32, i32, i32
  }
  func.func @transform_5(%arg0: i32) -> (i32, i32) {
    %c0_i32 = arith.constant 0 : i32
    %c0_i32_0 = arith.constant 0 : i32
    %c0_i32_1 = arith.constant 0 : i32
    return %c0_i32, %c0_i32_0 : i32, i32
  }
  func.func @transform_6(%arg0: i32) -> (i32, i32) {
    %c0_i32 = arith.constant 0 : i32
    %c0_i32_0 = arith.constant 0 : i32
    %c0_i32_1 = arith.constant 0 : i32
    return %c0_i32, %c0_i32_0 : i32, i32
  }
}

module attributes {stable_mosaic.version = 11 : i64} {
  func.func @_stage_d_kernel(%arg0: i32, %arg1: memref<256x128xf32, #tpu.memory_space<vmem>>, %arg2: memref<256x128xf32, #tpu.memory_space<vmem>>, %arg3: memref<1x128xf32, #tpu.memory_space<vmem>>, %arg4: memref<1x128xf32, #tpu.memory_space<vmem>>, %arg5: memref<1x128xf32, #tpu.memory_space<vmem>>, %arg6: memref<1x128xf32, #tpu.memory_space<vmem>>, %arg7: memref<256x128xf32, #tpu.memory_space<vmem>>) attributes {dimension_semantics = [#tpu.dimension_semantics<parallel>], iteration_bounds = array<i64: 2>, scalar_prefetch = 0 : i64, scratch_operands = 0 : i64, tpu.core_type = #tpu.core_type<tc>, window_params = [{transform_indices = @transform_0, window_bounds = array<i64: 256, 128>}, {transform_indices = @transform_1, window_bounds = array<i64: 256, 128>}, {pipeline_mode = #tpu.pipeline_mode<synchronous>, transform_indices = @transform_2, window_bounds = array<i64: 1, 128>}, {pipeline_mode = #tpu.pipeline_mode<synchronous>, transform_indices = @transform_3, window_bounds = array<i64: 1, 128>}, {pipeline_mode = #tpu.pipeline_mode<synchronous>, transform_indices = @transform_4, window_bounds = array<i64: 1, 128>}, {pipeline_mode = #tpu.pipeline_mode<synchronous>, transform_indices = @transform_5, window_bounds = array<i64: 1, 128>}, {transform_indices = @transform_6, window_bounds = array<i64: 256, 128>}]} {
    %c0 = arith.constant 0 : index
    %c0_0 = arith.constant 0 : index
    %0 = vector.load %arg1[%c0, %c0_0] : memref<256x128xf32, #tpu.memory_space<vmem>>, vector<256x128xf32>
    %c0_1 = arith.constant 0 : index
    %c0_2 = arith.constant 0 : index
    %1 = vector.load %arg3[%c0_1, %c0_2] : memref<1x128xf32, #tpu.memory_space<vmem>>, vector<1x128xf32>
    %2 = vector.broadcast %1 : vector<1x128xf32> to vector<256x128xf32>
    %3 = arith.mulf %0, %2 : vector<256x128xf32>
    %c0_3 = arith.constant 0 : index
    %c0_4 = arith.constant 0 : index
    %4 = vector.load %arg4[%c0_3, %c0_4] : memref<1x128xf32, #tpu.memory_space<vmem>>, vector<1x128xf32>
    %5 = vector.broadcast %4 : vector<1x128xf32> to vector<256x128xf32>
    %6 = arith.addf %3, %5 : vector<256x128xf32>
    %c0_5 = arith.constant 0 : index
    %c0_6 = arith.constant 0 : index
    %7 = vector.load %arg2[%c0_5, %c0_6] : memref<256x128xf32, #tpu.memory_space<vmem>>, vector<256x128xf32>
    %c0_7 = arith.constant 0 : index
    %c0_8 = arith.constant 0 : index
    %8 = vector.load %arg5[%c0_7, %c0_8] : memref<1x128xf32, #tpu.memory_space<vmem>>, vector<1x128xf32>
    %9 = vector.broadcast %8 : vector<1x128xf32> to vector<256x128xf32>
    %10 = arith.mulf %7, %9 : vector<256x128xf32>
    %11 = arith.addf %6, %10 : vector<256x128xf32>
    %c0_9 = arith.constant 0 : index
    %c0_10 = arith.constant 0 : index
    %12 = vector.load %arg6[%c0_9, %c0_10] : memref<1x128xf32, #tpu.memory_space<vmem>>, vector<1x128xf32>
    %13 = vector.broadcast %12 : vector<1x128xf32> to vector<256x128xf32>
    %14 = arith.addf %11, %13 : vector<256x128xf32>
    %cst = arith.constant 0.000000e+00 : f32
    %15 = vector.broadcast %cst : f32 to vector<256x128xf32>
    %16 = arith.maximumf %14, %15 : vector<256x128xf32>
    %c0_11 = arith.constant 0 : index
    %c0_12 = arith.constant 0 : index
    %17 = vector.load %arg7[%c0_11, %c0_12] : memref<256x128xf32, #tpu.memory_space<vmem>>, vector<256x128xf32>
    tpu.vector_store %arg7[%c0_11, %c0_12], %16 {strides = array<i32>} : memref<256x128xf32, #tpu.memory_space<vmem>>, vector<256x128xf32>,
    return
  }
  func.func @transform_0(%arg0: i32) -> (i32, i32) {
    %c0_i32 = arith.constant 0 : i32
    %c0_i32_0 = arith.constant 0 : i32
    return %arg0, %c0_i32 : i32, i32
  }
  func.func @transform_1(%arg0: i32) -> (i32, i32) {
    %c0_i32 = arith.constant 0 : i32
    %c0_i32_0 = arith.constant 0 : i32
    return %arg0, %c0_i32 : i32, i32
  }
  func.func @transform_2(%arg0: i32) -> (i32, i32) {
    %c0_i32 = arith.constant 0 : i32
    %c0_i32_0 = arith.constant 0 : i32
    %c0_i32_1 = arith.constant 0 : i32
    return %c0_i32, %c0_i32_0 : i32, i32
  }
  func.func @transform_3(%arg0: i32) -> (i32, i32) {
    %c0_i32 = arith.constant 0 : i32
    %c0_i32_0 = arith.constant 0 : i32
    %c0_i32_1 = arith.constant 0 : i32
    return %c0_i32, %c0_i32_0 : i32, i32
  }
  func.func @transform_4(%arg0: i32) -> (i32, i32) {
    %c0_i32 = arith.constant 0 : i32
    %c0_i32_0 = arith.constant 0 : i32
    %c0_i32_1 = arith.constant 0 : i32
    return %c0_i32, %c0_i32_0 : i32, i32
  }
  func.func @transform_5(%arg0: i32) -> (i32, i32) {
    %c0_i32 = arith.constant 0 : i32
    %c0_i32_0 = arith.constant 0 : i32
    %c0_i32_1 = arith.constant 0 : i32
    return %c0_i32, %c0_i32_0 : i32, i32
  }
  func.func @transform_6(%arg0: i32) -> (i32, i32) {
    %c0_i32 = arith.constant 0 : i32
    %c0_i32_0 = arith.constant 0 : i32
    return %arg0, %c0_i32 : i32, i32
  }
}

</mosaic_0001>

<bundles_post_ra>
// kernel: bottleneck_pallas.4
= control target key start
LH: loop header
LB: loop body
LE: loop exit
PB: predicated region body
PF: predicated region fallthrough
CT: control target
= control target key end

     0   :  { %s1162_s24 = smov 0   ;;  %s1576_s0 = inlined_call_operand.vmem [shape: f32[512,128], index: 0, kind: input, shape index: {}]   ;;  %s1577_s1 = inlined_call_operand.vmem [shape: bf16[128,256], index: 1, kind: input, shape index: {}]   ;;  %s1578_s2 = inlined_call_operand.vmem [shape: f32[512,128], index: 2, kind: output, shape index: {0}]   ;;  %s1579_s3 = inlined_call_operand.vmem [shape: f32[512,128], index: 3, kind: output, shape index: {1}]   ;;  %s1580_s4 = inlined_call_operand.vmem [shape: f32[1,128], index: 4, kind: output, shape index: {2}]   ;;  %s1581_s5 = inlined_call_operand.vmem [shape: f32[1,128], index: 5, kind: output, shape index: {3}]   ;;  %s1582_s6 = inlined_call_operand.vmem [shape: f32[1,128], index: 6, kind: output, shape index: {4}]   ;;  %s1583_s7 = inlined_call_operand.vmem [shape: f32[1,128], index: 7, kind: output, shape index: {5}]  }
   0x1 LB: > { %s1032_s25 = sadd.s32 4294967295, %s1118_s24   ;;  %p1036_p0 = scmp.ge.s32.totalorder %s1118_s24, 1  ;;  %s1118_s24 = sphi %s1162_s24, %s18_s24  }
   0x2   : > { %p229_p1 = scmp.lt.s32.totalorder %s1118_s24, 3 }
   0x4   : > { %p230_p2 = pnand %p1036_p0, %p229_p1 }
   0x5   : > { %s1037_s26 = sshll.u32 (!%p230_p2), %s1032_s25, 5  ;;  %p1043_p4 = scmp.ne.s32.totalorder (!%p230_p2), %s1032_s25, 0 }
   0x6   : > { %233 = sbr.rel (%p230_p2) target bundleno = 376 (0x178), region = 28  ;;  %p267_p3 = scmp.lt.s32.totalorder (!%p230_p2), %s1037_s26, 63 }
   0xd   : > { %s1585_s26 = smov (!%p267_p3, %s1037_s26), 63  ;;  %288 = sbr.rel (%p1043_p4) target bundleno = 20 (0x14), region = 32 }
   0xe   : > { %s1038_s27 = sshll.u32 %s1585_s26, 3  ;;  %v1120_v0 = vmov (!%p1043_p4), 0.0  }
   0xf   : > { %s1173_s30 = scalar_lea.vmem %s1576_s0, %s1038_s27  ;;  %s1178_s10 = scalar_lea.vmem %s1578_s2, %s1038_s27  ;;  %289 = vst [vmem:[%s1580_s4] sm:$0x1] (!%p1043_p4), %v1120_v0  ;;  %290 = vst [vmem:[%s1581_s5] sm:$0x1] (!%p1043_p4), %v1120_v0 }
  0x10   : > { %s1183_s13 = scalar_lea.vmem %s1579_s3, %s1038_s27  ;;  %291 = vst [vmem:[%s1582_s6] sm:$0x1] (!%p1043_p4), %v1120_v0  ;;  %292 = vst [vmem:[%s1583_s7] sm:$0x1] (!%p1043_p4), %v1120_v0 }
  0x14 PF: > { %v1088_v1 = vld [vmem:[%s1577_s1 + $0x4] ss:$8 sps:$4 sm:$0xff]   ;;  %v1090_v2 = vld [vmem:[%s1577_s1] ss:$8 sps:$4 sm:$0xff]   ;;  %v1121_v3 = vmov 0   ;;  %v295_v24 = vld [vmem:[%s1173_s30 + $0x10] sm:$0xff] }
  0x15   : > { %469 = vmatprep.mubr.bf16.mxu0 %v1121_v3  ;;  %549 = vmatprep.mubr.bf16.mxu1 %v1121_v3  ;;  %v1091_v4 = vld [vmem:[%s1577_s1 + $0x14] ss:$8 sps:$4 sm:$0xff]   ;;  %v1093_v5 = vld [vmem:[%s1577_s1 + $0x10] ss:$8 sps:$4 sm:$0xff]   ;;  %v1094_v6 = vld [vmem:[%s1577_s1 + $0x24] ss:$8 sps:$4 sm:$0xff]  }
  0x16   : > { %437 = vmatprep.subr.bf16.mxu0 %v1088_v1  ;;  %1062 = vmatprep.subr.bf16.mxu1 %v1088_v1  ;;  %v1096_v7 = vld [vmem:[%s1577_s1 + $0x20] ss:$8 sps:$4 sm:$0xff]   ;;  %v1097_v8 = vld [vmem:[%s1577_s1 + $0x34] ss:$8 sps:$4 sm:$0xff]   ;;  %v1099_v9 = vld [vmem:[%s1577_s1 + $0x30] ss:$8 sps:$4 sm:$0xff]  }
  0x17   : > { %438 = vmatpush1.bf16.msra.mxu0 %v1090_v2  ;;  %1070 = vmatpush1.bf16.msra.mxu1 %v1090_v2  ;;  %v1100_v10 = vld [vmem:[%s1577_s1 + $0x44] ss:$8 sps:$4 sm:$0xff]   ;;  %v1102_v11 = vld [vmem:[%s1577_s1 + $0x40] ss:$8 sps:$4 sm:$0xff]   ;;  %v1103_v12 = vld [vmem:[%s1577_s1 + $0x54] ss:$8 sps:$4 sm:$0xff]  }
  0x18   : > { %439 = vmatprep.subr.bf16.mxu0 %v1091_v4  ;;  %1063 = vmatprep.subr.bf16.mxu1 %v1091_v4  ;;  %v1105_v13 = vld [vmem:[%s1577_s1 + $0x50] ss:$8 sps:$4 sm:$0xff]   ;;  %v1106_v14 = vld [vmem:[%s1577_s1 + $0x64] ss:$8 sps:$4 sm:$0xff]   ;;  %v1108_v15 = vld [vmem:[%s1577_s1 + $0x60] ss:$8 sps:$4 sm:$0xff]  }
  0x19   : > { %v1109_v16 = vld [vmem:[%s1577_s1 + $0x74] ss:$8 sps:$4 sm:$0xff]   ;;  %v1111_v17 = vld [vmem:[%s1577_s1 + $0x70] ss:$8 sps:$4 sm:$0xff]   ;;  %v293_v18 = vld [vmem:[%s1173_s30] sm:$0xff] }
  0x1a   : > { %v294_v19 = vld [vmem:[%s1173_s30 + $0x8] sm:$0xff]  ;;  %v309_v20 = vld [vmem:[%s1173_s30 + $0x80] sm:$0xff]  ;;  %v296_v25 = vld [vmem:[%s1173_s30 + $0x18] sm:$0xff] }
  0x1b   : > { %440 = vmatpush1.bf16.msra.mxu0 %v1093_v5  ;;  %1071 = vmatpush1.bf16.msra.mxu1 %v1093_v5  ;;  %v310_v21 = vld [vmem:[%s1173_s30 + $0x88] sm:$0xff]  ;;  %v325_v22 = vpack.c.bf16 %v294_v19, %v293_v18  ;;  %v311_v26 = vld [vmem:[%s1173_s30 + $0x90] sm:$0xff]  ;;  %v312_v27 = vld [vmem:[%s1173_s30 + $0x98] sm:$0xff]  ;;  %v326_v28 = vpack.c.bf16 %v296_v25, %v295_v24 }
  0x1c   : > { %441 = vmatprep.subr.bf16.mxu0 %v1094_v6  ;;  %1064 = vmatprep.subr.bf16.mxu1 %v1094_v6  ;;  %v333_v23 = vpack.c.bf16 %v310_v21, %v309_v20  ;;  %v334_v29 = vpack.c.bf16 %v312_v27, %v311_v26  ;;  %v297_v30 = vld [vmem:[%s1173_s30 + $0x20] sm:$0xff]  ;;  %v298_v31 = vld [vmem:[%s1173_s30 + $0x28] sm:$0xff]  ;;  %v299_v36 = vld [vmem:[%s1173_s30 + $0x30] sm:$0xff] }
  0x1d   : > { %v313_v32 = vld [vmem:[%s1173_s30 + $0xa0] sm:$0xff]  ;;  %v314_v33 = vld [vmem:[%s1173_s30 + $0xa8] sm:$0xff]  ;;  %v327_v34 = vpack.c.bf16 %v298_v31, %v297_v30  ;;  %v300_v37 = vld [vmem:[%s1173_s30 + $0x38] sm:$0xff] }
  0x1e   : > { %v335_v35 = vpack.c.bf16 %v314_v33, %v313_v32  ;;  %v315_v38 = vld [vmem:[%s1173_s30 + $0xb0] sm:$0xff]  ;;  %v316_v39 = vld [vmem:[%s1173_s30 + $0xb8] sm:$0xff]  ;;  %v328_v40 = vpack.c.bf16 %v300_v37, %v299_v36  ;;  %v301_v42 = vld [vmem:[%s1173_s30 + $0x40] sm:$0xff] }
  0x1f   : > { %442 = vmatpush1.bf16.msra.mxu0 %v1096_v7  ;;  %1072 = vmatpush1.bf16.msra.mxu1 %v1096_v7  ;;  %v336_v41 = vpack.c.bf16 %v316_v39, %v315_v38  ;;  %v302_v43 = vld [vmem:[%s1173_s30 + $0x48] sm:$0xff]  ;;  %v317_v44 = vld [vmem:[%s1173_s30 + $0xc0] sm:$0xff]  ;;  %v303_v48 = vld [vmem:[%s1173_s30 + $0x50] sm:$0xff] }
  0x20   : > { %443 = vmatprep.subr.bf16.mxu0 %v1097_v8  ;;  %1065 = vmatprep.subr.bf16.mxu1 %v1097_v8  ;;  %v318_v45 = vld [vmem:[%s1173_s30 + $0xc8] sm:$0xff]  ;;  %v329_v46 = vpack.c.bf16 %v302_v43, %v301_v42  ;;  %v304_v49 = vld [vmem:[%s1173_s30 + $0x58] sm:$0xff]  ;;  %v319_v50 = vld [vmem:[%s1173_s30 + $0xd0] sm:$0xff] }
  0x21   : > { %v337_v47 = vpack.c.bf16 %v318_v45, %v317_v44  ;;  %v320_v51 = vld [vmem:[%s1173_s30 + $0xd8] sm:$0xff]  ;;  %v330_v52 = vpack.c.bf16 %v304_v49, %v303_v48  ;;  %v305_v54 = vld [vmem:[%s1173_s30 + $0x60] sm:$0xff]  ;;  %v306_v55 = vld [vmem:[%s1173_s30 + $0x68] sm:$0xff] }
  0x22   : > { %v338_v53 = vpack.c.bf16 %v320_v51, %v319_v50  ;;  %v321_v56 = vld [vmem:[%s1173_s30 + $0xe0] sm:$0xff]  ;;  %v322_v57 = vld [vmem:[%s1173_s30 + $0xe8] sm:$0xff]  ;;  %v331_v58 = vpack.c.bf16 %v306_v55, %v305_v54  ;;  %v307_v60 = vld [vmem:[%s1173_s30 + $0x70] sm:$0xff] }
  0x23   : > { %444 = vmatpush1.bf16.msra.mxu0 %v1099_v9  ;;  %1073 = vmatpush1.bf16.msra.mxu1 %v1099_v9  ;;  %v339_v59 = vpack.c.bf16 %v322_v57, %v321_v56  ;;  %v308_v61 = vld [vmem:[%s1173_s30 + $0x78] sm:$0xff]  ;;  %v323_v62 = vld [vmem:[%s1173_s30 + $0xf0] sm:$0xff] }
  0x24   : > { %445 = vmatprep.subr.bf16.mxu0 %v1100_v10  ;;  %1066 = vmatprep.subr.bf16.mxu1 %v1100_v10  ;;  %v324_v63 = vld [vmem:[%s1173_s30 + $0xf8] sm:$0xff]  ;;  %v332_v0 = vpack.c.bf16 %v308_v61, %v307_v60 }
  0x25   : > { %v340_v1 = vpack.c.bf16 %v324_v63, %v323_v62 }
  0x27   : > { %446 = vmatpush1.bf16.msra.mxu0 %v1102_v11  ;;  %1074 = vmatpush1.bf16.msra.mxu1 %v1102_v11 }
  0x28   : > { %447 = vmatprep.subr.bf16.mxu0 %v1103_v12  ;;  %1067 = vmatprep.subr.bf16.mxu1 %v1103_v12 }
  0x2b   : > { %448 = vmatpush1.bf16.msra.mxu0 %v1105_v13  ;;  %1075 = vmatpush1.bf16.msra.mxu1 %v1105_v13 }
  0x2c   : > { %449 = vmatprep.subr.bf16.mxu0 %v1106_v14  ;;  %1068 = vmatprep.subr.bf16.mxu1 %v1106_v14 }
  0x2f   : > { %450 = vmatpush1.bf16.msra.mxu0 %v1108_v15  ;;  %1076 = vmatpush1.bf16.msra.mxu1 %v1108_v15 }
  0x30   : > { %451 = vmatprep.subr.bf16.mxu0 %v1109_v16  ;;  %1069 = vmatprep.subr.bf16.mxu1 %v1109_v16 }
  0x33   : > { %452 = vmatpush1.bf16.msra.mxu0 %v1111_v17  ;;  %1077 = vmatpush1.bf16.msra.mxu1 %v1111_v17 }
  0x36   : > { %470 = vmatmul.mubr.bf16.vlgmr.msra.gmra.mrb[0].mxu0 %v325_v22  ;;  %550 = vmatmul.mubr.bf16.vlgmr.msra.gmra.mrb[0].mxu1 %v333_v23 }
  0x37   : > { %479 = vmatprep.mubr.bf16.mxu0 %v1121_v3  ;;  %559 = vmatprep.mubr.bf16.mxu1 %v1121_v3 }
  0x3e   : > { %480 = vmatmul.mubr.bf16.gmra.mrb[4].mxu0 %v326_v28  ;;  %560 = vmatmul.mubr.bf16.gmra.mrb[4].mxu1 %v334_v29 }
  0x3f   : > { %489 = vmatprep.mubr.bf16.mxu0 %v1121_v3  ;;  %569 = vmatprep.mubr.bf16.mxu1 %v1121_v3 }
  0x46   : > { %490 = vmatmul.mubr.bf16.gmra.mrb[8].mxu0 %v327_v34  ;;  %570 = vmatmul.mubr.bf16.gmra.mrb[8].mxu1 %v335_v35 }
  0x47   : > { %499 = vmatprep.mubr.bf16.mxu0 %v1121_v3  ;;  %579 = vmatprep.mubr.bf16.mxu1 %v1121_v3 }
  0x4e   : > { %500 = vmatmul.mubr.bf16.gmra.mrb[12].mxu0 %v328_v40  ;;  %580 = vmatmul.mubr.bf16.gmra.mrb[12].mxu1 %v336_v41 }
  0x4f   : > { %509 = vmatprep.mubr.bf16.mxu0 %v1121_v3  ;;  %589 = vmatprep.mubr.bf16.mxu1 %v1121_v3 }
  0x56   : > { %510 = vmatmul.mubr.bf16.gmra.mrb[16].mxu0 %v329_v46  ;;  %590 = vmatmul.mubr.bf16.gmra.mrb[16].mxu1 %v337_v47 }
  0x57   : > { %519 = vmatprep.mubr.bf16.mxu0 %v1121_v3  ;;  %599 = vmatprep.mubr.bf16.mxu1 %v1121_v3 }
  0x5e   : > { %520 = vmatmul.mubr.bf16.gmra.mrb[20].mxu0 %v330_v52  ;;  %600 = vmatmul.mubr.bf16.gmra.mrb[20].mxu1 %v338_v53 }
  0x5f   : > { %529 = vmatprep.mubr.bf16.mxu0 %v1121_v3  ;;  %609 = vmatprep.mubr.bf16.mxu1 %v1121_v3 }
  0x66   : > { %530 = vmatmul.mubr.bf16.gmra.mrb[24].mxu0 %v331_v58  ;;  %610 = vmatmul.mubr.bf16.gmra.mrb[24].mxu1 %v339_v59 }
  0x67   : > { %539 = vmatprep.mubr.bf16.mxu0 %v1121_v3  ;;  %619 = vmatprep.mubr.bf16.mxu1 %v1121_v3 }
  0x6e   : > { %540 = vmatmul.mubr.bf16.gmra.mrb[28].mxu0 %v332_v0  ;;  %620 = vmatmul.mubr.bf16.gmra.mrb[28].mxu1 %v340_v1 }
 0x109   : > { %v471_v2 = vpop.f32.mrb[0].mxu0  ;;  %v1293_v4 = vpop.f32.mrb[0].mxu1 }
 0x10a   : > { %630 = vst [vmem:[%s1178_s10] sm:$0xff] %v471_v2  ;;  %v473_v5 = vpop.f32.mrb[1].mxu0  ;;  %646 = vst [vmem:[%s1178_s10 + $0x80] sm:$0xff] %v1293_v4  ;;  %v1298_v6 = vpop.f32.mrb[1].mxu1  ;;  %v735_v8 = vmul.f32 %v471_v2, %v471_v2 }
 0x10b   : > { %662 = vst [vmem:[%s1183_s13] sm:$0xff] %v473_v5  ;;  %v475_v3 = vpop.f32.mrb[2].mxu0  ;;  %678 = vst [vmem:[%s1183_s13 + $0x80] sm:$0xff] %v1298_v6  ;;  %v1303_v7 = vpop.f32.mrb[2].mxu1  ;;  %v847_v13 = vmul.f32 %v473_v5, %v473_v5 }
 0x10c   : > { %631 = vst [vmem:[%s1178_s10 + $0x8] sm:$0xff] %v475_v3  ;;  %v695_v9 = vadd.f32 %v475_v3, %v471_v2  ;;  %v736_v10 = vmul.f32 %v475_v3, %v475_v3  ;;  %v477_v11 = vpop.f32.mrb[3].mxu0  ;;  %647 = vst [vmem:[%s1178_s10 + $0x88] sm:$0xff] %v1303_v7  ;;  %v1308_v12 = vpop.f32.mrb[3].mxu1 }
 0x10d   : > { %663 = vst [vmem:[%s1183_s13 + $0x8] sm:$0xff] %v477_v11  ;;  %v807_v14 = vadd.f32 %v477_v11, %v473_v5  ;;  %v848_v15 = vmul.f32 %v477_v11, %v477_v11  ;;  %679 = vst [vmem:[%s1183_s13 + $0x88] sm:$0xff] %v1308_v12 }
 0x10e   : > { %v767_v16 = vadd.f32 %v736_v10, %v735_v8 }
 0x10f   : > { %v879_v17 = vadd.f32 %v848_v15, %v847_v13 }
 0x111   : > { %v481_v18 = vpop.f32.mrb[4].mxu0  ;;  %v1313_v19 = vpop.f32.mrb[4].mxu1 }
 0x112   : > { %632 = vst [vmem:[%s1178_s10 + $0x10] sm:$0xff] %v481_v18  ;;  %v696_v20 = vadd.f32 %v695_v9, %v481_v18  ;;  %v737_v21 = vmul.f32 %v481_v18, %v481_v18  ;;  %v483_v22 = vpop.f32.mrb[5].mxu0  ;;  %648 = vst [vmem:[%s1178_s10 + $0x90] sm:$0xff] %v1313_v19  ;;  %v1318_v23 = vpop.f32.mrb[5].mxu1 }
 0x113   : > { %664 = vst [vmem:[%s1183_s13 + $0x10] sm:$0xff] %v483_v22  ;;  %v808_v24 = vadd.f32 %v807_v14, %v483_v22  ;;  %v849_v25 = vmul.f32 %v483_v22, %v483_v22  ;;  %v485_v26 = vpop.f32.mrb[6].mxu0  ;;  %680 = vst [vmem:[%s1183_s13 + $0x90] sm:$0xff] %v1318_v23  ;;  %v1323_v27 = vpop.f32.mrb[6].mxu1 }
 0x114   : > { %v768_v28 = vadd.f32 %v767_v16, %v737_v21  ;;  %633 = vst [vmem:[%s1178_s10 + $0x18] sm:$0xff] %v485_v26  ;;  %v697_v29 = vadd.f32 %v696_v20, %v485_v26  ;;  %v738_v30 = vmul.f32 %v485_v26, %v485_v26  ;;  %v487_v31 = vpop.f32.mrb[7].mxu0  ;;  %649 = vst [vmem:[%s1178_s10 + $0x98] sm:$0xff] %v1323_v27  ;;  %v1328_v32 = vpop.f32.mrb[7].mxu1 }
 0x115   : > { %v880_v33 = vadd.f32 %v879_v17, %v849_v25  ;;  %665 = vst [vmem:[%s1183_s13 + $0x18] sm:$0xff] %v487_v31  ;;  %v809_v34 = vadd.f32 %v808_v24, %v487_v31  ;;  %v850_v35 = vmul.f32 %v487_v31, %v487_v31  ;;  %681 = vst [vmem:[%s1183_s13 + $0x98] sm:$0xff] %v1328_v32 }
 0x116   : > { %v769_v36 = vadd.f32 %v768_v28, %v738_v30 }
 0x117   : > { %v881_v37 = vadd.f32 %v880_v33, %v850_v35 }
 0x119   : > { %v491_v38 = vpop.f32.mrb[8].mxu0  ;;  %v1333_v39 = vpop.f32.mrb[8].mxu1 }
 0x11a   : > { %634 = vst [vmem:[%s1178_s10 + $0x20] sm:$0xff] %v491_v38  ;;  %v698_v40 = vadd.f32 %v697_v29, %v491_v38  ;;  %v739_v41 = vmul.f32 %v491_v38, %v491_v38  ;;  %v493_v42 = vpop.f32.mrb[9].mxu0  ;;  %650 = vst [vmem:[%s1178_s10 + $0xa0] sm:$0xff] %v1333_v39  ;;  %v1338_v43 = vpop.f32.mrb[9].mxu1 }
 0x11b   : > { %666 = vst [vmem:[%s1183_s13 + $0x20] sm:$0xff] %v493_v42  ;;  %v810_v44 = vadd.f32 %v809_v34, %v493_v42  ;;  %v851_v45 = vmul.f32 %v493_v42, %v493_v42  ;;  %v495_v46 = vpop.f32.mrb[10].mxu0  ;;  %682 = vst [vmem:[%s1183_s13 + $0xa0] sm:$0xff] %v1338_v43  ;;  %v1343_v47 = vpop.f32.mrb[10].mxu1 }
 0x11c   : > { %v770_v48 = vadd.f32 %v769_v36, %v739_v41  ;;  %635 = vst [vmem:[%s1178_s10 + $0x28] sm:$0xff] %v495_v46  ;;  %v699_v49 = vadd.f32 %v698_v40, %v495_v46  ;;  %v740_v50 = vmul.f32 %v495_v46, %v495_v46  ;;  %v497_v51 = vpop.f32.mrb[11].mxu0  ;;  %651 = vst [vmem:[%s1178_s10 + $0xa8] sm:$0xff] %v1343_v47  ;;  %v1348_v52 = vpop.f32.mrb[11].mxu1 }
 0x11d   : > { %v882_v53 = vadd.f32 %v881_v37, %v851_v45  ;;  %667 = vst [vmem:[%s1183_s13 + $0x28] sm:$0xff] %v497_v51  ;;  %v811_v54 = vadd.f32 %v810_v44, %v497_v51  ;;  %v852_v55 = vmul.f32 %v497_v51, %v497_v51  ;;  %683 = vst [vmem:[%s1183_s13 + $0xa8] sm:$0xff] %v1348_v52 }
 0x11e   : > { %v771_v56 = vadd.f32 %v770_v48, %v740_v50 }
 0x11f   : > { %v883_v57 = vadd.f32 %v882_v53, %v852_v55 }
 0x121   : > { %v501_v58 = vpop.f32.mrb[12].mxu0  ;;  %v1353_v59 = vpop.f32.mrb[12].mxu1 }
 0x122   : > { %636 = vst [vmem:[%s1178_s10 + $0x30] sm:$0xff] %v501_v58  ;;  %v700_v60 = vadd.f32 %v699_v49, %v501_v58  ;;  %v741_v61 = vmul.f32 %v501_v58, %v501_v58  ;;  %v503_v62 = vpop.f32.mrb[13].mxu0  ;;  %652 = vst [vmem:[%s1178_s10 + $0xb0] sm:$0xff] %v1353_v59  ;;  %v1358_v63 = vpop.f32.mrb[13].mxu1 }
 0x123   : > { %668 = vst [vmem:[%s1183_s13 + $0x30] sm:$0xff] %v503_v62  ;;  %v812_v0 = vadd.f32 %v811_v54, %v503_v62  ;;  %v853_v1 = vmul.f32 %v503_v62, %v503_v62  ;;  %v505_v2 = vpop.f32.mrb[14].mxu0  ;;  %684 = vst [vmem:[%s1183_s13 + $0xb0] sm:$0xff] %v1358_v63  ;;  %v1363_v5 = vpop.f32.mrb[14].mxu1 }
 0x124   : > { %v772_v3 = vadd.f32 %v771_v56, %v741_v61  ;;  %637 = vst [vmem:[%s1178_s10 + $0x38] sm:$0xff] %v505_v2  ;;  %v701_v8 = vadd.f32 %v700_v60, %v505_v2  ;;  %v742_v9 = vmul.f32 %v505_v2, %v505_v2  ;;  %v507_v10 = vpop.f32.mrb[15].mxu0  ;;  %653 = vst [vmem:[%s1178_s10 + $0xb8] sm:$0xff] %v1363_v5  ;;  %v1368_v11 = vpop.f32.mrb[15].mxu1 }
 0x125   : > { %v884_v13 = vadd.f32 %v883_v57, %v853_v1  ;;  %669 = vst [vmem:[%s1183_s13 + $0x38] sm:$0xff] %v507_v10  ;;  %v813_v14 = vadd.f32 %v812_v0, %v507_v10  ;;  %v854_v15 = vmul.f32 %v507_v10, %v507_v10  ;;  %685 = vst [vmem:[%s1183_s13 + $0xb8] sm:$0xff] %v1368_v11 }
 0x126   : > { %v773_v16 = vadd.f32 %v772_v3, %v742_v9 }
 0x127   : > { %v885_v17 = vadd.f32 %v884_v13, %v854_v15 }
 0x129   : > { %v511_v18 = vpop.f32.mrb[16].mxu0  ;;  %v1373_v20 = vpop.f32.mrb[16].mxu1 }
 0x12a   : > { %638 = vst [vmem:[%s1178_s10 + $0x40] sm:$0xff] %v511_v18  ;;  %v702_v21 = vadd.f32 %v701_v8, %v511_v18  ;;  %v743_v22 = vmul.f32 %v511_v18, %v511_v18  ;;  %v513_v24 = vpop.f32.mrb[17].mxu0  ;;  %654 = vst [vmem:[%s1178_s10 + $0xc0] sm:$0xff] %v1373_v20  ;;  %v1378_v25 = vpop.f32.mrb[17].mxu1 }
 0x12b   : > { %670 = vst [vmem:[%s1183_s13 + $0x40] sm:$0xff] %v513_v24  ;;  %v814_v26 = vadd.f32 %v813_v14, %v513_v24  ;;  %v855_v28 = vmul.f32 %v513_v24, %v513_v24  ;;  %v515_v29 = vpop.f32.mrb[18].mxu0  ;;  %686 = vst [vmem:[%s1183_s13 + $0xc0] sm:$0xff] %v1378_v25  ;;  %v1383_v30 = vpop.f32.mrb[18].mxu1 }
 0x12c   : > { %v774_v31 = vadd.f32 %v773_v16, %v743_v22  ;;  %639 = vst [vmem:[%s1178_s10 + $0x48] sm:$0xff] %v515_v29  ;;  %v703_v33 = vadd.f32 %v702_v21, %v515_v29  ;;  %v744_v34 = vmul.f32 %v515_v29, %v515_v29  ;;  %v517_v35 = vpop.f32.mrb[19].mxu0  ;;  %655 = vst [vmem:[%s1178_s10 + $0xc8] sm:$0xff] %v1383_v30  ;;  %v1388_v36 = vpop.f32.mrb[19].mxu1 }
 0x12d   : > { %v886_v37 = vadd.f32 %v885_v17, %v855_v28  ;;  %671 = vst [vmem:[%s1183_s13 + $0x48] sm:$0xff] %v517_v35  ;;  %v815_v38 = vadd.f32 %v814_v26, %v517_v35  ;;  %v856_v40 = vmul.f32 %v517_v35, %v517_v35  ;;  %687 = vst [vmem:[%s1183_s13 + $0xc8] sm:$0xff] %v1388_v36 }
 0x12e   : > { %v775_v41 = vadd.f32 %v774_v31, %v744_v34 }
 0x12f   : > { %v887_v42 = vadd.f32 %v886_v37, %v856_v40 }
 0x131   : > { %v521_v44 = vpop.f32.mrb[20].mxu0  ;;  %v1393_v45 = vpop.f32.mrb[20].mxu1 }
 0x132   : > { %640 = vst [vmem:[%s1178_s10 + $0x50] sm:$0xff] %v521_v44  ;;  %v704_v46 = vadd.f32 %v703_v33, %v521_v44  ;;  %v745_v48 = vmul.f32 %v521_v44, %v521_v44  ;;  %v523_v49 = vpop.f32.mrb[21].mxu0  ;;  %656 = vst [vmem:[%s1178_s10 + $0xd0] sm:$0xff] %v1393_v45  ;;  %v1398_v50 = vpop.f32.mrb[21].mxu1 }
 0x133   : > { %672 = vst [vmem:[%s1183_s13 + $0x50] sm:$0xff] %v523_v49  ;;  %v816_v51 = vadd.f32 %v815_v38, %v523_v49  ;;  %v857_v53 = vmul.f32 %v523_v49, %v523_v49  ;;  %v525_v54 = vpop.f32.mrb[22].mxu0  ;;  %688 = vst [vmem:[%s1183_s13 + $0xd0] sm:$0xff] %v1398_v50  ;;  %v1403_v55 = vpop.f32.mrb[22].mxu1 }
 0x134   : > { %v776_v56 = vadd.f32 %v775_v41, %v745_v48  ;;  %641 = vst [vmem:[%s1178_s10 + $0x58] sm:$0xff] %v525_v54  ;;  %v705_v57 = vadd.f32 %v704_v46, %v525_v54  ;;  %v746_v58 = vmul.f32 %v525_v54, %v525_v54  ;;  %v527_v60 = vpop.f32.mrb[23].mxu0  ;;  %657 = vst [vmem:[%s1178_s10 + $0xd8] sm:$0xff] %v1403_v55  ;;  %v1408_v61 = vpop.f32.mrb[23].mxu1 }
 0x135   : > { %v888_v62 = vadd.f32 %v887_v42, %v857_v53  ;;  %673 = vst [vmem:[%s1183_s13 + $0x58] sm:$0xff] %v527_v60  ;;  %v817_v0 = vadd.f32 %v816_v51, %v527_v60  ;;  %v858_v1 = vmul.f32 %v527_v60, %v527_v60  ;;  %689 = vst [vmem:[%s1183_s13 + $0xd8] sm:$0xff] %v1408_v61 }
 0x136   : > { %v777_v2 = vadd.f32 %v776_v56, %v746_v58 }
 0x137   : > { %v889_v3 = vadd.f32 %v888_v62, %v858_v1 }
 0x139   : > { %v531_v8 = vpop.f32.mrb[24].mxu0  ;;  %v1413_v9 = vpop.f32.mrb[24].mxu1 }
 0x13a   : > { %642 = vst [vmem:[%s1178_s10 + $0x60] sm:$0xff] %v531_v8  ;;  %v706_v10 = vadd.f32 %v705_v57, %v531_v8  ;;  %v747_v13 = vmul.f32 %v531_v8, %v531_v8  ;;  %v533_v14 = vpop.f32.mrb[25].mxu0  ;;  %658 = vst [vmem:[%s1178_s10 + $0xe0] sm:$0xff] %v1413_v9  ;;  %v1418_v15 = vpop.f32.mrb[25].mxu1 }
 0x13b   : > { %674 = vst [vmem:[%s1183_s13 + $0x60] sm:$0xff] %v533_v14  ;;  %v818_v16 = vadd.f32 %v817_v0, %v533_v14  ;;  %v859_v17 = vmul.f32 %v533_v14, %v533_v14  ;;  %v535_v18 = vpop.f32.mrb[26].mxu0  ;;  %690 = vst [vmem:[%s1183_s13 + $0xe0] sm:$0xff] %v1418_v15  ;;  %v1423_v21 = vpop.f32.mrb[26].mxu1 }
 0x13c   : > { %v778_v22 = vadd.f32 %v777_v2, %v747_v13  ;;  %643 = vst [vmem:[%s1178_s10 + $0x68] sm:$0xff] %v535_v18  ;;  %v707_v24 = vadd.f32 %v706_v10, %v535_v18  ;;  %v748_v26 = vmul.f32 %v535_v18, %v535_v18  ;;  %v537_v28 = vpop.f32.mrb[27].mxu0  ;;  %659 = vst [vmem:[%s1178_s10 + $0xe8] sm:$0xff] %v1423_v21  ;;  %v1428_v29 = vpop.f32.mrb[27].mxu1 }
 0x13d   : > { %v890_v31 = vadd.f32 %v889_v3, %v859_v17  ;;  %675 = vst [vmem:[%s1183_s13 + $0x68] sm:$0xff] %v537_v28  ;;  %v819_v33 = vadd.f32 %v818_v16, %v537_v28  ;;  %v860_v34 = vmul.f32 %v537_v28, %v537_v28  ;;  %691 = vst [vmem:[%s1183_s13 + $0xe8] sm:$0xff] %v1428_v29 }
 0x13e   : > { %v779_v35 = vadd.f32 %v778_v22, %v748_v26  ;;  %v751_v2 = vmul.f32 %v1293_v4, %v1293_v4  ;;  %v863_v10 = vmul.f32 %v1298_v6, %v1298_v6  ;;  %v752_v16 = vmul.f32 %v1303_v7, %v1303_v7 }
 0x13f   : > { %v891_v37 = vadd.f32 %v890_v31, %v860_v34  ;;  %v864_v22 = vmul.f32 %v1308_v12, %v1308_v12 }
 0x141   : > { %v541_v38 = vpop.f32.mrb[28].mxu0  ;;  %v1433_v40 = vpop.f32.mrb[28].mxu1 }
 0x142   : > { %644 = vst [vmem:[%s1178_s10 + $0x70] sm:$0xff] %v541_v38  ;;  %v708_v41 = vadd.f32 %v707_v24, %v541_v38  ;;  %v749_v42 = vmul.f32 %v541_v38, %v541_v38  ;;  %v543_v44 = vpop.f32.mrb[29].mxu0  ;;  %660 = vst [vmem:[%s1178_s10 + $0xf0] sm:$0xff] %v1433_v40  ;;  %v1438_v46 = vpop.f32.mrb[29].mxu1 }
 0x143   : > { %676 = vst [vmem:[%s1183_s13 + $0x70] sm:$0xff] %v543_v44  ;;  %v820_v48 = vadd.f32 %v819_v33, %v543_v44  ;;  %v861_v49 = vmul.f32 %v543_v44, %v543_v44  ;;  %v545_v51 = vpop.f32.mrb[30].mxu0  ;;  %692 = vst [vmem:[%s1183_s13 + $0xf0] sm:$0xff] %v1438_v46  ;;  %v1443_v53 = vpop.f32.mrb[30].mxu1 }
 0x144   : > { %v780_v54 = vadd.f32 %v779_v35, %v749_v42  ;;  %645 = vst [vmem:[%s1178_s10 + $0x78] sm:$0xff] %v545_v51  ;;  %v709_v56 = vadd.f32 %v708_v41, %v545_v51  ;;  %v750_v57 = vmul.f32 %v545_v51, %v545_v51  ;;  %v547_v58 = vpop.f32.mrb[31].mxu0  ;;  %661 = vst [vmem:[%s1178_s10 + $0xf8] sm:$0xff] %v1443_v53  ;;  %v1448_v60 = vpop.f32.mrb[31].mxu1 }
 0x145   : > { %v892_v62 = vadd.f32 %v891_v37, %v861_v49  ;;  %677 = vst [vmem:[%s1183_s13 + $0x78] sm:$0xff] %v547_v58  ;;  %v821_v0 = vadd.f32 %v820_v48, %v547_v58  ;;  %v862_v1 = vmul.f32 %v547_v58, %v547_v58  ;;  %693 = vst [vmem:[%s1183_s13 + $0xf8] sm:$0xff] %v1448_v60 }
 0x146   : > { %v710_v3 = vadd.f32 %v709_v56, %v1293_v4  ;;  %v781_v8 = vadd.f32 %v780_v54, %v750_v57  ;;  %v753_v4 = vmul.f32 %v1313_v19, %v1313_v19 }
 0x147   : > { %v822_v13 = vadd.f32 %v821_v0, %v1298_v6  ;;  %v893_v14 = vadd.f32 %v892_v62, %v862_v1  ;;  %v865_v6 = vmul.f32 %v1318_v23, %v1318_v23 }
 0x148   : > { %v711_v17 = vadd.f32 %v710_v3, %v1303_v7  ;;  %v782_v18 = vadd.f32 %v781_v8, %v751_v2  ;;  %v754_v7 = vmul.f32 %v1323_v27, %v1323_v27 }
 0x149   : > { %v823_v24 = vadd.f32 %v822_v13, %v1308_v12  ;;  %v894_v26 = vadd.f32 %v893_v14, %v863_v10  ;;  %v866_v12 = vmul.f32 %v1328_v32, %v1328_v32  ;;  %v759_v13 = vmul.f32 %v1373_v20, %v1373_v20 }
 0x14a   : > { %v712_v28 = vadd.f32 %v711_v17, %v1313_v19  ;;  %v783_v31 = vadd.f32 %v782_v18, %v752_v16  ;;  %v755_v19 = vmul.f32 %v1333_v39, %v1333_v39  ;;  %v871_v16 = vmul.f32 %v1378_v25, %v1378_v25 }
 0x14b   : > { %v824_v33 = vadd.f32 %v823_v24, %v1318_v23  ;;  %v895_v34 = vadd.f32 %v894_v26, %v864_v22  ;;  %v867_v23 = vmul.f32 %v1338_v43, %v1338_v43  ;;  %v760_v22 = vmul.f32 %v1383_v30, %v1383_v30 }
 0x14c   : > { %v713_v35 = vadd.f32 %v712_v28, %v1323_v27  ;;  %v784_v37 = vadd.f32 %v783_v31, %v753_v4  ;;  %v756_v27 = vmul.f32 %v1343_v47, %v1343_v47  ;;  %v872_v26 = vmul.f32 %v1388_v36, %v1388_v36 }
 0x14d   : > { %v825_v38 = vadd.f32 %v824_v33, %v1328_v32  ;;  %v896_v41 = vadd.f32 %v895_v34, %v865_v6  ;;  %v868_v32 = vmul.f32 %v1348_v52, %v1348_v52  ;;  %v761_v28 = vmul.f32 %v1393_v45, %v1393_v45 }
 0x14e   : > { %v785_v42 = vadd.f32 %v784_v37, %v754_v7  ;;  %v714_v44 = vadd.f32 %v713_v35, %v1333_v39  ;;  %v757_v39 = vmul.f32 %v1353_v59, %v1353_v59  ;;  %v873_v6 = vmul.f32 %v1398_v50, %v1398_v50 }
 0x14f   : > { %v897_v48 = vadd.f32 %v896_v41, %v866_v12  ;;  %v826_v49 = vadd.f32 %v825_v38, %v1338_v43  ;;  %v869_v43 = vmul.f32 %v1358_v63, %v1358_v63  ;;  %v762_v34 = vmul.f32 %v1403_v55, %v1403_v55 }
 0x150   : > { %v715_v51 = vadd.f32 %v714_v44, %v1343_v47  ;;  %v786_v54 = vadd.f32 %v785_v42, %v755_v19  ;;  %v758_v47 = vmul.f32 %v1363_v5, %v1363_v5  ;;  %v874_v35 = vmul.f32 %v1408_v61, %v1408_v61 }
 0x151   : > { %v827_v56 = vadd.f32 %v826_v49, %v1348_v52  ;;  %v898_v57 = vadd.f32 %v897_v48, %v867_v23  ;;  %v870_v52 = vmul.f32 %v1368_v11, %v1368_v11  ;;  %v763_v12 = vmul.f32 %v1413_v9, %v1413_v9 }
 0x152   : > { %v716_v58 = vadd.f32 %v715_v51, %v1353_v59  ;;  %v787_v62 = vadd.f32 %v786_v54, %v756_v27  ;;  %v875_v41 = vmul.f32 %v1418_v15, %v1418_v15  ;;  %v764_v42 = vmul.f32 %v1423_v21, %v1423_v21 }
 0x153   : > { %v828_v0 = vadd.f32 %v827_v56, %v1358_v63  ;;  %v899_v1 = vadd.f32 %v898_v57, %v868_v32  ;;  %v877_v48 = vmul.f32 %v1438_v46, %v1438_v46  ;;  %v766_v32 = vmul.f32 %v1443_v53, %v1443_v53 }
 0x154   : > { %v717_v2 = vadd.f32 %v716_v58, %v1363_v5  ;;  %v788_v3 = vadd.f32 %v787_v62, %v757_v39 }
 0x155   : > { %v829_v8 = vadd.f32 %v828_v0, %v1368_v11  ;;  %v900_v10 = vadd.f32 %v899_v1, %v869_v43 }
 0x156   : > { %v718_v59 = vadd.f32 %v717_v2, %v1373_v20  ;;  %v789_v14 = vadd.f32 %v788_v3, %v758_v47 }
 0x157   : > { %v830_v63 = vadd.f32 %v829_v8, %v1378_v25  ;;  %v901_v17 = vadd.f32 %v900_v10, %v870_v52 }
 0x158   : > { %v790_v5 = vadd.f32 %v789_v14, %v759_v13  ;;  %v719_v18 = vadd.f32 %v718_v59, %v1383_v30 }
 0x159   : > { %v902_v11 = vadd.f32 %v901_v17, %v871_v16  ;;  %v831_v24 = vadd.f32 %v830_v63, %v1388_v36 }
 0x15a   : > { %v791_v20 = vadd.f32 %v790_v5, %v760_v22  ;;  %v720_v4 = vadd.f32 %v719_v18, %v1393_v45  ;;  %v806_v18 = vld [vmem:[%s1582_s6] sm:$0x1] }
 0x15b   : > { %v903_v25 = vadd.f32 %v902_v11, %v872_v26  ;;  %v832_v31 = vadd.f32 %v831_v24, %v1398_v50  ;;  %v734_v22 = vld [vmem:[%s1581_s5] sm:$0x1] }
 0x15c   : > { %v792_v33 = vadd.f32 %v791_v20, %v761_v28  ;;  %v721_v30 = vadd.f32 %v720_v4, %v1403_v55  ;;  %v846_v4 = vld [vmem:[%s1583_s7] sm:$0x1] }
 0x15d   : > { %v904_v7 = vadd.f32 %v903_v25, %v873_v6  ;;  %v833_v36 = vadd.f32 %v832_v31, %v1408_v61  ;;  %v765_v61 = vmul.f32 %v1433_v40, %v1433_v40 }
 0x15e   : > { %v793_v37 = vadd.f32 %v792_v33, %v762_v34  ;;  %v722_v45 = vadd.f32 %v721_v30, %v1413_v9  ;;  %v876_v9 = vmul.f32 %v1428_v29, %v1428_v29 }
 0x15f   : > { %v905_v38 = vadd.f32 %v904_v7, %v874_v35  ;;  %v834_v50 = vadd.f32 %v833_v36, %v1418_v15 }
 0x160   : > { %v794_v19 = vadd.f32 %v793_v37, %v763_v12  ;;  %v723_v55 = vadd.f32 %v722_v45, %v1423_v21 }
 0x161   : > { %v906_v44 = vadd.f32 %v905_v38, %v875_v41  ;;  %v835_v23 = vadd.f32 %v834_v50, %v1428_v29  ;;  %v878_v29 = vmul.f32 %v1448_v60, %v1448_v60 }
 0x162   : > { %v795_v49 = vadd.f32 %v794_v19, %v764_v42  ;;  %v724_v15 = vadd.f32 %v723_v55, %v1433_v40 }
 0x163   : > { %v907_v27 = vadd.f32 %v906_v44, %v876_v9  ;;  %v836_v51 = vadd.f32 %v835_v23, %v1438_v46 }
 0x164   : > { %v796_v54 = vadd.f32 %v795_v49, %v765_v61  ;;  %v725_v21 = vadd.f32 %v724_v15, %v1443_v53 }
 0x165   : > { %v908_v56 = vadd.f32 %v907_v27, %v877_v48  ;;  %v837_v57 = vadd.f32 %v836_v51, %v1448_v60  ;;  %v694_v60 = vld [vmem:[%s1580_s4] sm:$0x1] }
 0x166   : > { %v726_v39 = vrot.slane %v725_v21, 4  ;;  %v797_v58 = vadd.f32 %v796_v54, %v766_v32 }
 0x167   : > { %v838_v62 = vrot.slane %v837_v57, 4  ;;  %v909_v43 = vadd.f32 %v908_v56, %v878_v29 }
 0x168   : > { %v727_v40 = vadd.f32 %v726_v39, %v725_v21  ;;  %v798_v0 = vrot.slane %v797_v58, 4 }
 0x169   : > { %v839_v1 = vadd.f32 %v838_v62, %v837_v57  ;;  %v910_v46 = vrot.slane %v909_v43, 4 }
 0x16a   : > { %v728_v47 = vrot.slane %v727_v40, 2  ;;  %v799_v2 = vadd.f32 %v798_v0, %v797_v58 }
 0x16b   : > { %v840_v3 = vrot.slane %v839_v1, 2  ;;  %v911_v52 = vadd.f32 %v910_v46, %v909_v43 }
 0x16c   : > { %v729_v8 = vadd.f32 %v728_v47, %v727_v40  ;;  %v800_v53 = vrot.slane %v799_v2, 2 }
 0x16d   : > { %v841_v10 = vadd.f32 %v840_v3, %v839_v1  ;;  %v912_v59 = vrot.slane %v911_v52, 2 }
 0x16e   : > { %v730_v13 = vrot.slane %v729_v8, 1  ;;  %v801_v14 = vadd.f32 %v800_v53, %v799_v2 }
 0x16f   : > { %v842_v63 = vrot.slane %v841_v10, 1  ;;  %v913_v16 = vadd.f32 %v912_v59, %v911_v52 }
 0x170   : > { %v731_v17 = vadd.f32 %v730_v13, %v729_v8  ;;  %v802_v5 = vrot.slane %v801_v14, 1 }
 0x171   : > { %v843_v11 = vadd.f32 %v842_v63, %v841_v10  ;;  %v914_v24 = vrot.slane %v913_v16, 1 }
 0x172   : > { %v732_v26 = vadd.f32 %v731_v17, %v694_v60  ;;  %v803_v20 = vadd.f32 %v802_v5, %v801_v14 }
 0x173   : > { %v844_v28 = vadd.f32 %v843_v11, %v806_v18  ;;  %v915_v25 = vadd.f32 %v914_v24, %v913_v16 }
 0x174   : > { %733 = vst [vmem:[%s1580_s4] sm:$0x1] %v732_v26  ;;  %v804_v31 = vadd.f32 %v803_v20, %v734_v22 }
 0x175   : > { %845 = vst [vmem:[%s1582_s6] sm:$0x1] %v844_v28  ;;  %v916_v6 = vadd.f32 %v915_v25, %v846_v4 }
 0x176   : > { %805 = vst [vmem:[%s1581_s5] sm:$0x1] %v804_v31 }
 0x177   : > { %917 = vst [vmem:[%s1583_s7] sm:$0x1] %v916_v6 }
 0x178 PF: > { %s18_s24 = sadd.s32 1, %s1118_s24  }
 0x179   : > { %p15_p5 = scmp.ge.s32.totalorder %s18_s24, 4  }
 0x17b   :  { %17 = sbr.rel (!%p15_p5) target bundleno = 1 (0x1), region = 106 }

// kernel: bottleneck_pallas.6
= control target key start
LH: loop header
LB: loop body
LE: loop exit
PB: predicated region body
PF: predicated region fallthrough
CT: control target
= control target key end

     0   :  { %s1023_s21 = smov 0   ;;  %s1322_s0 = inlined_call_operand.vmem [shape: f32[512,128], index: 0, kind: input, shape index: {}]   ;;  %s1323_s1 = inlined_call_operand.vmem [shape: f32[1,128], index: 1, kind: input, shape index: {}]   ;;  %s1324_s2 = inlined_call_operand.vmem [shape: f32[1,128], index: 2, kind: input, shape index: {}]   ;;  %s1325_s3 = inlined_call_operand.vmem [shape: bf16[128,128], index: 3, kind: input, shape index: {}]   ;;  %s1326_s4 = inlined_call_operand.vmem [shape: f32[512,128], index: 4, kind: output, shape index: {0}]   ;;  %s1327_s5 = inlined_call_operand.vmem [shape: f32[1,128], index: 5, kind: output, shape index: {1}]   ;;  %s1328_s6 = inlined_call_operand.vmem [shape: f32[1,128], index: 6, kind: output, shape index: {2}]  }
   0x1 LB: > { %s852_s22 = sadd.s32 4294967295, %s985_s21   ;;  %p856_p0 = scmp.ge.s32.totalorder %s985_s21, 1  ;;  %s985_s21 = sphi %s1023_s21, %s17_s21  }
   0x2   : > { %p208_p1 = scmp.lt.s32.totalorder %s985_s21, 3 }
   0x4   : > { %p209_p2 = pnand %p856_p0, %p208_p1 }
   0x5   : > { %s857_s23 = sshll.u32 (!%p209_p2), %s852_s22, 5  ;;  %p861_p4 = scmp.ne.s32.totalorder (!%p209_p2), %s852_s22, 0 }
   0x6   : > { %212 = sbr.rel (%p209_p2) target bundleno = 347 (0x15b), region = 36  ;;  %p239_p3 = scmp.lt.s32.totalorder (!%p209_p2), %s857_s23, 63 }
   0xd   : > { %s1330_s23 = smov (!%p239_p3, %s857_s23), 63  ;;  %254 = sbr.rel (%p861_p4) target bundleno = 20 (0x14), region = 40 }
   0xe   : > { %s858_s24 = sshll.u32 %s1330_s23, 3  ;;  %v987_v0 = vmov (!%p861_p4), 0.0  }
   0xf   : > { %s1034_s27 = scalar_lea.vmem %s1322_s0, %s858_s24  ;;  %s1039_s30 = scalar_lea.vmem %s1326_s4, %s858_s24  ;;  %255 = vst [vmem:[%s1327_s5] sm:$0x1] (!%p861_p4), %v987_v0  ;;  %256 = vst [vmem:[%s1328_s6] sm:$0x1] (!%p861_p4), %v987_v0 }
  0x14 PF: > { %v971_v1 = vld [vmem:[%s1325_s3] sm:$0xff]   ;;  %v972_v2 = vld [vmem:[%s1325_s3 + $0x8] sm:$0xff]   ;;  %v973_v3 = vld [vmem:[%s1325_s3 + $0x10] sm:$0xff]  }
  0x15   : > { %898 = vmatprep.subr.bf16.mxu0 %v971_v1  ;;  %946 = vmatprep.subr.bf16.mxu1 %v971_v1  ;;  %v974_v4 = vld [vmem:[%s1325_s3 + $0x18] sm:$0xff]   ;;  %v257_v5 = vld [vmem:[%s1034_s27] sm:$0xff]  ;;  %v258_v6 = vld [vmem:[%s1034_s27 + $0x8] sm:$0xff] }
  0x16   : > { %899 = vmatpush3.bf16.msra.mxu0 %v971_v1  ;;  %954 = vmatpush3.bf16.msra.mxu1 %v971_v1  ;;  %v1064_v7 = vld [vmem:[%s1323_s1] ss:$0 sm:$0xff]  ;;  %v259_v11 = vld [vmem:[%s1034_s27 + $0x10] sm:$0xff]  ;;  %v260_v12 = vld [vmem:[%s1034_s27 + $0x18] sm:$0xff] }
  0x17   : > { %900 = vmatprep.subr.bf16.mxu0 %v972_v2  ;;  %947 = vmatprep.subr.bf16.mxu1 %v972_v2  ;;  %v296_v8 = vmul.f32 %v1064_v7, %v257_v5  ;;  %v297_v9 = vmul.f32 %v1064_v7, %v258_v6  ;;  %v1071_v10 = vld [vmem:[%s1324_s2] ss:$0 sm:$0xff]  ;;  %v298_v13 = vmul.f32 %v1064_v7, %v259_v11  ;;  %v262_v21 = vld [vmem:[%s1034_s27 + $0x28] sm:$0xff]  ;;  %v263_v23 = vld [vmem:[%s1034_s27 + $0x30] sm:$0xff] }
  0x18   : > { %v299_v16 = vmul.f32 %v1064_v7, %v260_v12  ;;  %v261_v17 = vld [vmem:[%s1034_s27 + $0x20] sm:$0xff]  ;;  %v264_v27 = vld [vmem:[%s1034_s27 + $0x38] sm:$0xff]  ;;  %v976_v28 = vld [vmem:[%s1325_s3 + $0x28] sm:$0xff]   ;;  %v301_v29 = vmul.f32 %v1064_v7, %v262_v21  ;;  %v302_v30 = vmul.f32 %v1064_v7, %v263_v23 }
  0x19   : > { %v335_v14 = vadd.f32 %v1071_v10, %v296_v8  ;;  %v336_v15 = vadd.f32 %v1071_v10, %v297_v9  ;;  %v975_v18 = vld [vmem:[%s1325_s3 + $0x20] sm:$0xff]   ;;  %v300_v22 = vmul.f32 %v1064_v7, %v261_v17  ;;  %v337_v25 = vadd.f32 %v1071_v10, %v298_v13  ;;  %v977_v36 = vld [vmem:[%s1325_s3 + $0x30] sm:$0xff]   ;;  %v274_v39 = vld [vmem:[%s1034_s27 + $0x88] sm:$0xff] }
  0x1a   : > { %901 = vmatpush3.bf16.msra.mxu0 %v972_v2  ;;  %955 = vmatpush3.bf16.msra.mxu1 %v972_v2  ;;  %v338_v26 = vadd.f32 %v1071_v10, %v299_v16  ;;  %v303_v31 = vmul.f32 %v1064_v7, %v264_v27  ;;  %v273_v32 = vld [vmem:[%s1034_s27 + $0x80] sm:$0xff]  ;;  %v1103_v37 = vadd.f32 %v1071_v10, %v301_v29  ;;  %v266_v41 = vld [vmem:[%s1034_s27 + $0x48] sm:$0xff]  ;;  %v275_v43 = vld [vmem:[%s1034_s27 + $0x90] sm:$0xff] }
  0x1b   : > { %902 = vmatprep.subr.bf16.mxu0 %v973_v3  ;;  %948 = vmatprep.subr.bf16.mxu1 %v973_v3  ;;  %v367_v19 = vmax.f32 %v335_v14, 0.0  ;;  %v368_v20 = vmax.f32 %v336_v15, 0.0  ;;  %v369_v33 = vmax.f32 %v337_v25, 0.0  ;;  %v1097_v35 = vadd.f32 %v1071_v10, %v300_v22  ;;  %v265_v38 = vld [vmem:[%s1034_s27 + $0x40] sm:$0xff]  ;;  %v276_v45 = vld [vmem:[%s1034_s27 + $0x98] sm:$0xff]  ;;  %v278_v51 = vld [vmem:[%s1034_s27 + $0xa8] sm:$0xff] }
  0x1c   : > { %v370_v34 = vmax.f32 %v338_v26, 0.0  ;;  %v1108_v40 = vadd.f32 %v1071_v10, %v302_v30  ;;  %v312_v42 = vmul.f32 %v1064_v7, %v273_v32  ;;  %v1114_v44 = vadd.f32 %v1071_v10, %v303_v31  ;;  %v277_v46 = vld [vmem:[%s1034_s27 + $0xa0] sm:$0xff]  ;;  %v279_v52 = vld [vmem:[%s1034_s27 + $0xb0] sm:$0xff]  ;;  %v978_v53 = vld [vmem:[%s1325_s3 + $0x38] sm:$0xff]  }
  0x1d   : > { %v399_v24 = vpack.c.bf16 %v368_v20, %v367_v19  ;;  %v371_v48 = vmax.f32 %v1097_v35, 0.0  ;;  %v304_v49 = vmul.f32 %v1064_v7, %v265_v38  ;;  %v313_v50 = vmul.f32 %v1064_v7, %v274_v39  ;;  %v280_v62 = vld [vmem:[%s1034_s27 + $0xb8] sm:$0xff]  ;;  %v282_v9 = vld [vmem:[%s1034_s27 + $0xc8] sm:$0xff]  ;;  %v267_v15 = vld [vmem:[%s1034_s27 + $0x50] sm:$0xff] }
  0x1e   : > { %903 = vmatpush3.bf16.msra.mxu0 %v973_v3  ;;  %956 = vmatpush3.bf16.msra.mxu1 %v973_v3  ;;  %v1118_v47 = vpack.c.bf16 %v370_v34, %v369_v33  ;;  %v372_v54 = vmax.f32 %v1103_v37, 0.0  ;;  %v305_v55 = vmul.f32 %v1064_v7, %v266_v41  ;;  %v351_v56 = vadd.f32 %v1071_v10, %v312_v42  ;;  %v281_v3 = vld [vmem:[%s1034_s27 + $0xc0] sm:$0xff]  ;;  %v268_v16 = vld [vmem:[%s1034_s27 + $0x58] sm:$0xff]  ;;  %v270_v22 = vld [vmem:[%s1034_s27 + $0x68] sm:$0xff] }
  0x1f   : > { %904 = vmatprep.subr.bf16.mxu0 %v974_v4  ;;  %949 = vmatprep.subr.bf16.mxu1 %v974_v4  ;;  %v314_v57 = vmul.f32 %v1064_v7, %v275_v43  ;;  %v373_v58 = vmax.f32 %v1108_v40, 0.0  ;;  %v352_v59 = vadd.f32 %v1071_v10, %v313_v50  ;;  %v315_v60 = vmul.f32 %v1064_v7, %v276_v45  ;;  %v269_v21 = vld [vmem:[%s1034_s27 + $0x60] sm:$0xff]  ;;  %v283_v31 = vld [vmem:[%s1034_s27 + $0xd0] sm:$0xff]  ;;  %v284_v32 = vld [vmem:[%s1034_s27 + $0xd8] sm:$0xff] }
  0x20   : > { %914 = vmatprep.mubr.bf16.mxu0 %v399_v24  ;;  %v316_v61 = vmul.f32 %v1064_v7, %v277_v46  ;;  %v383_v63 = vmax.f32 %v351_v56, 0.0  ;;  %v317_v1 = vmul.f32 %v1064_v7, %v278_v51  ;;  %v318_v2 = vmul.f32 %v1064_v7, %v279_v52  ;;  %v285_v37 = vld [vmem:[%s1034_s27 + $0xe0] sm:$0xff]  ;;  %v286_v38 = vld [vmem:[%s1034_s27 + $0xe8] sm:$0xff] }
  0x21   : > { %v353_v0 = vadd.f32 %v1071_v10, %v314_v57  ;;  %v384_v5 = vmax.f32 %v352_v59, 0.0  ;;  %v354_v6 = vadd.f32 %v1071_v10, %v315_v60  ;;  %v344_v11 = vadd.f32 %v1071_v10, %v305_v55  ;;  %v271_v57 = vld [vmem:[%s1034_s27 + $0x70] sm:$0xff]  ;;  %v272_v59 = vld [vmem:[%s1034_s27 + $0x78] sm:$0xff] }
  0x22   : > { %905 = vmatpush3.bf16.msra.mxu0 %v974_v4  ;;  %957 = vmatpush3.bf16.msra.mxu1 %v974_v4  ;;  %v1142_v4 = vadd.f32 %v1071_v10, %v304_v49  ;;  %v355_v8 = vadd.f32 %v1071_v10, %v316_v61  ;;  %v356_v13 = vadd.f32 %v1071_v10, %v317_v1  ;;  %v287_v1 = vld [vmem:[%s1034_s27 + $0xf0] sm:$0xff] }
  0x23   : > { %906 = vmatprep.subr.bf16.mxu0 %v975_v18  ;;  %950 = vmatprep.subr.bf16.mxu1 %v975_v18  ;;  %v385_v12 = vmax.f32 %v353_v0, 0.0  ;;  %v319_v14 = vmul.f32 %v1064_v7, %v280_v62  ;;  %v407_v17 = vpack.c.bf16 %v384_v5, %v383_v63  ;;  %v320_v20 = vmul.f32 %v1064_v7, %v281_v3 }
  0x24   : > { %v387_v19 = vmax.f32 %v355_v8, 0.0  ;;  %v388_v23 = vmax.f32 %v356_v13, 0.0  ;;  %v357_v24 = vadd.f32 %v1071_v10, %v318_v2  ;;  %v321_v26 = vmul.f32 %v1064_v7, %v282_v9  ;;  %v288_v2 = vld [vmem:[%s1034_s27 + $0xf8] sm:$0xff] }
  0x25   : > { %v358_v25 = vadd.f32 %v1071_v10, %v319_v14  ;;  %v401_v27 = vpack.c.bf16 %v372_v54, %v371_v48  ;;  %v359_v30 = vadd.f32 %v1071_v10, %v320_v20  ;;  %v306_v33 = vmul.f32 %v1064_v7, %v267_v15  ;;  %930 = vmatprep.mubr.bf16.mxu1 %v407_v17 }
  0x26   : > { %907 = vmatpush3.bf16.msra.mxu0 %v975_v18  ;;  %958 = vmatpush3.bf16.msra.mxu1 %v975_v18  ;;  %v386_v18 = vmax.f32 %v354_v6, 0.0  ;;  %v307_v34 = vmul.f32 %v1064_v7, %v268_v16  ;;  %v409_v35 = vpack.c.bf16 %v388_v23, %v387_v19  ;;  %v375_v39 = vmax.f32 %v1142_v4, 0.0 }
  0x27   : > { %908 = vmatprep.subr.bf16.mxu0 %v976_v28  ;;  %951 = vmatprep.subr.bf16.mxu1 %v976_v28  ;;  %v376_v41 = vmax.f32 %v344_v11, 0.0  ;;  %v308_v42 = vmul.f32 %v1064_v7, %v269_v21  ;;  %v309_v43 = vmul.f32 %v1064_v7, %v270_v22  ;;  %v390_v45 = vmax.f32 %v358_v25, 0.0 }
  0x28   : > { %v408_v29 = vpack.c.bf16 %v386_v18, %v385_v12  ;;  %v322_v46 = vmul.f32 %v1064_v7, %v283_v31  ;;  %v323_v48 = vmul.f32 %v1064_v7, %v284_v32  ;;  %v391_v49 = vmax.f32 %v359_v30, 0.0 }
  0x29   : > { %v324_v51 = vmul.f32 %v1064_v7, %v285_v37  ;;  %v325_v52 = vmul.f32 %v1064_v7, %v286_v38  ;;  %v346_v54 = vadd.f32 %v1071_v10, %v307_v34  ;;  %v347_v55 = vadd.f32 %v1071_v10, %v308_v42 }
  0x2a   : > { %909 = vmatpush3.bf16.msra.mxu0 %v976_v28  ;;  %959 = vmatpush3.bf16.msra.mxu1 %v976_v28  ;;  %v374_v28 = vmax.f32 %v1114_v44, 0.0  ;;  %v389_v44 = vmax.f32 %v357_v24, 0.0  ;;  %v348_v56 = vadd.f32 %v1071_v10, %v309_v43  ;;  %v361_v61 = vadd.f32 %v1071_v10, %v322_v46 }
  0x2b   : > { %910 = vmatprep.subr.bf16.mxu0 %v977_v36  ;;  %952 = vmatprep.subr.bf16.mxu1 %v977_v36  ;;  %v362_v62 = vadd.f32 %v1071_v10, %v323_v48  ;;  %v403_v63 = vpack.c.bf16 %v376_v41, %v375_v39  ;;  %v363_v40 = vadd.f32 %v1071_v10, %v324_v51  ;;  %v378_v4 = vmax.f32 %v346_v54, 0.0 }
  0x2c   : > { %v410_v60 = vpack.c.bf16 %v390_v45, %v389_v44  ;;  %v310_v5 = vmul.f32 %v1064_v7, %v271_v57  ;;  %v311_v6 = vmul.f32 %v1064_v7, %v272_v59  ;;  %v393_v8 = vmax.f32 %v361_v61, 0.0 }
  0x2d   : > { %v394_v9 = vmax.f32 %v362_v62, 0.0  ;;  %v326_v11 = vmul.f32 %v1064_v7, %v287_v1  ;;  %v327_v12 = vmul.f32 %v1064_v7, %v288_v2  ;;  %v379_v13 = vmax.f32 %v347_v55, 0.0 }
  0x2e   : > { %911 = vmatpush3.bf16.msra.mxu0 %v977_v36  ;;  %960 = vmatpush3.bf16.msra.mxu1 %v977_v36  ;;  %v360_v36 = vadd.f32 %v1071_v10, %v321_v26  ;;  %v380_v14 = vmax.f32 %v348_v56, 0.0  ;;  %v395_v15 = vmax.f32 %v363_v40, 0.0  ;;  %v349_v18 = vadd.f32 %v1071_v10, %v310_v5 }
  0x2f   : > { %912 = vmatprep.subr.bf16.mxu0 %v978_v53  ;;  %953 = vmatprep.subr.bf16.mxu1 %v978_v53  ;;  %v350_v19 = vadd.f32 %v1071_v10, %v311_v6  ;;  %v412_v20 = vpack.c.bf16 %v394_v9, %v393_v8  ;;  %v365_v21 = vadd.f32 %v1071_v10, %v326_v11 }
  0x30   : > { %v392_v50 = vmax.f32 %v360_v36, 0.0  ;;  %v366_v22 = vadd.f32 %v1071_v10, %v327_v12  ;;  %v405_v23 = vpack.c.bf16 %v380_v14, %v379_v13  ;;  %v381_v7 = vmax.f32 %v349_v18, 0.0 }
  0x31   : > { %v382_v25 = vmax.f32 %v350_v19, 0.0  ;;  %v397_v26 = vmax.f32 %v365_v21, 0.0 }
  0x32   : > { %913 = vmatpush3.bf16.msra.mxu0 %v978_v53  ;;  %961 = vmatpush3.bf16.msra.mxu1 %v978_v53  ;;  %v345_v53 = vadd.f32 %v1071_v10, %v306_v33  ;;  %v411_v0 = vpack.c.bf16 %v392_v50, %v391_v49 }
  0x34   : > { %v377_v3 = vmax.f32 %v345_v53, 0.0 }
  0x35   : > { %915 = vmatmul.mubr.bf16.vlgmr.msra.gmra.mrb[0].mxu0 %v1118_v47  ;;  %931 = vmatmul.mubr.bf16.vlgmr.msra.gmra.mrb[0].mxu1 %v408_v29  ;;  %v402_v47 = vpack.c.bf16 %v374_v28, %v373_v58  ;;  %v364_v58 = vadd.f32 %v1071_v10, %v325_v52  ;;  %v406_v28 = vpack.c.bf16 %v382_v25, %v381_v7 }
  0x36   : > { %918 = vmatprep.mubr.bf16.mxu0 %v401_v27  ;;  %934 = vmatprep.mubr.bf16.mxu1 %v409_v35  ;;  %v404_v17 = vpack.c.bf16 %v378_v4, %v377_v3  ;;  %v398_v27 = vmax.f32 %v366_v22, 0.0 }
  0x37   : > { %v396_v16 = vmax.f32 %v364_v58, 0.0 }
  0x38   : > { %v414_v29 = vpack.c.bf16 %v398_v27, %v397_v26 }
  0x39   : > { %v413_v24 = vpack.c.bf16 %v396_v16, %v395_v15 }
  0x3d   : > { %919 = vmatmul.mubr.bf16.gmra.mrb[4].mxu0 %v402_v47  ;;  %935 = vmatmul.mubr.bf16.gmra.mrb[4].mxu1 %v410_v60 }
  0x3e   : > { %922 = vmatprep.mubr.bf16.mxu0 %v403_v63  ;;  %938 = vmatprep.mubr.bf16.mxu1 %v411_v0 }
  0x45   : > { %923 = vmatmul.mubr.bf16.gmra.mrb[8].mxu0 %v404_v17  ;;  %939 = vmatmul.mubr.bf16.gmra.mrb[8].mxu1 %v412_v20 }
  0x46   : > { %926 = vmatprep.mubr.bf16.mxu0 %v405_v23  ;;  %942 = vmatprep.mubr.bf16.mxu1 %v413_v24 }
  0x4d   : > { %927 = vmatmul.mubr.bf16.gmra.mrb[12].mxu0 %v406_v28  ;;  %943 = vmatmul.mubr.bf16.gmra.mrb[12].mxu1 %v414_v29 }
 0x108   : > { %v916_v10 = vpop.f32.mrb[0].mxu0  ;;  %v1197_v30 = vpop.f32.mrb[0].mxu1 }
 0x109   : > { %642 = vst [vmem:[%s1039_s30 + $0x10] sm:$0xff] %v916_v10  ;;  %v513_v31 = vpop.f32.mrb[1].mxu0  ;;  %658 = vst [vmem:[%s1039_s30 + $0x90] sm:$0xff] %v1197_v30  ;;  %v1202_v32 = vpop.f32.mrb[1].mxu1  ;;  %v715_v41 = vmul.f32 %v916_v10, %v916_v10 }
 0x10a   : > { %640 = vst [vmem:[%s1039_s30] sm:$0xff] %v513_v31  ;;  %v917_v33 = vpop.f32.mrb[2].mxu0  ;;  %656 = vst [vmem:[%s1039_s30 + $0x80] sm:$0xff] %v1202_v32  ;;  %v1207_v34 = vpop.f32.mrb[2].mxu1  ;;  %v713_v37 = vmul.f32 %v513_v31, %v513_v31 }
 0x10b   : > { %643 = vst [vmem:[%s1039_s30 + $0x18] sm:$0xff] %v917_v33  ;;  %v516_v35 = vpop.f32.mrb[3].mxu0  ;;  %659 = vst [vmem:[%s1039_s30 + $0x98] sm:$0xff] %v1207_v34  ;;  %v1212_v36 = vpop.f32.mrb[3].mxu1  ;;  %v716_v44 = vmul.f32 %v917_v33, %v917_v33 }
 0x10c   : > { %641 = vst [vmem:[%s1039_s30 + $0x8] sm:$0xff] %v516_v35  ;;  %v673_v38 = vadd.f32 %v516_v35, %v513_v31  ;;  %v714_v39 = vmul.f32 %v516_v35, %v516_v35  ;;  %657 = vst [vmem:[%s1039_s30 + $0x88] sm:$0xff] %v1212_v36 }
 0x10e   : > { %v674_v42 = vadd.f32 %v916_v10, %v673_v38  ;;  %v745_v43 = vadd.f32 %v714_v39, %v713_v37 }
 0x110   : > { %v746_v45 = vadd.f32 %v745_v43, %v715_v41  ;;  %v920_v46 = vpop.f32.mrb[4].mxu0  ;;  %v675_v48 = vadd.f32 %v917_v33, %v674_v42  ;;  %v1217_v49 = vpop.f32.mrb[4].mxu1 }
 0x111   : > { %646 = vst [vmem:[%s1039_s30 + $0x30] sm:$0xff] %v920_v46  ;;  %v529_v50 = vpop.f32.mrb[5].mxu0  ;;  %662 = vst [vmem:[%s1039_s30 + $0xb0] sm:$0xff] %v1217_v49  ;;  %v1222_v51 = vpop.f32.mrb[5].mxu1  ;;  %v719_v62 = vmul.f32 %v920_v46, %v920_v46 }
 0x112   : > { %644 = vst [vmem:[%s1039_s30 + $0x20] sm:$0xff] %v529_v50  ;;  %v676_v52 = vadd.f32 %v675_v48, %v529_v50  ;;  %v717_v47 = vmul.f32 %v529_v50, %v529_v50  ;;  %v747_v53 = vadd.f32 %v746_v45, %v716_v44  ;;  %v921_v54 = vpop.f32.mrb[6].mxu0  ;;  %660 = vst [vmem:[%s1039_s30 + $0xa0] sm:$0xff] %v1222_v51  ;;  %v1227_v55 = vpop.f32.mrb[6].mxu1 }
 0x113   : > { %647 = vst [vmem:[%s1039_s30 + $0x38] sm:$0xff] %v921_v54  ;;  %v532_v56 = vpop.f32.mrb[7].mxu0  ;;  %663 = vst [vmem:[%s1039_s30 + $0xb8] sm:$0xff] %v1227_v55  ;;  %v1232_v57 = vpop.f32.mrb[7].mxu1  ;;  %v720_v40 = vmul.f32 %v921_v54, %v921_v54  ;;  %v729_v48 = vmul.f32 %v1202_v32, %v1202_v32 }
 0x114   : > { %v748_v59 = vadd.f32 %v747_v53, %v717_v47  ;;  %645 = vst [vmem:[%s1039_s30 + $0x28] sm:$0xff] %v532_v56  ;;  %v677_v60 = vadd.f32 %v676_v52, %v532_v56  ;;  %v718_v61 = vmul.f32 %v532_v56, %v532_v56  ;;  %661 = vst [vmem:[%s1039_s30 + $0xa8] sm:$0xff] %v1232_v57 }
 0x115   : > { %v731_v56 = vmul.f32 %v1197_v30, %v1197_v30 }
 0x116   : > { %v678_v63 = vadd.f32 %v920_v46, %v677_v60  ;;  %v749_v0 = vadd.f32 %v748_v59, %v718_v61  ;;  %v732_v61 = vmul.f32 %v1207_v34, %v1207_v34 }
 0x118   : > { %v750_v58 = vadd.f32 %v749_v0, %v719_v62  ;;  %v924_v1 = vpop.f32.mrb[8].mxu0  ;;  %v679_v2 = vadd.f32 %v921_v54, %v678_v63  ;;  %v1237_v3 = vpop.f32.mrb[8].mxu1  ;;  %v730_v54 = vmul.f32 %v1212_v36, %v1212_v36 }
 0x119   : > { %650 = vst [vmem:[%s1039_s30 + $0x50] sm:$0xff] %v924_v1  ;;  %v545_v4 = vpop.f32.mrb[9].mxu0  ;;  %666 = vst [vmem:[%s1039_s30 + $0xd0] sm:$0xff] %v1237_v3  ;;  %v1242_v5 = vpop.f32.mrb[9].mxu1  ;;  %v723_v18 = vmul.f32 %v924_v1, %v924_v1 }
 0x11a   : > { %648 = vst [vmem:[%s1039_s30 + $0x40] sm:$0xff] %v545_v4  ;;  %v680_v6 = vadd.f32 %v679_v2, %v545_v4  ;;  %v721_v8 = vmul.f32 %v545_v4, %v545_v4  ;;  %v751_v9 = vadd.f32 %v750_v58, %v720_v40  ;;  %v925_v11 = vpop.f32.mrb[10].mxu0  ;;  %664 = vst [vmem:[%s1039_s30 + $0xc0] sm:$0xff] %v1242_v5  ;;  %v1247_v12 = vpop.f32.mrb[10].mxu1 }
 0x11b   : > { %651 = vst [vmem:[%s1039_s30 + $0x58] sm:$0xff] %v925_v11  ;;  %v548_v13 = vpop.f32.mrb[11].mxu0  ;;  %667 = vst [vmem:[%s1039_s30 + $0xd8] sm:$0xff] %v1247_v12  ;;  %v1252_v14 = vpop.f32.mrb[11].mxu1  ;;  %v724_v21 = vmul.f32 %v925_v11, %v925_v11 }
 0x11c   : > { %v752_v15 = vadd.f32 %v751_v9, %v721_v8  ;;  %649 = vst [vmem:[%s1039_s30 + $0x48] sm:$0xff] %v548_v13  ;;  %v681_v16 = vadd.f32 %v680_v6, %v548_v13  ;;  %v722_v17 = vmul.f32 %v548_v13, %v548_v13  ;;  %665 = vst [vmem:[%s1039_s30 + $0xc8] sm:$0xff] %v1252_v14 }
 0x11e   : > { %v682_v19 = vadd.f32 %v924_v1, %v681_v16  ;;  %v753_v20 = vadd.f32 %v752_v15, %v722_v17  ;;  %v734_v1 = vmul.f32 %v1232_v57, %v1232_v57  ;;  %v738_v15 = vmul.f32 %v1252_v14, %v1252_v14 }
 0x120   : > { %v754_v22 = vadd.f32 %v753_v20, %v723_v18  ;;  %v928_v23 = vpop.f32.mrb[12].mxu0  ;;  %v683_v24 = vadd.f32 %v925_v11, %v682_v19  ;;  %v1257_v7 = vpop.f32.mrb[12].mxu1 }
 0x121   : > { %654 = vst [vmem:[%s1039_s30 + $0x70] sm:$0xff] %v928_v23  ;;  %v561_v25 = vpop.f32.mrb[13].mxu0  ;;  %670 = vst [vmem:[%s1039_s30 + $0xf0] sm:$0xff] %v1257_v7  ;;  %v625_v26 = vpop.f32.mrb[13].mxu1  ;;  %v727_v41 = vmul.f32 %v928_v23, %v928_v23 }
 0x122   : > { %652 = vst [vmem:[%s1039_s30 + $0x60] sm:$0xff] %v561_v25  ;;  %v684_v27 = vadd.f32 %v683_v24, %v561_v25  ;;  %v725_v28 = vmul.f32 %v561_v25, %v561_v25  ;;  %v755_v29 = vadd.f32 %v754_v22, %v724_v21  ;;  %v929_v10 = vpop.f32.mrb[14].mxu0  ;;  %668 = vst [vmem:[%s1039_s30 + $0xe0] sm:$0xff] %v625_v26  ;;  %v945_v31 = vpop.f32.mrb[14].mxu1 }
 0x123   : > { %655 = vst [vmem:[%s1039_s30 + $0x78] sm:$0xff] %v929_v10  ;;  %v564_v33 = vpop.f32.mrb[15].mxu0  ;;  %671 = vst [vmem:[%s1039_s30 + $0xf8] sm:$0xff] %v945_v31  ;;  %v628_v35 = vpop.f32.mrb[15].mxu1  ;;  %v728_v44 = vmul.f32 %v929_v10, %v929_v10 }
 0x124   : > { %v756_v37 = vadd.f32 %v755_v29, %v725_v28  ;;  %653 = vst [vmem:[%s1039_s30 + $0x68] sm:$0xff] %v564_v33  ;;  %v685_v38 = vadd.f32 %v684_v27, %v564_v33  ;;  %v726_v39 = vmul.f32 %v564_v33, %v564_v33  ;;  %669 = vst [vmem:[%s1039_s30 + $0xe8] sm:$0xff] %v628_v35 }
 0x125   : > { %v742_v24 = vmul.f32 %v628_v35, %v628_v35 }
 0x126   : > { %v686_v42 = vadd.f32 %v928_v23, %v685_v38  ;;  %v757_v43 = vadd.f32 %v756_v37, %v726_v39 }
 0x128   : > { %v758_v45 = vadd.f32 %v757_v43, %v727_v41  ;;  %v687_v46 = vadd.f32 %v929_v10, %v686_v42 }
 0x12a   : > { %v688_v50 = vadd.f32 %v687_v46, %v1202_v32  ;;  %v759_v52 = vadd.f32 %v758_v45, %v728_v44  ;;  %v733_v32 = vmul.f32 %v1222_v51, %v1222_v51 }
 0x12c   : > { %v760_v47 = vadd.f32 %v759_v52, %v729_v48  ;;  %v689_v53 = vadd.f32 %v688_v50, %v1212_v36 }
 0x12e   : > { %v690_v59 = vadd.f32 %v1197_v30, %v689_v53  ;;  %v761_v60 = vadd.f32 %v760_v47, %v730_v54  ;;  %v735_v30 = vmul.f32 %v1217_v49, %v1217_v49 }
 0x130   : > { %v762_v62 = vadd.f32 %v761_v60, %v731_v56  ;;  %v691_v63 = vadd.f32 %v1207_v34, %v690_v59  ;;  %v736_v34 = vmul.f32 %v1227_v55, %v1227_v55 }
 0x132   : > { %v692_v0 = vadd.f32 %v691_v63, %v1222_v51  ;;  %v763_v40 = vadd.f32 %v762_v62, %v732_v61  ;;  %v737_v51 = vmul.f32 %v1242_v5, %v1242_v5 }
 0x134   : > { %v764_v58 = vadd.f32 %v763_v40, %v733_v32  ;;  %v693_v36 = vadd.f32 %v692_v0, %v1232_v57 }
 0x136   : > { %v694_v2 = vadd.f32 %v1217_v49, %v693_v36  ;;  %v765_v4 = vadd.f32 %v764_v58, %v734_v1  ;;  %v739_v49 = vmul.f32 %v1237_v3, %v1237_v3 }
 0x138   : > { %v766_v6 = vadd.f32 %v765_v4, %v735_v30  ;;  %v695_v8 = vadd.f32 %v1227_v55, %v694_v2  ;;  %v740_v55 = vmul.f32 %v1247_v12, %v1247_v12 }
 0x13a   : > { %v696_v9 = vadd.f32 %v695_v8, %v1242_v5  ;;  %v767_v11 = vadd.f32 %v766_v6, %v736_v34  ;;  %v741_v5 = vmul.f32 %v625_v26, %v625_v26 }
 0x13c   : > { %v768_v13 = vadd.f32 %v767_v11, %v737_v51  ;;  %v697_v57 = vadd.f32 %v696_v9, %v1252_v14  ;;  %v743_v14 = vmul.f32 %v1257_v7, %v1257_v7 }
 0x13e   : > { %v698_v16 = vadd.f32 %v1237_v3, %v697_v57  ;;  %v769_v17 = vadd.f32 %v768_v13, %v738_v15  ;;  %v744_v3 = vmul.f32 %v945_v31, %v945_v31 }
 0x140   : > { %v770_v18 = vadd.f32 %v769_v17, %v739_v49  ;;  %v699_v19 = vadd.f32 %v1247_v12, %v698_v16 }
 0x142   : > { %v700_v20 = vadd.f32 %v699_v19, %v625_v26  ;;  %v771_v21 = vadd.f32 %v770_v18, %v740_v55 }
 0x144   : > { %v772_v22 = vadd.f32 %v771_v21, %v741_v5  ;;  %v701_v23 = vadd.f32 %v700_v20, %v628_v35  ;;  %v672_v35 = vld [vmem:[%s1327_s5] sm:$0x1] }
 0x146   : > { %v702_v25 = vadd.f32 %v1257_v7, %v701_v23  ;;  %v773_v27 = vadd.f32 %v772_v22, %v742_v24 }
 0x148   : > { %v703_v28 = vadd.f32 %v945_v31, %v702_v25  ;;  %v774_v29 = vadd.f32 %v773_v27, %v743_v14  ;;  %v712_v31 = vld [vmem:[%s1328_s6] sm:$0x1] }
 0x14a   : > { %v704_v10 = vrot.slane %v703_v28, 4  ;;  %v775_v33 = vadd.f32 %v774_v29, %v744_v3 }
 0x14c   : > { %v705_v37 = vadd.f32 %v704_v10, %v703_v28  ;;  %v776_v38 = vrot.slane %v775_v33, 4 }
 0x14e   : > { %v706_v12 = vrot.slane %v705_v37, 2  ;;  %v777_v39 = vadd.f32 %v776_v38, %v775_v33 }
 0x150   : > { %v707_v26 = vadd.f32 %v706_v12, %v705_v37  ;;  %v778_v41 = vrot.slane %v777_v39, 2 }
 0x152   : > { %v708_v42 = vrot.slane %v707_v26, 1  ;;  %v779_v43 = vadd.f32 %v778_v41, %v777_v39 }
 0x154   : > { %v709_v44 = vadd.f32 %v708_v42, %v707_v26  ;;  %v780_v7 = vrot.slane %v779_v43, 1 }
 0x156   : > { %v710_v45 = vadd.f32 %v709_v44, %v672_v35  ;;  %v781_v46 = vadd.f32 %v780_v7, %v779_v43 }
 0x158   : > { %711 = vst [vmem:[%s1327_s5] sm:$0x1] %v710_v45  ;;  %v782_v48 = vadd.f32 %v781_v46, %v712_v31 }
 0x15a   : > { %783 = vst [vmem:[%s1328_s6] sm:$0x1] %v782_v48 }
 0x15b PF: > { %s17_s21 = sadd.s32 1, %s985_s21  }
 0x15c   : > { %p14_p5 = scmp.ge.s32.totalorder %s17_s21, 4  }
 0x15e   :  { %16 = sbr.rel (!%p14_p5) target bundleno = 1 (0x1), region = 86 }

// kernel: bottleneck_pallas.7
= control target key start
LH: loop header
LB: loop body
LE: loop exit
PB: predicated region body
PF: predicated region fallthrough
CT: control target
= control target key end

     0   :  { %s729_s21 = smov 0   ;;  %s1004_s0 = inlined_call_operand.vmem [shape: f32[512,128], index: 0, kind: input, shape index: {}]   ;;  %s1005_s1 = inlined_call_operand.vmem [shape: f32[512,128], index: 1, kind: input, shape index: {}]   ;;  %s1006_s2 = inlined_call_operand.vmem [shape: f32[1,128], index: 2, kind: input, shape index: {}]   ;;  %s1007_s3 = inlined_call_operand.vmem [shape: f32[1,128], index: 3, kind: input, shape index: {}]   ;;  %s1008_s4 = inlined_call_operand.vmem [shape: f32[1,128], index: 4, kind: input, shape index: {}]   ;;  %s1009_s5 = inlined_call_operand.vmem [shape: f32[1,128], index: 5, kind: input, shape index: {}]   ;;  %s1010_s6 = inlined_call_operand.vmem [shape: f32[512,128], index: 6, kind: output, shape index: {}]  }
   0x1 LB: > { %s661_s22 = sadd.s32 4294967295, %s692_s21   ;;  %p665_p0 = scmp.ge.s32.totalorder %s692_s21, 1  ;;  %s692_s21 = sphi %s729_s21, %s16_s21  }
   0x2   : > { %p224_p1 = scmp.lt.s32.totalorder %s692_s21, 3 }
   0x4   : > { %p225_p2 = pnand %p665_p0, %p224_p1 }
   0x5   : > { %s666_s23 = sshll.u32 (!%p225_p2), %s661_s22, 5  ;;  %v742_v0 = vld [vmem:[%s1006_s2] ss:$0 sm:$0xff] (!%p225_p2) }
   0x6   : > { %228 = sbr.rel (%p225_p2) target bundleno = 72 (0x48), region = 44  ;;  %p260_p3 = scmp.lt.s32.totalorder (!%p225_p2), %s666_s23, 63  ;;  %v747_v1 = vld [vmem:[%s1008_s4] ss:$0 sm:$0xff] (!%p225_p2) }
   0x7   : > { %v764_v2 = vld [vmem:[%s1007_s3] ss:$0 sm:$0xff] (!%p225_p2) }
   0x8   : > { %v791_v25 = vld [vmem:[%s1009_s5] ss:$0 sm:$0xff] (!%p225_p2) }
   0xd   : > { %s1012_s23 = smov (!%p260_p3, %s666_s23), 63 }
   0xe   : > { %s737_s24 = sshll.u32 %s1012_s23, 3 }
   0xf   : > { %s753_s7 = scalar_lea.vmem %s1004_s0, %s737_s24  ;;  %s759_s10 = scalar_lea.vmem %s1005_s1, %s737_s24 }
  0x10   : > { %v277_v3 = vld [vmem:[%s753_s7] sm:$0xff]  ;;  %v278_v5 = vld [vmem:[%s753_s7 + $0x8] sm:$0xff]  ;;  %v279_v10 = vld [vmem:[%s753_s7 + $0x10] sm:$0xff]  ;;  %s812_s17 = scalar_lea.vmem %s1010_s6, %s737_s24 }
  0x11   : > { %v387_v4 = vld [vmem:[%s759_s10] sm:$0xff]  ;;  %v316_v6 = vmul.f32 %v742_v0, %v277_v3  ;;  %v317_v8 = vmul.f32 %v742_v0, %v278_v5  ;;  %v388_v9 = vld [vmem:[%s759_s10 + $0x8] sm:$0xff]  ;;  %v389_v11 = vld [vmem:[%s759_s10 + $0x10] sm:$0xff]  ;;  %v318_v13 = vmul.f32 %v742_v0, %v279_v10 }
  0x12   : > { %v426_v7 = vmul.f32 %v747_v1, %v387_v4  ;;  %v427_v12 = vmul.f32 %v747_v1, %v388_v9  ;;  %v428_v14 = vmul.f32 %v747_v1, %v389_v11  ;;  %v280_v15 = vld [vmem:[%s753_s7 + $0x18] sm:$0xff]  ;;  %v281_v17 = vld [vmem:[%s753_s7 + $0x20] sm:$0xff]  ;;  %v282_v23 = vld [vmem:[%s753_s7 + $0x28] sm:$0xff] }
  0x13   : > { %v390_v16 = vld [vmem:[%s759_s10 + $0x18] sm:$0xff]  ;;  %v355_v18 = vadd.f32 %v764_v2, %v316_v6  ;;  %v356_v19 = vadd.f32 %v764_v2, %v317_v8  ;;  %v319_v20 = vmul.f32 %v742_v0, %v280_v15  ;;  %v391_v22 = vld [vmem:[%s759_s10 + $0x20] sm:$0xff]  ;;  %v392_v24 = vld [vmem:[%s759_s10 + $0x28] sm:$0xff]  ;;  %v357_v26 = vadd.f32 %v764_v2, %v318_v13 }
  0x14   : > { %v429_v21 = vmul.f32 %v747_v1, %v390_v16  ;;  %v320_v27 = vmul.f32 %v742_v0, %v281_v17  ;;  %v430_v28 = vmul.f32 %v747_v1, %v391_v22  ;;  %v321_v29 = vmul.f32 %v742_v0, %v282_v23  ;;  %v283_v30 = vld [vmem:[%s753_s7 + $0x30] sm:$0xff]  ;;  %v284_v40 = vld [vmem:[%s753_s7 + $0x38] sm:$0xff]  ;;  %v285_v50 = vld [vmem:[%s753_s7 + $0x40] sm:$0xff] }
  0x15   : > { %v393_v31 = vld [vmem:[%s759_s10 + $0x30] sm:$0xff]  ;;  %v458_v32 = vadd.f32 %v426_v7, %v355_v18  ;;  %v459_v33 = vadd.f32 %v427_v12, %v356_v19  ;;  %v358_v34 = vadd.f32 %v764_v2, %v319_v20  ;;  %v431_v35 = vmul.f32 %v747_v1, %v392_v24  ;;  %v394_v49 = vld [vmem:[%s759_s10 + $0x38] sm:$0xff]  ;;  %v395_v55 = vld [vmem:[%s759_s10 + $0x40] sm:$0xff] }
  0x16   : > { %v460_v36 = vadd.f32 %v428_v14, %v357_v26  ;;  %v359_v37 = vadd.f32 %v764_v2, %v320_v27  ;;  %v360_v38 = vadd.f32 %v764_v2, %v321_v29  ;;  %v322_v39 = vmul.f32 %v742_v0, %v283_v30  ;;  %v286_v60 = vld [vmem:[%s753_s7 + $0x48] sm:$0xff]  ;;  %v287_v5 = vld [vmem:[%s753_s7 + $0x50] sm:$0xff]  ;;  %v288_v7 = vld [vmem:[%s753_s7 + $0x58] sm:$0xff] }
  0x17   : > { %v497_v41 = vadd.f32 %v791_v25, %v458_v32  ;;  %v498_v42 = vadd.f32 %v791_v25, %v459_v33  ;;  %v461_v43 = vadd.f32 %v429_v21, %v358_v34  ;;  %v432_v44 = vmul.f32 %v747_v1, %v393_v31  ;;  %v396_v61 = vld [vmem:[%s759_s10 + $0x48] sm:$0xff]  ;;  %v397_v6 = vld [vmem:[%s759_s10 + $0x50] sm:$0xff]  ;;  %v398_v12 = vld [vmem:[%s759_s10 + $0x58] sm:$0xff] }
  0x18   : > { %v499_v45 = vadd.f32 %v791_v25, %v460_v36  ;;  %v462_v46 = vadd.f32 %v430_v28, %v359_v37  ;;  %v463_v47 = vadd.f32 %v431_v35, %v360_v38  ;;  %v361_v48 = vadd.f32 %v764_v2, %v322_v39  ;;  %v289_v17 = vld [vmem:[%s753_s7 + $0x60] sm:$0xff]  ;;  %v290_v23 = vld [vmem:[%s753_s7 + $0x68] sm:$0xff]  ;;  %v291_v34 = vld [vmem:[%s753_s7 + $0x70] sm:$0xff] }
  0x19   : > { %v529_v51 = vmax.f32 %v497_v41, 0.0  ;;  %v530_v52 = vmax.f32 %v498_v42, 0.0  ;;  %v500_v53 = vadd.f32 %v791_v25, %v461_v43  ;;  %v323_v54 = vmul.f32 %v742_v0, %v284_v40  ;;  %v399_v18 = vld [vmem:[%s759_s10 + $0x60] sm:$0xff]  ;;  %v400_v29 = vld [vmem:[%s759_s10 + $0x68] sm:$0xff]  ;;  %v401_v39 = vld [vmem:[%s759_s10 + $0x70] sm:$0xff] }
  0x1a   : > { %v531_v56 = vmax.f32 %v499_v45, 0.0  ;;  %v501_v57 = vadd.f32 %v791_v25, %v462_v46  ;;  %v502_v58 = vadd.f32 %v791_v25, %v463_v47  ;;  %v464_v59 = vadd.f32 %v432_v44, %v361_v48  ;;  %v292_v44 = vld [vmem:[%s753_s7 + $0x78] sm:$0xff] }
  0x1b   : > { %561 = vst [vmem:[%s812_s17] sm:$0xff] %v529_v51  ;;  %562 = vst [vmem:[%s812_s17 + $0x8] sm:$0xff] %v530_v52  ;;  %v532_v62 = vmax.f32 %v500_v53, 0.0  ;;  %v362_v63 = vadd.f32 %v764_v2, %v323_v54  ;;  %v433_v3 = vmul.f32 %v747_v1, %v394_v49  ;;  %v324_v4 = vmul.f32 %v742_v0, %v285_v50  ;;  %v402_v49 = vld [vmem:[%s759_s10 + $0x78] sm:$0xff]  ;;  %v293_v54 = vld [vmem:[%s753_s7 + $0x80] sm:$0xff] }
  0x1c   : > { %563 = vst [vmem:[%s812_s17 + $0x10] sm:$0xff] %v531_v56  ;;  %v533_v8 = vmax.f32 %v501_v57, 0.0  ;;  %v534_v9 = vmax.f32 %v502_v58, 0.0  ;;  %v503_v10 = vadd.f32 %v791_v25, %v464_v59  ;;  %v434_v11 = vmul.f32 %v747_v1, %v395_v55  ;;  %v403_v59 = vld [vmem:[%s759_s10 + $0x80] sm:$0xff] }
  0x1d   : > { %564 = vst [vmem:[%s812_s17 + $0x18] sm:$0xff] %v532_v62  ;;  %v465_v13 = vadd.f32 %v433_v3, %v362_v63  ;;  %v363_v14 = vadd.f32 %v764_v2, %v324_v4  ;;  %v325_v15 = vmul.f32 %v742_v0, %v286_v60  ;;  %v435_v16 = vmul.f32 %v747_v1, %v396_v61  ;;  %v294_v60 = vld [vmem:[%s753_s7 + $0x88] sm:$0xff] }
  0x1e   : > { %565 = vst [vmem:[%s812_s17 + $0x20] sm:$0xff] %v533_v8  ;;  %566 = vst [vmem:[%s812_s17 + $0x28] sm:$0xff] %v534_v9  ;;  %v535_v19 = vmax.f32 %v503_v10, 0.0  ;;  %v326_v20 = vmul.f32 %v742_v0, %v287_v5  ;;  %v436_v21 = vmul.f32 %v747_v1, %v397_v6  ;;  %v327_v22 = vmul.f32 %v742_v0, %v288_v7  ;;  %v404_v61 = vld [vmem:[%s759_s10 + $0x88] sm:$0xff]  ;;  %v295_v9 = vld [vmem:[%s753_s7 + $0x90] sm:$0xff] }
  0x1f   : > { %v504_v24 = vadd.f32 %v791_v25, %v465_v13  ;;  %v466_v26 = vadd.f32 %v434_v11, %v363_v14  ;;  %v364_v27 = vadd.f32 %v764_v2, %v325_v15  ;;  %v437_v28 = vmul.f32 %v747_v1, %v398_v12  ;;  %v405_v10 = vld [vmem:[%s759_s10 + $0x90] sm:$0xff]  ;;  %v296_v11 = vld [vmem:[%s753_s7 + $0x98] sm:$0xff] }
  0x20   : > { %567 = vst [vmem:[%s812_s17 + $0x30] sm:$0xff] %v535_v19  ;;  %v365_v30 = vadd.f32 %v764_v2, %v326_v20  ;;  %v366_v31 = vadd.f32 %v764_v2, %v327_v22  ;;  %v328_v32 = vmul.f32 %v742_v0, %v289_v17  ;;  %v438_v33 = vmul.f32 %v747_v1, %v399_v18 }
  0x21   : > { %v536_v35 = vmax.f32 %v504_v24, 0.0  ;;  %v505_v36 = vadd.f32 %v791_v25, %v466_v26  ;;  %v467_v37 = vadd.f32 %v435_v16, %v364_v27  ;;  %v329_v38 = vmul.f32 %v742_v0, %v290_v23  ;;  %v406_v16 = vld [vmem:[%s759_s10 + $0x98] sm:$0xff]  ;;  %v407_v27 = vld [vmem:[%s759_s10 + $0xa0] sm:$0xff] }
  0x22   : > { %v468_v40 = vadd.f32 %v436_v21, %v365_v30  ;;  %v469_v41 = vadd.f32 %v437_v28, %v366_v31  ;;  %v367_v42 = vadd.f32 %v764_v2, %v328_v32  ;;  %v439_v43 = vmul.f32 %v747_v1, %v400_v29  ;;  %v297_v21 = vld [vmem:[%s753_s7 + $0xa0] sm:$0xff]  ;;  %v298_v28 = vld [vmem:[%s753_s7 + $0xa8] sm:$0xff] }
  0x23   : > { %568 = vst [vmem:[%s812_s17 + $0x38] sm:$0xff] %v536_v35  ;;  %v537_v45 = vmax.f32 %v505_v36, 0.0  ;;  %v506_v46 = vadd.f32 %v791_v25, %v467_v37  ;;  %v368_v47 = vadd.f32 %v764_v2, %v329_v38  ;;  %v330_v48 = vmul.f32 %v742_v0, %v291_v34  ;;  %v408_v37 = vld [vmem:[%s759_s10 + $0xa8] sm:$0xff]  ;;  %v299_v38 = vld [vmem:[%s753_s7 + $0xb0] sm:$0xff] }
  0x24   : > { %v507_v50 = vadd.f32 %v791_v25, %v468_v40  ;;  %v508_v51 = vadd.f32 %v791_v25, %v469_v41  ;;  %v470_v52 = vadd.f32 %v438_v33, %v367_v42  ;;  %v440_v53 = vmul.f32 %v747_v1, %v401_v39 }
  0x25   : > { %569 = vst [vmem:[%s812_s17 + $0x40] sm:$0xff] %v537_v45  ;;  %v538_v55 = vmax.f32 %v506_v46, 0.0  ;;  %v471_v56 = vadd.f32 %v439_v43, %v368_v47  ;;  %v369_v57 = vadd.f32 %v764_v2, %v330_v48  ;;  %v331_v58 = vmul.f32 %v742_v0, %v292_v44  ;;  %v409_v47 = vld [vmem:[%s759_s10 + $0xb0] sm:$0xff]  ;;  %v300_v48 = vld [vmem:[%s753_s7 + $0xb8] sm:$0xff] }
  0x26   : > { %v539_v62 = vmax.f32 %v507_v50, 0.0  ;;  %v540_v63 = vmax.f32 %v508_v51, 0.0  ;;  %v509_v3 = vadd.f32 %v791_v25, %v470_v52  ;;  %v441_v4 = vmul.f32 %v747_v1, %v402_v49 }
  0x27   : > { %570 = vst [vmem:[%s812_s17 + $0x48] sm:$0xff] %v538_v55  ;;  %v510_v5 = vadd.f32 %v791_v25, %v471_v56  ;;  %v472_v6 = vadd.f32 %v440_v53, %v369_v57  ;;  %v370_v7 = vadd.f32 %v764_v2, %v331_v58  ;;  %v332_v8 = vmul.f32 %v742_v0, %v293_v54  ;;  %v410_v53 = vld [vmem:[%s759_s10 + $0xb8] sm:$0xff]  ;;  %v301_v58 = vld [vmem:[%s753_s7 + $0xc0] sm:$0xff] }
  0x28   : > { %571 = vst [vmem:[%s812_s17 + $0x50] sm:$0xff] %v539_v62  ;;  %572 = vst [vmem:[%s812_s17 + $0x58] sm:$0xff] %v540_v63  ;;  %v541_v12 = vmax.f32 %v509_v3, 0.0  ;;  %v442_v13 = vmul.f32 %v747_v1, %v403_v59  ;;  %v333_v14 = vmul.f32 %v742_v0, %v294_v60  ;;  %v443_v15 = vmul.f32 %v747_v1, %v404_v61  ;;  %v411_v63 = vld [vmem:[%s759_s10 + $0xc0] sm:$0xff]  ;;  %v302_v3 = vld [vmem:[%s753_s7 + $0xc8] sm:$0xff] }
  0x29   : > { %v542_v17 = vmax.f32 %v510_v5, 0.0  ;;  %v511_v18 = vadd.f32 %v791_v25, %v472_v6  ;;  %v473_v19 = vadd.f32 %v441_v4, %v370_v7  ;;  %v371_v20 = vadd.f32 %v764_v2, %v332_v8  ;;  %v412_v4 = vld [vmem:[%s759_s10 + $0xc8] sm:$0xff] }
  0x2a   : > { %573 = vst [vmem:[%s812_s17 + $0x60] sm:$0xff] %v541_v12  ;;  %v372_v22 = vadd.f32 %v764_v2, %v333_v14  ;;  %v334_v23 = vmul.f32 %v742_v0, %v295_v9  ;;  %v444_v24 = vmul.f32 %v747_v1, %v405_v10  ;;  %v335_v26 = vmul.f32 %v742_v0, %v296_v11  ;;  %v413_v14 = vld [vmem:[%s759_s10 + $0xd0] sm:$0xff] }
  0x2b   : > { %574 = vst [vmem:[%s812_s17 + $0x68] sm:$0xff] %v542_v17  ;;  %v543_v29 = vmax.f32 %v511_v18, 0.0  ;;  %v512_v30 = vadd.f32 %v791_v25, %v473_v19  ;;  %v474_v31 = vadd.f32 %v442_v13, %v371_v20  ;;  %v445_v32 = vmul.f32 %v747_v1, %v406_v16  ;;  %v303_v13 = vld [vmem:[%s753_s7 + $0xd0] sm:$0xff]  ;;  %v414_v20 = vld [vmem:[%s759_s10 + $0xd8] sm:$0xff] }
  0x2c   : > { %v475_v33 = vadd.f32 %v443_v15, %v372_v22  ;;  %v373_v34 = vadd.f32 %v764_v2, %v334_v23  ;;  %v374_v35 = vadd.f32 %v764_v2, %v335_v26  ;;  %v336_v36 = vmul.f32 %v742_v0, %v297_v21  ;;  %v304_v15 = vld [vmem:[%s753_s7 + $0xd8] sm:$0xff]  ;;  %v305_v26 = vld [vmem:[%s753_s7 + $0xe0] sm:$0xff] }
  0x2d   : > { %575 = vst [vmem:[%s812_s17 + $0x70] sm:$0xff] %v543_v29  ;;  %v544_v39 = vmax.f32 %v512_v30, 0.0  ;;  %v513_v40 = vadd.f32 %v791_v25, %v474_v31  ;;  %v446_v41 = vmul.f32 %v747_v1, %v407_v27  ;;  %v337_v42 = vmul.f32 %v742_v0, %v298_v28  ;;  %v415_v31 = vld [vmem:[%s759_s10 + $0xe0] sm:$0xff] }
  0x2e   : > { %v514_v43 = vadd.f32 %v791_v25, %v475_v33  ;;  %v476_v44 = vadd.f32 %v444_v24, %v373_v34  ;;  %v477_v45 = vadd.f32 %v445_v32, %v374_v35  ;;  %v375_v46 = vadd.f32 %v764_v2, %v336_v36  ;;  %v306_v32 = vld [vmem:[%s753_s7 + $0xe8] sm:$0xff] }
  0x2f   : > { %576 = vst [vmem:[%s812_s17 + $0x78] sm:$0xff] %v544_v39  ;;  %v545_v49 = vmax.f32 %v513_v40, 0.0  ;;  %v376_v50 = vadd.f32 %v764_v2, %v337_v42  ;;  %v447_v51 = vmul.f32 %v747_v1, %v408_v37  ;;  %v338_v52 = vmul.f32 %v742_v0, %v299_v38  ;;  %v307_v42 = vld [vmem:[%s753_s7 + $0xf0] sm:$0xff] }
  0x30   : > { %v546_v54 = vmax.f32 %v514_v43, 0.0  ;;  %v515_v55 = vadd.f32 %v791_v25, %v476_v44  ;;  %v516_v56 = vadd.f32 %v791_v25, %v477_v45  ;;  %v478_v57 = vadd.f32 %v446_v41, %v375_v46  ;;  %v416_v41 = vld [vmem:[%s759_s10 + $0xe8] sm:$0xff] }
  0x31   : > { %577 = vst [vmem:[%s812_s17 + $0x80] sm:$0xff] %v545_v49  ;;  %v479_v59 = vadd.f32 %v447_v51, %v376_v50  ;;  %v377_v60 = vadd.f32 %v764_v2, %v338_v52  ;;  %v448_v61 = vmul.f32 %v747_v1, %v409_v47  ;;  %v339_v62 = vmul.f32 %v742_v0, %v300_v48  ;;  %v417_v51 = vld [vmem:[%s759_s10 + $0xf0] sm:$0xff]  ;;  %v308_v52 = vld [vmem:[%s753_s7 + $0xf8] sm:$0xff] }
  0x32   : > { %578 = vst [vmem:[%s812_s17 + $0x88] sm:$0xff] %v546_v54  ;;  %v547_v5 = vmax.f32 %v515_v55, 0.0  ;;  %v548_v6 = vmax.f32 %v516_v56, 0.0  ;;  %v517_v7 = vadd.f32 %v791_v25, %v478_v57  ;;  %v449_v8 = vmul.f32 %v747_v1, %v410_v53  ;;  %v418_v57 = vld [vmem:[%s759_s10 + $0xf8] sm:$0xff] }
  0x33   : > { %v518_v9 = vadd.f32 %v791_v25, %v479_v59  ;;  %v480_v10 = vadd.f32 %v448_v61, %v377_v60  ;;  %v378_v11 = vadd.f32 %v764_v2, %v339_v62  ;;  %v340_v12 = vmul.f32 %v742_v0, %v301_v58 }
  0x34   : > { %579 = vst [vmem:[%s812_s17 + $0x90] sm:$0xff] %v547_v5  ;;  %580 = vst [vmem:[%s812_s17 + $0x98] sm:$0xff] %v548_v6  ;;  %v549_v16 = vmax.f32 %v517_v7, 0.0  ;;  %v450_v17 = vmul.f32 %v747_v1, %v411_v63  ;;  %v341_v18 = vmul.f32 %v742_v0, %v302_v3  ;;  %v451_v19 = vmul.f32 %v747_v1, %v412_v4 }
  0x35   : > { %v550_v21 = vmax.f32 %v518_v9, 0.0  ;;  %v519_v22 = vadd.f32 %v791_v25, %v480_v10  ;;  %v481_v23 = vadd.f32 %v449_v8, %v378_v11  ;;  %v379_v24 = vadd.f32 %v764_v2, %v340_v12 }
  0x36   : > { %581 = vst [vmem:[%s812_s17 + $0xa0] sm:$0xff] %v549_v16  ;;  %v380_v27 = vadd.f32 %v764_v2, %v341_v18  ;;  %v342_v28 = vmul.f32 %v742_v0, %v303_v13  ;;  %v452_v29 = vmul.f32 %v747_v1, %v413_v14  ;;  %v343_v30 = vmul.f32 %v742_v0, %v304_v15 }
  0x37   : > { %582 = vst [vmem:[%s812_s17 + $0xa8] sm:$0xff] %v550_v21  ;;  %v551_v33 = vmax.f32 %v519_v22, 0.0  ;;  %v520_v34 = vadd.f32 %v791_v25, %v481_v23  ;;  %v482_v35 = vadd.f32 %v450_v17, %v379_v24  ;;  %v453_v36 = vmul.f32 %v747_v1, %v414_v20 }
  0x38   : > { %v483_v37 = vadd.f32 %v451_v19, %v380_v27  ;;  %v381_v38 = vadd.f32 %v764_v2, %v342_v28  ;;  %v382_v39 = vadd.f32 %v764_v2, %v343_v30  ;;  %v344_v40 = vmul.f32 %v742_v0, %v305_v26 }
  0x39   : > { %583 = vst [vmem:[%s812_s17 + $0xb0] sm:$0xff] %v551_v33  ;;  %v552_v43 = vmax.f32 %v520_v34, 0.0  ;;  %v521_v44 = vadd.f32 %v791_v25, %v482_v35  ;;  %v454_v45 = vmul.f32 %v747_v1, %v415_v31  ;;  %v345_v46 = vmul.f32 %v742_v0, %v306_v32 }
  0x3a   : > { %v522_v47 = vadd.f32 %v791_v25, %v483_v37  ;;  %v484_v48 = vadd.f32 %v452_v29, %v381_v38  ;;  %v485_v49 = vadd.f32 %v453_v36, %v382_v39  ;;  %v383_v50 = vadd.f32 %v764_v2, %v344_v40 }
  0x3b   : > { %584 = vst [vmem:[%s812_s17 + $0xb8] sm:$0xff] %v552_v43  ;;  %v553_v53 = vmax.f32 %v521_v44, 0.0  ;;  %v384_v54 = vadd.f32 %v764_v2, %v345_v46  ;;  %v455_v55 = vmul.f32 %v747_v1, %v416_v41  ;;  %v346_v56 = vmul.f32 %v742_v0, %v307_v42 }
  0x3c   : > { %v554_v58 = vmax.f32 %v522_v47, 0.0  ;;  %v523_v59 = vadd.f32 %v791_v25, %v484_v48  ;;  %v524_v60 = vadd.f32 %v791_v25, %v485_v49  ;;  %v486_v61 = vadd.f32 %v454_v45, %v383_v50 }
  0x3d   : > { %585 = vst [vmem:[%s812_s17 + $0xc0] sm:$0xff] %v553_v53  ;;  %v487_v62 = vadd.f32 %v455_v55, %v384_v54  ;;  %v385_v63 = vadd.f32 %v764_v2, %v346_v56  ;;  %v456_v3 = vmul.f32 %v747_v1, %v417_v51  ;;  %v347_v4 = vmul.f32 %v742_v0, %v308_v52 }
  0x3e   : > { %586 = vst [vmem:[%s812_s17 + $0xc8] sm:$0xff] %v554_v58  ;;  %v555_v5 = vmax.f32 %v523_v59, 0.0  ;;  %v556_v6 = vmax.f32 %v524_v60, 0.0  ;;  %v525_v7 = vadd.f32 %v791_v25, %v486_v61  ;;  %v457_v8 = vmul.f32 %v747_v1, %v418_v57 }
  0x3f   : > { %v526_v9 = vadd.f32 %v791_v25, %v487_v62  ;;  %v488_v10 = vadd.f32 %v456_v3, %v385_v63  ;;  %v386_v11 = vadd.f32 %v764_v2, %v347_v4 }
  0x40   : > { %587 = vst [vmem:[%s812_s17 + $0xd0] sm:$0xff] %v555_v5  ;;  %588 = vst [vmem:[%s812_s17 + $0xd8] sm:$0xff] %v556_v6  ;;  %v557_v12 = vmax.f32 %v525_v7, 0.0 }
  0x41   : > { %v558_v13 = vmax.f32 %v526_v9, 0.0  ;;  %v527_v0 = vadd.f32 %v791_v25, %v488_v10  ;;  %v489_v14 = vadd.f32 %v457_v8, %v386_v11 }
  0x42   : > { %589 = vst [vmem:[%s812_s17 + $0xe0] sm:$0xff] %v557_v12 }
  0x43   : > { %590 = vst [vmem:[%s812_s17 + $0xe8] sm:$0xff] %v558_v13  ;;  %v559_v15 = vmax.f32 %v527_v0, 0.0  ;;  %v528_v16 = vadd.f32 %v791_v25, %v489_v14 }
  0x45   : > { %591 = vst [vmem:[%s812_s17 + $0xf0] sm:$0xff] %v559_v15  ;;  %v560_v1 = vmax.f32 %v528_v16, 0.0 }
  0x47   : > { %592 = vst [vmem:[%s812_s17 + $0xf8] sm:$0xff] %v560_v1 }
  0x48 PF: > { %s16_s21 = sadd.s32 1, %s692_s21  }
  0x49   : > { %p13_p4 = scmp.ge.s32.totalorder %s16_s21, 4  }
  0x4b   :  { %15 = sbr.rel (!%p13_p4) target bundleno = 1 (0x1), region = 77 }

// kernel: bottleneck_pallas.5
= control target key start
LH: loop header
LB: loop body
LE: loop exit
PB: predicated region body
PF: predicated region fallthrough
CT: control target
= control target key end

     0   :  { %s3545_s21 = smov 0   ;;  %s4574_s0 = inlined_call_operand.vmem [shape: f32[2,16,16,128], index: 0, kind: input, shape index: {}]   ;;  %s4575_s1 = inlined_call_operand.vmem [shape: f32[1,128], index: 1, kind: input, shape index: {}]   ;;  %s4576_s2 = inlined_call_operand.vmem [shape: f32[1,128], index: 2, kind: input, shape index: {}]   ;;  %s4577_s3 = inlined_call_operand.vmem [shape: bf16[1152,128], index: 3, kind: input, shape index: {}]   ;;  %s4578_s4 = inlined_call_operand.vmem [shape: f32[2,16,16,128], index: 4, kind: output, shape index: {0}]   ;;  %s4579_s5 = inlined_call_operand.vmem [shape: f32[1,128], index: 5, kind: output, shape index: {1}]   ;;  %s4580_s6 = inlined_call_operand.vmem [shape: f32[1,128], index: 6, kind: output, shape index: {2}]  }
   0x1 LB: > { %s2796_s22 = sadd.s32 4294967295, %s3507_s21   ;;  %p2800_p0 = scmp.ge.s32.totalorder %s3507_s21, 1  ;;  %s3507_s21 = sphi %s3545_s21, %s17_s21  }
   0x2   : > { %p207_p1 = scmp.lt.s32.totalorder %s3507_s21, 3 }
   0x4   : > { %p208_p2 = pnand %p2800_p0, %p207_p1 }
   0x5   : > { %p237_p3 = scmp.lt.s32.totalorder (!%p208_p2), %s2796_s22, 1  ;;  %p2805_p4 = scmp.ne.s32.totalorder (!%p208_p2), %s2796_s22, 0 }
   0x6   : > { %211 = sbr.rel (%p208_p2) target bundleno = 597 (0x255), region = 36 }
   0xd   : > { %s238_s23 = scalar_select %p237_p3, %s2796_s22, 1 }
   0xe   : > { %251 = sbr.rel (%p2805_p4) target bundleno = 43 (0x2b), region = 40  ;;  %v3509_v0 = vmov (!%p2805_p4), 0.0  }
   0xf   : > { %s2882_s24 = sshll.u32 %s238_s23, 8  ;;  %252 = vst [vmem:[%s4579_s5] sm:$0x1] (!%p2805_p4), %v3509_v0  ;;  %253 = vst [vmem:[%s4580_s6] sm:$0x1] (!%p2805_p4), %v3509_v0 }
  0x10   : > { %s3556_s27 = scalar_lea.vmem %s4574_s0, %s2882_s24  ;;  %s3561_s30 = scalar_lea.vmem %s4578_s4, %s2882_s24  ;;  %254 = vst [vmem:[#allocation2] sm:$0xff] (!%p2805_p4), %v3509_v0  ;;  %255 = vst [vmem:[#allocation2 + $0x8] sm:$0xff] (!%p2805_p4), %v3509_v0 }
  0x11   : > { %256 = vst [vmem:[#allocation2 + $0x10] sm:$0x3] (!%p2805_p4), %v3509_v0  ;;  %257 = vst [vmem:[#allocation2 + $0x18] sm:$0xff] (!%p2805_p4), %v3509_v0 }
  0x12   : > { %258 = vst [vmem:[#allocation2 + $0x20] sm:$0xff] (!%p2805_p4), %v3509_v0  ;;  %259 = vst [vmem:[#allocation2 + $0x28] sm:$0x3] (!%p2805_p4), %v3509_v0 }
  0x13   : > { %260 = vst [vmem:[#allocation2 + $0x30] sm:$0xff] (!%p2805_p4), %v3509_v0  ;;  %261 = vst [vmem:[#allocation2 + $0x38] sm:$0xff] (!%p2805_p4), %v3509_v0 }
  0x14   : > { %262 = vst [vmem:[#allocation2 + $0x40] sm:$0x3] (!%p2805_p4), %v3509_v0  ;;  %263 = vst [vmem:[#allocation2 + $0x48] sm:$0xff] (!%p2805_p4), %v3509_v0 }
  0x15   : > { %264 = vst [vmem:[#allocation2 + $0x50] sm:$0xff] %v3509_v0  ;;  %265 = vst [vmem:[#allocation2 + $0x58] sm:$0x3] %v3509_v0 }
  0x16   : > { %266 = vst [vmem:[#allocation2 + $0x60] sm:$0xff] %v3509_v0  ;;  %267 = vst [vmem:[#allocation2 + $0x68] sm:$0xff] %v3509_v0 }
  0x17   : > { %268 = vst [vmem:[#allocation2 + $0x70] sm:$0x3] %v3509_v0  ;;  %269 = vst [vmem:[#allocation2 + $0x78] sm:$0xff] %v3509_v0 }
  0x18   : > { %270 = vst [vmem:[#allocation2 + $0x80] sm:$0xff] %v3509_v0  ;;  %271 = vst [vmem:[#allocation2 + $0x88] sm:$0x3] %v3509_v0 }
  0x19   : > { %272 = vst [vmem:[#allocation2 + $0x90] sm:$0xff] %v3509_v0  ;;  %273 = vst [vmem:[#allocation2 + $0x98] sm:$0xff] %v3509_v0 }
  0x1a   : > { %274 = vst [vmem:[#allocation2 + $0xa0] sm:$0x3] %v3509_v0  ;;  %275 = vst [vmem:[#allocation2 + $0xa8] sm:$0xff] %v3509_v0 }
  0x1b   : > { %276 = vst [vmem:[#allocation2 + $0xb0] sm:$0xff] %v3509_v0  ;;  %277 = vst [vmem:[#allocation2 + $0xb8] sm:$0x3] %v3509_v0 }
  0x1c   : > { %278 = vst [vmem:[#allocation2 + $0xc0] sm:$0xff] %v3509_v0  ;;  %279 = vst [vmem:[#allocation2 + $0xc8] sm:$0xff] %v3509_v0 }
  0x1d   : > { %280 = vst [vmem:[#allocation2 + $0xd0] sm:$0x3] %v3509_v0  ;;  %281 = vst [vmem:[#allocation2 + $0xd8] sm:$0xff] %v3509_v0 }
  0x1e   : > { %282 = vst [vmem:[#allocation2 + $0xe0] sm:$0xff] %v3509_v0  ;;  %283 = vst [vmem:[#allocation2 + $0xe8] sm:$0x3] %v3509_v0 }
  0x1f   : > { %284 = vst [vmem:[#allocation2 + $0xf0] sm:$0xff] %v3509_v0  ;;  %285 = vst [vmem:[#allocation2 + $0xf8] sm:$0xff] %v3509_v0 }
  0x20   : > { %286 = vst [vmem:[#allocation2 + $0x100] sm:$0x3] %v3509_v0  ;;  %287 = vst [vmem:[#allocation2 + $0x108] sm:$0xff] %v3509_v0 }
  0x21   : > { %288 = vst [vmem:[#allocation2 + $0x110] sm:$0xff] %v3509_v0  ;;  %289 = vst [vmem:[#allocation2 + $0x118] sm:$0x3] %v3509_v0 }
  0x22   : > { %290 = vst [vmem:[#allocation2 + $0x120] sm:$0xff] %v3509_v0  ;;  %291 = vst [vmem:[#allocation2 + $0x128] sm:$0xff] %v3509_v0 }
  0x23   : > { %292 = vst [vmem:[#allocation2 + $0x130] sm:$0x3] %v3509_v0  ;;  %293 = vst [vmem:[#allocation2 + $0x138] sm:$0xff] %v3509_v0 }
  0x24   : > { %294 = vst [vmem:[#allocation2 + $0x140] sm:$0xff] %v3509_v0  ;;  %295 = vst [vmem:[#allocation2 + $0x148] sm:$0x3] %v3509_v0 }
  0x25   : > { %296 = vst [vmem:[#allocation2 + $0x150] sm:$0xff] %v3509_v0  ;;  %297 = vst [vmem:[#allocation2 + $0x158] sm:$0xff] %v3509_v0 }
  0x26   : > { %298 = vst [vmem:[#allocation2 + $0x160] sm:$0x3] %v3509_v0  ;;  %299 = vst [vmem:[#allocation2 + $0x168] sm:$0xff] %v3509_v0 }
  0x27   : > { %300 = vst [vmem:[#allocation2 + $0x170] sm:$0xff] %v3509_v0  ;;  %301 = vst [vmem:[#allocation2 + $0x178] sm:$0x3] %v3509_v0 }
  0x28   : > { %302 = vst [vmem:[#allocation2 + $0x180] sm:$0xff] %v3509_v0  ;;  %303 = vst [vmem:[#allocation2 + $0x188] sm:$0xff] %v3509_v0 }
  0x29   : > { %304 = vst [vmem:[#allocation2 + $0x190] sm:$0x3] %v3509_v0  ;;  %305 = vst [vmem:[#allocation2 + $0x198] sm:$0xff] %v3509_v0 }
  0x2a   : > { %306 = vst [vmem:[#allocation2 + $0x1a0] sm:$0xff] %v3509_v0  ;;  %307 = vst [vmem:[#allocation2 + $0x1a8] sm:$0x3] %v3509_v0 }
  0x2b PF: > { %v3429_v1 = vld [vmem:[%s4577_s3 + $0x40] sm:$0xff]   ;;  %v3431_v3 = vld [vmem:[%s4577_s3 + $0x48] sm:$0xff]   ;;  %v3433_v5 = vld [vmem:[%s4577_s3 + $0x50] sm:$0xff]  }
  0x2c   : > { %v3430_v2 = vld [vmem:[%s4577_s3] sm:$0xff]   ;;  %2884 = vmatprep.subr.bf16.mxu0 %v3429_v1  ;;  %3404 = vmatprep.subr.bf16.mxu1 %v3429_v1  ;;  %v3432_v4 = vld [vmem:[%s4577_s3 + $0x8] sm:$0xff]   ;;  %v3434_v6 = vld [vmem:[%s4577_s3 + $0x10] sm:$0xff]  }
  0x2d   : > { %2885 = vmatpush3.bf16.msra.mxu0 %v3430_v2  ;;  %3412 = vmatpush3.bf16.msra.mxu1 %v3430_v2  ;;  %v3435_v7 = vld [vmem:[%s4577_s3 + $0x58] sm:$0xff]   ;;  %v3437_v9 = vld [vmem:[%s4577_s3 + $0x60] sm:$0xff]   ;;  %v3439_v11 = vld [vmem:[%s4577_s3 + $0x68] sm:$0xff]  }
  0x2e   : > { %2886 = vmatprep.subr.bf16.mxu0 %v3431_v3  ;;  %3405 = vmatprep.subr.bf16.mxu1 %v3431_v3  ;;  %v3436_v8 = vld [vmem:[%s4577_s3 + $0x18] sm:$0xff]   ;;  %v3438_v10 = vld [vmem:[%s4577_s3 + $0x20] sm:$0xff]   ;;  %v548_v13 = vld [vmem:[#allocation2 + $0x9] sm:$0xff] }
  0x2f   : > { %v547_v12 = vld [vmem:[#allocation2 + $0x1] sm:$0xff]  ;;  %v3605_v14 = vld [vmem:[%s4575_s1] ss:$0 sm:$0xff]  ;;  %v332_v17 = vld [vmem:[%s3556_s27 + $0xb0] sm:$0xff] }
  0x30   : > { %v579_v15 = vpack.c.bf16 %v548_v13, %v547_v12  ;;  %v3610_v16 = vld [vmem:[%s4576_s2] ss:$0 sm:$0xff]  ;;  %v333_v18 = vld [vmem:[%s3556_s27 + $0xb8] sm:$0xff]  ;;  %v370_v19 = vmul.f32 %v3605_v14, %v332_v17  ;;  %v3440_v21 = vld [vmem:[%s4577_s3 + $0x28] sm:$0xff]  }
  0x31   : > { %2887 = vmatpush3.bf16.msra.mxu0 %v3432_v4  ;;  %3413 = vmatpush3.bf16.msra.mxu1 %v3432_v4  ;;  %v371_v20 = vmul.f32 %v3605_v14, %v333_v18  ;;  %v3441_v22 = vld [vmem:[%s4577_s3 + $0x70] sm:$0xff]   ;;  %v3443_v28 = vld [vmem:[%s4577_s3 + $0x78] sm:$0xff]   ;;  %v310_v30 = vld [vmem:[%s3556_s27] sm:$0xff] }
  0x32   : > { %2888 = vmatprep.subr.bf16.mxu0 %v3433_v5  ;;  %3406 = vmatprep.subr.bf16.mxu1 %v3433_v5  ;;  %v408_v23 = vadd.f32 %v3610_v16, %v370_v19  ;;  %v3442_v25 = vld [vmem:[%s4577_s3 + $0x30] sm:$0xff]   ;;  %v3444_v31 = vld [vmem:[%s4577_s3 + $0x38] sm:$0xff]   ;;  %v483_v32 = vld [vmem:[#allocation2] sm:$0xff]  ;;  %v348_v34 = vmul.f32 %v3605_v14, %v310_v30 }
  0x33   : > { %v409_v24 = vadd.f32 %v3610_v16, %v371_v20  ;;  %1812 = vmatprep.mubr.bf16.mxu0 %v579_v15  ;;  %v311_v33 = vld [vmem:[%s3556_s27 + $0x8] sm:$0xff]  ;;  %v334_v35 = vld [vmem:[%s3556_s27 + $0xc0] sm:$0xff]  ;;  %v312_v62 = vld [vmem:[%s3556_s27 + $0x10] sm:$0xff] }
  0x34   : > { %v440_v26 = vmax.f32 %v408_v23, 0.0  ;;  %v335_v36 = vld [vmem:[%s3556_s27 + $0xc8] sm:$0xff]  ;;  %v349_v38 = vmul.f32 %v3605_v14, %v311_v33  ;;  %v372_v39 = vmul.f32 %v3605_v14, %v334_v35  ;;  %v3445_v41 = vld [vmem:[%s4577_s3 + $0xc0] sm:$0xff]   ;;  %v386_v42 = vadd.f32 %v3610_v16, %v348_v34  ;;  %v313_v63 = vld [vmem:[%s3556_s27 + $0x18] sm:$0xff] }
  0x35   : > { %2889 = vmatpush3.bf16.msra.mxu0 %v3434_v6  ;;  %3414 = vmatpush3.bf16.msra.mxu1 %v3434_v6  ;;  %v441_v27 = vmax.f32 %v409_v24, 0.0  ;;  %v484_v37 = vld [vmem:[#allocation2 + $0x8] sm:$0xff]  ;;  %v373_v40 = vmul.f32 %v3605_v14, %v335_v36  ;;  %v3446_v43 = vld [vmem:[%s4577_s3 + $0x140] sm:$0xff]   ;;  %v336_v0 = vld [vmem:[%s3556_s27 + $0xd0] sm:$0xff]  ;;  %v350_v1 = vmul.f32 %v3605_v14, %v312_v62  ;;  %v351_v2 = vmul.f32 %v3605_v14, %v313_v63 }
  0x36   : > { %2890 = vmatprep.subr.bf16.mxu0 %v3435_v7  ;;  %3407 = vmatprep.subr.bf16.mxu1 %v3435_v7  ;;  %473 = vst [vmem:[#allocation2 + $0x121] sm:$0xff] %v440_v26  ;;  %v387_v44 = vadd.f32 %v3610_v16, %v349_v38  ;;  %v410_v45 = vadd.f32 %v3610_v16, %v372_v39  ;;  %v3447_v47 = vld [vmem:[%s4577_s3 + $0x80] sm:$0xff]   ;;  %v418_v49 = vmax.f32 %v386_v42, 0.0  ;;  %v3449_v51 = vld [vmem:[%s4577_s3 + $0xc8] sm:$0xff]   ;;  %v337_v3 = vld [vmem:[%s3556_s27 + $0xd8] sm:$0xff] }
  0x37   : > { %474 = vst [vmem:[#allocation2 + $0x129] sm:$0xff] %v441_v27  ;;  %v591_v29 = vpack.c.bf16 %v441_v27, %v440_v26  ;;  %v411_v46 = vadd.f32 %v3610_v16, %v373_v40  ;;  %v3448_v48 = vld [vmem:[%s4577_s3 + $0x100] sm:$0xff]   ;;  %v515_v50 = vpack.c.bf16 %v484_v37, %v483_v32  ;;  %v3454_v59 = vld [vmem:[%s4577_s3 + $0x148] sm:$0xff]   ;;  %v374_v4 = vmul.f32 %v3605_v14, %v336_v0  ;;  %v3451_v7 = vld [vmem:[%s4577_s3 + $0xd0] sm:$0xff]  }
  0x38   : > { %v419_v52 = vmax.f32 %v387_v44, 0.0  ;;  %v442_v53 = vmax.f32 %v410_v45, 0.0  ;;  %451 = vst [vmem:[#allocation2 + $0x19] sm:$0xff] %v418_v49  ;;  %v3450_v60 = vld [vmem:[%s4577_s3 + $0x88] sm:$0xff]   ;;  %v375_v6 = vmul.f32 %v3605_v14, %v337_v3  ;;  %v3453_v15 = vld [vmem:[%s4577_s3 + $0xd8] sm:$0xff]   ;;  %v314_v20 = vld [vmem:[%s3556_s27 + $0x20] sm:$0xff] }
  0x39   : > { %2891 = vmatpush3.bf16.msra.mxu0 %v3436_v8  ;;  %3415 = vmatpush3.bf16.msra.mxu1 %v3436_v8  ;;  %v443_v54 = vmax.f32 %v411_v46, 0.0  ;;  %v3456_v5 = vld [vmem:[%s4577_s3 + $0x108] sm:$0xff]   ;;  %v388_v8 = vadd.f32 %v3610_v16, %v350_v1  ;;  %v338_v30 = vld [vmem:[%s3556_s27 + $0xe0] sm:$0xff]  ;;  %v3455_v32 = vld [vmem:[%s4577_s3 + $0x98] sm:$0xff]  }
  0x3a   : > { %2892 = vmatprep.subr.bf16.mxu0 %v3437_v9  ;;  %3408 = vmatprep.subr.bf16.mxu1 %v3437_v9  ;;  %452 = vst [vmem:[#allocation2 + $0x21] sm:$0xff] %v419_v52  ;;  %v3660_v58 = vpack.c.bf16 %v419_v52, %v418_v49  ;;  %475 = vst [vmem:[#allocation2 + $0x139] sm:$0xff] %v442_v53  ;;  %v389_v9 = vadd.f32 %v3610_v16, %v351_v2  ;;  %v3462_v38 = vld [vmem:[%s4577_s3 + $0x150] sm:$0xff]   ;;  %v3457_v39 = vld [vmem:[%s4577_s3 + $0xe0] sm:$0xff]  }
  0x3b   : > { %1908 = vmatprep.mubr.bf16.mxu1 %v591_v29  ;;  %476 = vst [vmem:[#allocation2 + $0x141] sm:$0xff] %v443_v54  ;;  %v592_v61 = vpack.c.bf16 %v443_v54, %v442_v53  ;;  %v413_v12 = vadd.f32 %v3610_v16, %v375_v6  ;;  %v420_v17 = vmax.f32 %v388_v8, 0.0  ;;  %v315_v29 = vld [vmem:[%s3556_s27 + $0x28] sm:$0xff]  ;;  %v376_v36 = vmul.f32 %v3605_v14, %v338_v30  ;;  %v3464_v44 = vld [vmem:[%s4577_s3 + $0x110] sm:$0xff]   ;;  %v3458_v54 = vld [vmem:[%s4577_s3 + $0xa0] sm:$0xff]  }
  0x3c   : > { %v421_v18 = vmax.f32 %v389_v9, 0.0  ;;  %v353_v34 = vmul.f32 %v3605_v14, %v315_v29  ;;  %v3460_v62 = vld [vmem:[%s4577_s3 + $0xa8] sm:$0xff]   ;;  %v3461_v0 = vld [vmem:[%s4577_s3 + $0xf0] sm:$0xff]   ;;  %v3470_v9 = vld [vmem:[%s4577_s3 + $0x118] sm:$0xff]  }
  0x3d   : > { %2893 = vmatpush3.bf16.msra.mxu0 %v3438_v10  ;;  %3416 = vmatpush3.bf16.msra.mxu1 %v3438_v10  ;;  %v507_v55 = vld [vmem:[#allocation2 + $0x120] sm:$0xff]  ;;  %v412_v10 = vadd.f32 %v3610_v16, %v374_v4  ;;  %v445_v24 = vmax.f32 %v413_v12, 0.0  ;;  %453 = vst [vmem:[#allocation2 + $0x31] sm:$0xff] %v420_v17  ;;  %v414_v42 = vadd.f32 %v3610_v16, %v376_v36  ;;  %v612_v30 = vld [vmem:[#allocation2 + $0xa] sm:$0xff] }
  0x3e   : > { %2894 = vmatprep.subr.bf16.mxu0 %v3439_v11  ;;  %3409 = vmatprep.subr.bf16.mxu1 %v3439_v11  ;;  %v508_v56 = vld [vmem:[#allocation2 + $0x128] sm:$0xff]  ;;  %v3452_v11 = vld [vmem:[%s4577_s3 + $0x90] sm:$0xff]   ;;  %454 = vst [vmem:[#allocation2 + $0x39] sm:$0xff] %v421_v18  ;;  %v391_v40 = vadd.f32 %v3610_v16, %v353_v34  ;;  %v318_v12 = vld [vmem:[%s3556_s27 + $0x40] sm:$0xff] }
  0x3f   : > { %v527_v57 = vpack.c.bf16 %v508_v56, %v507_v55  ;;  %v485_v13 = vld [vmem:[#allocation2 + $0x18] sm:$0xff]  ;;  %v444_v19 = vmax.f32 %v412_v10, 0.0  ;;  %478 = vst [vmem:[#allocation2 + $0x159] sm:$0xff] %v445_v24  ;;  %v446_v46 = vmax.f32 %v414_v42, 0.0  ;;  %v316_v56 = vld [vmem:[%s3556_s27 + $0x30] sm:$0xff]  ;;  %v611_v29 = vld [vmem:[#allocation2 + $0x2] sm:$0xff] }
  0x40   : > { %v423_v45 = vmax.f32 %v391_v40, 0.0  ;;  %v3467_v34 = vld [vmem:[%s4577_s3 + $0x1c0] sm:$0xff]  }
  0x41   : > { %2895 = vmatpush3.bf16.msra.mxu0 %v3440_v21  ;;  %3417 = vmatpush3.bf16.msra.mxu1 %v3440_v21  ;;  %v486_v21 = vld [vmem:[#allocation2 + $0x20] sm:$0xff]  ;;  %477 = vst [vmem:[#allocation2 + $0x151] sm:$0xff] %v444_v19  ;;  %v593_v33 = vpack.c.bf16 %v445_v24, %v444_v19  ;;  %479 = vst [vmem:[#allocation2 + $0x169] sm:$0xff] %v446_v46  ;;  %v356_v19 = vmul.f32 %v3605_v14, %v318_v12 }
  0x42   : > { %2896 = vmatprep.subr.bf16.mxu0 %v3441_v22  ;;  %3410 = vmatprep.subr.bf16.mxu1 %v3441_v22  ;;  %v509_v22 = vld [vmem:[#allocation2 + $0x138] sm:$0xff]  ;;  %v510_v23 = vld [vmem:[#allocation2 + $0x140] sm:$0xff]  ;;  %v3695_v26 = vpack.c.bf16 %v486_v21, %v485_v13  ;;  %456 = vst [vmem:[#allocation2 + $0x51] sm:$0xff] %v423_v45  ;;  %v319_v13 = vld [vmem:[%s3556_s27 + $0x48] sm:$0xff] }
  0x43   : > { %v3697_v27 = vpack.c.bf16 %v510_v23, %v509_v22  ;;  %v3465_v21 = vld [vmem:[%s4577_s3 + $0xf8] sm:$0xff]   ;;  %v357_v22 = vmul.f32 %v3605_v14, %v319_v13  ;;  %v326_v13 = vld [vmem:[%s3556_s27 + $0x80] sm:$0xff] }
  0x44   : > { %v321_v23 = vld [vmem:[%s3556_s27 + $0x58] sm:$0xff] }
  0x45   : > { %2897 = vmatpush3.bf16.msra.mxu0 %v3442_v25  ;;  %3418 = vmatpush3.bf16.msra.mxu1 %v3442_v25  ;;  %v352_v25 = vmul.f32 %v3605_v14, %v314_v20  ;;  %v488_v49 = vld [vmem:[#allocation2 + $0x38] sm:$0xff]  ;;  %v320_v20 = vld [vmem:[%s3556_s27 + $0x50] sm:$0xff] }
  0x46   : > { %2898 = vmatprep.subr.bf16.mxu0 %v3443_v28  ;;  %3411 = vmatprep.subr.bf16.mxu1 %v3443_v28  ;;  %v3699_v28 = vpack.c.bf16 %v421_v18, %v420_v17  ;;  %v3463_v17 = vld [vmem:[%s4577_s3 + $0xb0] sm:$0xff]   ;;  %v358_v24 = vmul.f32 %v3605_v14, %v320_v20 }
  0x47   : > { %v390_v35 = vadd.f32 %v3610_v16, %v352_v25  ;;  %v3466_v25 = vld [vmem:[%s4577_s3 + $0xb8] sm:$0xff]  }
  0x48   : > { %v512_v53 = vld [vmem:[#allocation2 + $0x158] sm:$0xff]  ;;  %v396_v36 = vadd.f32 %v3610_v16, %v358_v24 }
  0x49   : > { %2899 = vmatpush3.bf16.msra.mxu0 %v3444_v31  ;;  %3419 = vmatpush3.bf16.msra.mxu1 %v3444_v31  ;;  %v339_v31 = vld [vmem:[%s3556_s27 + $0xe8] sm:$0xff] }
  0x4a   : > { %2996 = vmatprep.subr.bf16.mxu1 %v3445_v41  ;;  %3108 = vmatprep.subr.bf16.mxu0 %v3446_v43  ;;  %v377_v37 = vmul.f32 %v3605_v14, %v339_v31  ;;  %v422_v41 = vmax.f32 %v390_v35, 0.0  ;;  %v394_v31 = vadd.f32 %v3610_v16, %v356_v19  ;;  %v395_v35 = vadd.f32 %v3610_v16, %v357_v22 }
  0x4b   : > { %v364_v22 = vmul.f32 %v3605_v14, %v326_v13 }
  0x4c   : > { %1813 = vmatmul.mubr.bf16.vlgmr.msra.gmra.mrb[0].mxu0 %v515_v50  ;;  %1909 = vmatmul.mubr.bf16.vlgmr.msra.gmra.mrb[0].mxu1 %v527_v57  ;;  %v415_v43 = vadd.f32 %v3610_v16, %v377_v37  ;;  %455 = vst [vmem:[#allocation2 + $0x49] sm:$0xff] %v422_v41  ;;  %v511_v50 = vld [vmem:[#allocation2 + $0x150] sm:$0xff]  ;;  %v426_v37 = vmax.f32 %v394_v31, 0.0  ;;  %v427_v40 = vmax.f32 %v395_v35, 0.0 }
  0x4d   : > { %2997 = vmatpush3.bf16.msra.mxu1 %v3447_v47  ;;  %3109 = vmatpush3.bf16.msra.mxu0 %v3448_v48  ;;  %v487_v48 = vld [vmem:[#allocation2 + $0x30] sm:$0xff]  ;;  %v3734_v57 = vpack.c.bf16 %v512_v53, %v511_v50  ;;  %v3472_v53 = vld [vmem:[%s4577_s3 + $0x1c8] sm:$0xff]  }
  0x4e   : > { %2998 = vmatprep.subr.bf16.mxu1 %v3449_v51  ;;  %1820 = vmatprep.mubr.bf16.mxu0 %v3660_v58  ;;  %v447_v47 = vmax.f32 %v415_v43, 0.0  ;;  %v3726_v51 = vpack.c.bf16 %v423_v45, %v422_v41  ;;  %v3728_v52 = vpack.c.bf16 %v488_v49, %v487_v48  ;;  %v428_v41 = vmax.f32 %v396_v36, 0.0  ;;  %459 = vst [vmem:[#allocation2 + $0x79] sm:$0xff] %v426_v37  ;;  %v323_v48 = vld [vmem:[%s3556_s27 + $0x68] sm:$0xff] }
  0x4f   : > { %1916 = vmatprep.mubr.bf16.mxu1 %v592_v61  ;;  %3110 = vmatprep.subr.bf16.mxu0 %v3454_v59  ;;  %v3459_v59 = vld [vmem:[%s4577_s3 + $0xe8] sm:$0xff]   ;;  %v354_v61 = vmul.f32 %v3605_v14, %v316_v56  ;;  %460 = vst [vmem:[#allocation2 + $0x81] sm:$0xff] %v427_v40 }
  0x50   : > { %480 = vst [vmem:[#allocation2 + $0x171] sm:$0xff] %v447_v47  ;;  %v594_v55 = vpack.c.bf16 %v447_v47, %v446_v46  ;;  %v643_v46 = vpack.c.bf16 %v612_v30, %v611_v29  ;;  %v3803_v47 = vpack.c.bf16 %v427_v40, %v426_v37  ;;  %461 = vst [vmem:[#allocation2 + $0x91] sm:$0xff] %v428_v41  ;;  %v3475_v56 = vld [vmem:[%s4577_s3 + $0x168] sm:$0xff]   ;;  %v3479_v29 = vld [vmem:[%s4577_s3 + $0x170] sm:$0xff]  }
  0x51   : > { %2999 = vmatpush3.bf16.msra.mxu1 %v3450_v60  ;;  %3111 = vmatpush3.bf16.msra.mxu0 %v3456_v5  ;;  %v317_v60 = vld [vmem:[%s3556_s27 + $0x38] sm:$0xff]  ;;  %v392_v1 = vadd.f32 %v3610_v16, %v354_v61  ;;  %v324_v61 = vld [vmem:[%s3556_s27 + $0x70] sm:$0xff] }
  0x52   : > { %3000 = vmatprep.subr.bf16.mxu1 %v3451_v7  ;;  %3112 = vmatprep.subr.bf16.mxu0 %v3462_v38  ;;  %v355_v63 = vmul.f32 %v3605_v14, %v317_v60  ;;  %v3469_v5 = vld [vmem:[%s4577_s3 + $0x158] sm:$0xff]   ;;  %v513_v7 = vld [vmem:[#allocation2 + $0x168] sm:$0xff] }
  0x53   : > { %v489_v2 = vld [vmem:[#allocation2 + $0x48] sm:$0xff]  ;;  %v424_v4 = vmax.f32 %v392_v1, 0.0  ;;  %v490_v6 = vld [vmem:[#allocation2 + $0x50] sm:$0xff]  ;;  %v616_v40 = vld [vmem:[#allocation2 + $0x3a] sm:$0xff] }
  0x54   : > { %1821 = vmatmul.mubr.bf16.gmra.mrb[4].mxu0 %v3695_v26  ;;  %1917 = vmatmul.mubr.bf16.gmra.mrb[4].mxu1 %v3697_v27  ;;  %v393_v3 = vadd.f32 %v3610_v16, %v355_v63  ;;  %v3759_v10 = vpack.c.bf16 %v490_v6, %v489_v2  ;;  %v3476_v60 = vld [vmem:[%s4577_s3 + $0x128] sm:$0xff]   ;;  %v613_v63 = vld [vmem:[#allocation2 + $0x1a] sm:$0xff]  ;;  %v362_v2 = vmul.f32 %v3605_v14, %v324_v61  ;;  %v615_v30 = vld [vmem:[#allocation2 + $0x32] sm:$0xff] }
  0x55   : > { %3001 = vmatpush3.bf16.msra.mxu1 %v3452_v11  ;;  %1828 = vmatprep.mubr.bf16.mxu0 %v3699_v28  ;;  %457 = vst [vmem:[#allocation2 + $0x61] sm:$0xff] %v424_v4  ;;  %v493_v6 = vld [vmem:[#allocation2 + $0x78] sm:$0xff]  ;;  %v617_v61 = vld [vmem:[#allocation2 + $0x4a] sm:$0xff] }
  0x56   : > { %3002 = vmatprep.subr.bf16.mxu1 %v3453_v15  ;;  %1924 = vmatprep.mubr.bf16.mxu1 %v593_v33  ;;  %v425_v8 = vmax.f32 %v393_v3, 0.0  ;;  %v3471_v33 = vld [vmem:[%s4577_s3 + $0x160] sm:$0xff]  }
  0x57   : > { %3113 = vmatpush3.bf16.msra.mxu0 %v3464_v44  ;;  %v514_v11 = vld [vmem:[#allocation2 + $0x170] sm:$0xff]  ;;  %v322_v44 = vld [vmem:[%s3556_s27 + $0x60] sm:$0xff] }
  0x58   : > { %3114 = vmatprep.subr.bf16.mxu0 %v3469_v5  ;;  %v3763_v15 = vpack.c.bf16 %v514_v11, %v513_v7  ;;  %458 = vst [vmem:[#allocation2 + $0x69] sm:$0xff] %v425_v8  ;;  %v3768_v18 = vpack.c.bf16 %v425_v8, %v424_v4  ;;  %v360_v49 = vmul.f32 %v3605_v14, %v322_v44  ;;  %v3474_v4 = vld [vmem:[%s4577_s3 + $0x188] sm:$0xff]   ;;  %v495_v35 = vld [vmem:[#allocation2 + $0x90] sm:$0xff] }
  0x59   : > { %3003 = vmatpush3.bf16.msra.mxu1 %v3455_v32  ;;  %v359_v32 = vmul.f32 %v3605_v14, %v321_v23  ;;  %v3838_v7 = vadd.f32 %v3610_v16, %v362_v2  ;;  %v3478_v23 = vld [vmem:[%s4577_s3 + $0x190] sm:$0xff]  }
  0x5a   : > { %3004 = vmatprep.subr.bf16.mxu1 %v3457_v39  ;;  %v3473_v39 = vld [vmem:[%s4577_s3 + $0x120] sm:$0xff]  }
  0x5b   : > { %3115 = vmatpush3.bf16.msra.mxu0 %v3470_v9  ;;  %v397_v38 = vadd.f32 %v3610_v16, %v359_v32  ;;  %v494_v9 = vld [vmem:[#allocation2 + $0x80] sm:$0xff]  ;;  %v432_v19 = vmax.f32 %v3838_v7, 0.0  ;;  %v3480_v32 = vld [vmem:[%s4577_s3 + $0x130] sm:$0xff]  }
  0x5c   : > { %1829 = vmatmul.mubr.bf16.gmra.mrb[8].mxu0 %v3728_v52  ;;  %1925 = vmatmul.mubr.bf16.gmra.mrb[8].mxu1 %v3734_v57  ;;  %v491_v42 = vld [vmem:[#allocation2 + $0x60] sm:$0xff] }
  0x5d   : > { %1836 = vmatprep.mubr.bf16.mxu0 %v3726_v51  ;;  %3005 = vmatpush3.bf16.msra.mxu1 %v3458_v54  ;;  %v429_v43 = vmax.f32 %v397_v38, 0.0  ;;  %v361_v54 = vmul.f32 %v3605_v14, %v323_v48  ;;  %465 = vst [vmem:[#allocation2 + $0xc1] sm:$0xff] %v432_v19 }
  0x5e   : > { %1932 = vmatprep.mubr.bf16.mxu1 %v594_v55  ;;  %3006 = vmatprep.subr.bf16.mxu1 %v3459_v59  ;;  %v3814_v55 = vadd.f32 %v3610_v16, %v360_v49 }
  0x5f   : > { %3116 = vmatprep.subr.bf16.mxu0 %v3471_v33  ;;  %v492_v45 = vld [vmem:[#allocation2 + $0x68] sm:$0xff]  ;;  %462 = vst [vmem:[#allocation2 + $0x99] sm:$0xff] %v429_v43  ;;  %v3821_v59 = vadd.f32 %v3610_v16, %v361_v54  ;;  %v3848_v12 = vpack.c.bf16 %v429_v43, %v428_v41  ;;  %v328_v33 = vld [vmem:[%s3556_s27 + $0x90] sm:$0xff]  ;;  %v3484_v54 = vld [vmem:[%s4577_s3 + $0x138] sm:$0xff]  }
  0x60   : > { %3117 = vmatpush3.bf16.msra.mxu0 %v3473_v39  ;;  %v3807_v50 = vpack.c.bf16 %v492_v45, %v491_v42  ;;  %v430_v1 = vmax.f32 %v3814_v55, 0.0  ;;  %v366_v38 = vmul.f32 %v3605_v14, %v328_v33  ;;  %v3481_v42 = vld [vmem:[%s4577_s3 + $0x1d8] sm:$0xff]   ;;  %v330_v55 = vld [vmem:[%s3556_s27 + $0xa0] sm:$0xff]  ;;  %v3493_v33 = vld [vmem:[%s4577_s3 + $0x1b0] sm:$0xff]  }
  0x61   : > { %3007 = vmatpush3.bf16.msra.mxu1 %v3460_v62  ;;  %v325_v62 = vld [vmem:[%s3556_s27 + $0x78] sm:$0xff]  ;;  %v431_v5 = vmax.f32 %v3821_v59, 0.0  ;;  %3118 = vmatprep.subr.bf16.mxu0 %v3475_v56  ;;  %v331_v56 = vld [vmem:[%s3556_s27 + $0xa8] sm:$0xff] }
  0x62   : > { %3008 = vmatprep.subr.bf16.mxu1 %v3461_v0  ;;  %v614_v0 = vld [vmem:[#allocation2 + $0x22] sm:$0xff]  ;;  %v363_v3 = vmul.f32 %v3605_v14, %v325_v62  ;;  %463 = vst [vmem:[#allocation2 + $0xa9] sm:$0xff] %v430_v1  ;;  %v3893_v43 = vadd.f32 %v3610_v16, %v366_v38  ;;  %v3482_v45 = vld [vmem:[%s4577_s3 + $0x198] sm:$0xff]   ;;  %v368_v62 = vmul.f32 %v3605_v14, %v330_v55  ;;  %v340_v38 = vld [vmem:[%s3556_s27 + $0xf0] sm:$0xff] }
  0x63   : > { %v3846_v11 = vpack.c.bf16 %v614_v0, %v613_v63  ;;  %464 = vst [vmem:[#allocation2 + $0xb1] sm:$0xff] %v431_v5  ;;  %v369_v63 = vmul.f32 %v3605_v14, %v331_v56  ;;  %v3485_v0 = vld [vmem:[%s4577_s3 + $0x1e0] sm:$0xff]  }
  0x64   : > { %1837 = vmatmul.mubr.bf16.gmra.mrb[12].mxu0 %v3759_v10  ;;  %1933 = vmatmul.mubr.bf16.gmra.mrb[12].mxu1 %v3763_v15  ;;  %v3841_v8 = vadd.f32 %v3610_v16, %v363_v3  ;;  %v436_v48 = vmax.f32 %v3893_v43, 0.0  ;;  %v3933_v2 = vadd.f32 %v3610_v16, %v368_v62 }
  0x65   : > { %1844 = vmatprep.mubr.bf16.mxu0 %v3768_v18  ;;  %3009 = vmatpush3.bf16.msra.mxu1 %v3463_v17  ;;  %v3851_v17 = vpack.c.bf16 %v494_v9, %v493_v6  ;;  %v3936_v3 = vadd.f32 %v3610_v16, %v369_v63  ;;  %v3487_v9 = vld [vmem:[%s4577_s3 + $0x1a0] sm:$0xff]  }
  0x66   : > { %1973 = vmatprep.mubr.bf16.mxu1 %v3695_v26  ;;  %3010 = vmatprep.subr.bf16.mxu1 %v3465_v21  ;;  %v3468_v26 = vld [vmem:[%s4577_s3 + $0x180] sm:$0xff]   ;;  %v433_v20 = vmax.f32 %v3841_v8, 0.0  ;;  %v327_v21 = vld [vmem:[%s3556_s27 + $0x88] sm:$0xff]  ;;  %v496_v36 = vld [vmem:[#allocation2 + $0x98] sm:$0xff]  ;;  %469 = vst [vmem:[#allocation2 + $0xf1] sm:$0xff] %v436_v48  ;;  %v438_v6 = vmax.f32 %v3933_v2, 0.0 }
  0x67   : > { %3119 = vmatpush3.bf16.msra.mxu0 %v3476_v60  ;;  %v365_v24 = vmul.f32 %v3605_v14, %v327_v21  ;;  %v3490_v8 = vld [vmem:[%s4577_s3 + $0x1a8] sm:$0xff]  }
  0x68   : > { %466 = vst [vmem:[#allocation2 + $0xc9] sm:$0xff] %v433_v20  ;;  %3120 = vmatprep.subr.bf16.mxu0 %v3479_v29  ;;  %v3956_v21 = vpack.c.bf16 %v433_v20, %v432_v19  ;;  %471 = vst [vmem:[#allocation2 + $0x109] sm:$0xff] %v438_v6  ;;  %v619_v19 = vld [vmem:[#allocation2 + $0x62] sm:$0xff]  ;;  %v620_v20 = vld [vmem:[#allocation2 + $0x6a] sm:$0xff] }
  0x69   : > { %3011 = vmatpush3.bf16.msra.mxu1 %v3466_v25  ;;  %v3866_v25 = vadd.f32 %v3610_v16, %v364_v22  ;;  %v3873_v31 = vadd.f32 %v3610_v16, %v365_v24  ;;  %v497_v59 = vld [vmem:[#allocation2 + $0xa8] sm:$0xff]  ;;  %v3491_v24 = vld [vmem:[%s4577_s3 + $0x1f0] sm:$0xff]  }
  0x6a   : > { %3220 = vmatprep.subr.bf16.mxu1 %v3467_v34  ;;  %v329_v34 = vld [vmem:[%s3556_s27 + $0x98] sm:$0xff]  ;;  %v498_v60 = vld [vmem:[#allocation2 + $0xb0] sm:$0xff]  ;;  %v3488_v22 = vld [vmem:[%s4577_s3 + $0x1e8] sm:$0xff]  }
  0x6b   : > { %v434_v37 = vmax.f32 %v3866_v25, 0.0  ;;  %v367_v39 = vmul.f32 %v3605_v14, %v329_v34  ;;  %v435_v41 = vmax.f32 %v3873_v31, 0.0  ;;  %3121 = vmatpush3.bf16.msra.mxu0 %v3480_v32  ;;  %v3494_v25 = vld [vmem:[%s4577_s3 + $0x1f8] sm:$0xff]   ;;  %v622_v31 = vld [vmem:[#allocation2 + $0x82] sm:$0xff]  ;;  %v625_v63 = vld [vmem:[#allocation2 + $0xaa] sm:$0xff] }
  0x6c   : > { %1845 = vmatmul.mubr.bf16.gmra.mrb[16].mxu0 %v3807_v50  ;;  %1974 = vmatmul.mubr.bf16.vlgmr.msra.gmra.mrb[16].mxu1 %v643_v46  ;;  %v3905_v46 = vpack.c.bf16 %v616_v40, %v615_v30  ;;  %v3976_v30 = vpack.c.bf16 %v620_v20, %v619_v19  ;;  %v341_v40 = vld [vmem:[%s3556_s27 + $0xf8] sm:$0xff]  ;;  %v697_v19 = vld [vmem:[#allocation2 + $0x120] sm:$0xff]  ;;  %v698_v20 = vld [vmem:[#allocation2 + $0x128] sm:$0xff] }
  0x6d   : > { %1852 = vmatprep.mubr.bf16.mxu0 %v3803_v47  ;;  %3221 = vmatpush3.bf16.msra.mxu1 %v3468_v26  ;;  %467 = vst [vmem:[#allocation2 + $0xd9] sm:$0xff] %v434_v37  ;;  %v3896_v44 = vadd.f32 %v3610_v16, %v367_v39  ;;  %468 = vst [vmem:[#allocation2 + $0xe1] sm:$0xff] %v435_v41  ;;  %v3907_v26 = vpack.c.bf16 %v431_v5, %v430_v1  ;;  %v618_v1 = vld [vmem:[#allocation2 + $0x52] sm:$0xff] }
  0x6e   : > { %1981 = vmatprep.mubr.bf16.mxu1 %v3728_v52  ;;  %3222 = vmatprep.subr.bf16.mxu1 %v3472_v53  ;;  %v3477_v52 = vld [vmem:[%s4577_s3 + $0x1d0] sm:$0xff]   ;;  %v3483_v53 = vld [vmem:[%s4577_s3 + $0x178] sm:$0xff]   ;;  %v3943_v5 = vpack.c.bf16 %v498_v60, %v497_v59  ;;  %v3950_v13 = vpack.c.bf16 %v618_v1, %v617_v61  ;;  %v3982_v32 = vpack.c.bf16 %v435_v41, %v434_v37 }
  0x6f   : > { %v437_v49 = vmax.f32 %v3896_v44, 0.0  ;;  %3122 = vmatprep.subr.bf16.mxu0 %v3483_v53  ;;  %v500_v7 = vld [vmem:[#allocation2 + $0xc8] sm:$0xff]  ;;  %v3496_v37 = vld [vmem:[%s4577_s3 + $0x1b8] sm:$0xff]   ;;  %v378_v41 = vmul.f32 %v3605_v14, %v340_v38  ;;  %v379_v53 = vmul.f32 %v3605_v14, %v341_v40  ;;  %v503_v59 = vld [vmem:[#allocation2 + $0xf0] sm:$0xff] }
  0x70   : > { %3123 = vmatpush3.bf16.msra.mxu0 %v3484_v54  ;;  %v623_v44 = vld [vmem:[#allocation2 + $0x92] sm:$0xff]  ;;  %v505_v61 = vld [vmem:[#allocation2 + $0x108] sm:$0xff]  ;;  %v637_v40 = vld [vmem:[#allocation2 + $0x13a] sm:$0xff] }
  0x71   : > { %3223 = vmatpush3.bf16.msra.mxu1 %v3474_v4  ;;  %470 = vst [vmem:[#allocation2 + $0xf9] sm:$0xff] %v437_v49  ;;  %v3941_v4 = vld [vmem:[%s4577_s3 + $0x200] sm:$0xff]   ;;  %v416_v54 = vadd.f32 %v3610_v16, %v378_v41  ;;  %v417_v55 = vadd.f32 %v3610_v16, %v379_v53 }
  0x72   : > { %3224 = vmatprep.subr.bf16.mxu1 %v3477_v52  ;;  %v439_v52 = vmax.f32 %v3936_v3, 0.0  ;;  %3356 = vmatprep.subr.bf16.mxu0 %v3941_v4  ;;  %v627_v2 = vld [vmem:[#allocation2 + $0xc2] sm:$0xff] }
  0x73   : > { %v448_v56 = vmax.f32 %v416_v54, 0.0  ;;  %v449_v60 = vmax.f32 %v417_v55, 0.0  ;;  %v638_v41 = vld [vmem:[#allocation2 + $0x142] sm:$0xff]  ;;  %v640_v54 = vld [vmem:[#allocation2 + $0x15a] sm:$0xff] }
  0x74   : > { %1853 = vmatmul.mubr.bf16.gmra.mrb[20].mxu0 %v3851_v17  ;;  %1982 = vmatmul.mubr.bf16.gmra.mrb[20].mxu1 %v3846_v11  ;;  %472 = vst [vmem:[#allocation2 + $0x111] sm:$0xff] %v439_v52  ;;  %v501_v34 = vld [vmem:[#allocation2 + $0xd8] sm:$0xff]  ;;  %v4023_v16 = vpack.c.bf16 %v439_v52, %v438_v6  ;;  %v628_v6 = vld [vmem:[#allocation2 + $0xca] sm:$0xff]  ;;  %v4093_v53 = vpack.c.bf16 %v638_v41, %v637_v40 }
  0x75   : > { %1860 = vmatprep.mubr.bf16.mxu0 %v3848_v12  ;;  %1989 = vmatprep.mubr.bf16.mxu1 %v3759_v10  ;;  %v3898_v10 = vpack.c.bf16 %v496_v36, %v495_v35  ;;  %v502_v35 = vld [vmem:[#allocation2 + $0xe0] sm:$0xff]  ;;  %481 = vst [vmem:[#allocation2 + $0x181] sm:$0xff] %v448_v56  ;;  %482 = vst [vmem:[#allocation2 + $0x189] sm:$0xff] %v449_v60  ;;  %v4039_v52 = vpack.c.bf16 %v628_v6, %v627_v2  ;;  %v935_v2 = vld [vmem:[#allocation2 + $0x51] sm:$0xff] }
  0x76   : > { %3225 = vmatpush3.bf16.msra.mxu1 %v3478_v23  ;;  %v499_v23 = vld [vmem:[#allocation2 + $0xc0] sm:$0xff]  ;;  %v3998_v39 = vpack.c.bf16 %v502_v35, %v501_v34  ;;  %v4066_v34 = vpack.c.bf16 %v698_v20, %v697_v19 }
  0x77   : > { %3226 = vmatprep.subr.bf16.mxu1 %v3481_v42  ;;  %v3974_v29 = vpack.c.bf16 %v500_v7, %v499_v23  ;;  %v621_v36 = vld [vmem:[#allocation2 + $0x7a] sm:$0xff]  ;;  %v630_v23 = vld [vmem:[#allocation2 + $0xe2] sm:$0xff]  ;;  %v3492_v7 = vld [vmem:[%s4577_s3 + $0x210] sm:$0xff]  }
  0x78   : > { %v4002_v42 = vpack.c.bf16 %v622_v31, %v621_v36  ;;  %v504_v43 = vld [vmem:[#allocation2 + $0xf8] sm:$0xff]  ;;  %v3499_v36 = vld [vmem:[%s4577_s3 + $0x230] sm:$0xff]   ;;  %v635_v31 = vld [vmem:[#allocation2 + $0x122] sm:$0xff] }
  0x79   : > { %v4017_v14 = vpack.c.bf16 %v504_v43, %v503_v59  ;;  %v763_v19 = vld [vmem:[#allocation2 + $0x139] sm:$0xff] }
  0x7a   : > { %3227 = vmatpush3.bf16.msra.mxu1 %v3482_v45  ;;  %v4008_v45 = vpack.c.bf16 %v437_v49, %v436_v48  ;;  %v624_v48 = vld [vmem:[#allocation2 + $0x9a] sm:$0xff] }
  0x7b   : > { %3228 = vmatprep.subr.bf16.mxu1 %v3485_v0  ;;  %v4019_v49 = vpack.c.bf16 %v624_v48, %v623_v44  ;;  %v506_v62 = vld [vmem:[#allocation2 + $0x110] sm:$0xff] }
  0x7c   : > { %1861 = vmatmul.mubr.bf16.gmra.mrb[24].mxu0 %v3898_v10  ;;  %1990 = vmatmul.mubr.bf16.gmra.mrb[24].mxu1 %v3905_v46  ;;  %v626_v0 = vld [vmem:[#allocation2 + $0xb2] sm:$0xff]  ;;  %v4029_v1 = vpack.c.bf16 %v506_v62, %v505_v61  ;;  %v705_v55 = vld [vmem:[#allocation2 + $0x180] sm:$0xff] }
  0x7d   : > { %1868 = vmatprep.mubr.bf16.mxu0 %v3907_v26  ;;  %1997 = vmatprep.mubr.bf16.mxu1 %v3807_v50  ;;  %v4031_v3 = vpack.c.bf16 %v626_v0, %v625_v63  ;;  %v634_v35 = vld [vmem:[#allocation2 + $0x112] sm:$0xff]  ;;  %v934_v0 = vld [vmem:[#allocation2 + $0x49] sm:$0xff] }
  0x7e   : > { %3229 = vmatpush3.bf16.msra.mxu1 %v3487_v9  ;;  %v4033_v9 = vpack.c.bf16 %v449_v60, %v448_v56  ;;  %v706_v56 = vld [vmem:[#allocation2 + $0x188] sm:$0xff]  ;;  %v642_v60 = vld [vmem:[#allocation2 + $0x172] sm:$0xff] }
  0x7f   : > { %3230 = vmatprep.subr.bf16.mxu1 %v3488_v22  ;;  %v3489_v22 = vld [vmem:[%s4577_s3 + $0x208] sm:$0xff]   ;;  %v4101_v43 = vpack.c.bf16 %v706_v56, %v705_v55  ;;  %v932_v44 = vld [vmem:[#allocation2 + $0x31] sm:$0xff] }
  0x80   : > { %v868_v62 = vld [vmem:[#allocation2 + $0x30] sm:$0xff]  ;;  %v869_v63 = vld [vmem:[#allocation2 + $0x38] sm:$0xff] }
  0x81   : > { %v900_v6 = vpack.c.bf16 %v869_v63, %v868_v62 }
  0x82   : > { %3231 = vmatpush3.bf16.msra.mxu1 %v3490_v8 }
  0x83   : > { %3232 = vmatprep.subr.bf16.mxu1 %v3491_v24  ;;  %v3497_v24 = vld [vmem:[%s4577_s3 + $0x220] sm:$0xff]  }
  0x84   : > { %1869 = vmatmul.mubr.bf16.gmra.mrb[28].mxu0 %v3943_v5  ;;  %1998 = vmatmul.mubr.bf16.gmra.mrb[28].mxu1 %v3950_v13 }
  0x85   : > { %1876 = vmatprep.mubr.bf16.mxu0 %v3956_v21  ;;  %2005 = vmatprep.mubr.bf16.mxu1 %v3851_v17 }
  0x86   : > { %3233 = vmatpush3.bf16.msra.mxu1 %v3493_v33 }
  0x87   : > { %3234 = vmatprep.subr.bf16.mxu1 %v3494_v25 }
  0x8a   : > { %3235 = vmatpush3.bf16.msra.mxu1 %v3496_v37  ;;  %v636_v37 = vld [vmem:[#allocation2 + $0x12a] sm:$0xff] }
  0x8b   : > { %v4087_v38 = vpack.c.bf16 %v636_v37, %v635_v31 }
  0x8c   : > { %1877 = vmatmul.mubr.bf16.gmra.mrb[32].mxu0 %v3974_v29  ;;  %2006 = vmatmul.mubr.bf16.gmra.mrb[32].mxu1 %v3976_v30 }
  0x8d   : > { %1884 = vmatprep.mubr.bf16.mxu0 %v3982_v32  ;;  %2013 = vmatprep.mubr.bf16.mxu1 %v3898_v10 }
  0x94   : > { %1885 = vmatmul.mubr.bf16.gmra.mrb[36].mxu0 %v3998_v39  ;;  %2014 = vmatmul.mubr.bf16.gmra.mrb[36].mxu1 %v4002_v42 }
  0x95   : > { %1892 = vmatprep.mubr.bf16.mxu0 %v4008_v45  ;;  %2021 = vmatprep.mubr.bf16.mxu1 %v3943_v5 }
  0x9c   : > { %1893 = vmatmul.mubr.bf16.gmra.mrb[40].mxu0 %v4017_v14  ;;  %2022 = vmatmul.mubr.bf16.gmra.mrb[40].mxu1 %v4019_v49 }
  0x9d   : > { %1900 = vmatprep.mubr.bf16.mxu0 %v4023_v16  ;;  %2029 = vmatprep.mubr.bf16.mxu1 %v3974_v29 }
  0xa4   : > { %1901 = vmatmul.mubr.bf16.gmra.mrb[44].mxu0 %v4029_v1  ;;  %2030 = vmatmul.mubr.bf16.gmra.mrb[44].mxu1 %v4031_v3 }
  0xa5   : > { %2134 = vmatprep.mubr.bf16.mxu0 %v3846_v11  ;;  %2037 = vmatprep.mubr.bf16.mxu1 %v3998_v39  ;;  %v629_v11 = vld [vmem:[#allocation2 + $0xda] sm:$0xff] }
  0xa6   : > { %v4052_v8 = vpack.c.bf16 %v630_v23, %v629_v11  ;;  %v870_v11 = vld [vmem:[#allocation2 + $0x48] sm:$0xff]  ;;  %v871_v23 = vld [vmem:[#allocation2 + $0x50] sm:$0xff] }
  0xac   : > { %2135 = vmatmul.mubr.bf16.vlgmr.msra.gmra.mrb[48].mxu0 %v3660_v58  ;;  %2038 = vmatmul.mubr.bf16.gmra.mrb[48].mxu1 %v4039_v52  ;;  %v3495_v58 = vld [vmem:[%s4577_s3 + $0x218] sm:$0xff]  }
  0xad   : > { %3357 = vmatpush3.bf16.msra.mxu0 %v3941_v4  ;;  %2045 = vmatprep.mubr.bf16.mxu1 %v4017_v14  ;;  %v632_v4 = vld [vmem:[#allocation2 + $0xfa] sm:$0xff] }
  0xae   : > { %2142 = vmatprep.mubr.bf16.mxu0 %v3905_v46  ;;  %3358 = vmatprep.subr.bf16.mxu0 %v3489_v22  ;;  %v631_v46 = vld [vmem:[#allocation2 + $0xf2] sm:$0xff] }
  0xaf   : > { %v4064_v33 = vpack.c.bf16 %v632_v4, %v631_v46  ;;  %v762_v46 = vld [vmem:[#allocation2 + $0x129] sm:$0xff] }
  0xb1   : > { %3359 = vmatpush3.bf16.msra.mxu0 %v3489_v22  ;;  %v965_v22 = vpack.c.bf16 %v935_v2, %v934_v0 }
  0xb2   : > { %3360 = vmatprep.subr.bf16.mxu0 %v3492_v7 }
  0xb4   : > { %2143 = vmatmul.mubr.bf16.gmra.mrb[52].mxu0 %v3699_v28  ;;  %2046 = vmatmul.mubr.bf16.gmra.mrb[52].mxu1 %v4052_v8  ;;  %v3498_v28 = vld [vmem:[%s4577_s3 + $0x228] sm:$0xff]  }
  0xb5   : > { %2150 = vmatprep.mubr.bf16.mxu0 %v3950_v13  ;;  %2053 = vmatprep.mubr.bf16.mxu1 %v4029_v1  ;;  %v633_v13 = vld [vmem:[#allocation2 + $0x10a] sm:$0xff] }
  0xb6   : > { %3361 = vmatpush3.bf16.msra.mxu0 %v3492_v7  ;;  %v4078_v25 = vpack.c.bf16 %v634_v35, %v633_v13  ;;  %v901_v7 = vpack.c.bf16 %v871_v23, %v870_v11 }
  0xb7   : > { %3362 = vmatprep.subr.bf16.mxu0 %v3495_v58 }
  0xba   : > { %3363 = vmatpush3.bf16.msra.mxu0 %v3495_v58  ;;  %v761_v58 = vld [vmem:[#allocation2 + $0x121] sm:$0xff] }
  0xbb   : > { %3364 = vmatprep.subr.bf16.mxu0 %v3497_v24  ;;  %v4121_v4 = vpack.c.bf16 %v762_v46, %v761_v58 }
  0xbc   : > { %2151 = vmatmul.mubr.bf16.gmra.mrb[56].mxu0 %v3726_v51  ;;  %2054 = vmatmul.mubr.bf16.gmra.mrb[56].mxu1 %v4064_v33  ;;  %v3500_v51 = vld [vmem:[%s4577_s3 + $0x238] sm:$0xff]  }
  0xbd   : > { %2158 = vmatprep.mubr.bf16.mxu0 %v3976_v30  ;;  %2061 = vmatprep.mubr.bf16.mxu1 %v4066_v34 }
  0xbe   : > { %3365 = vmatpush3.bf16.msra.mxu0 %v3497_v24 }
  0xbf   : > { %3366 = vmatprep.subr.bf16.mxu0 %v3498_v28 }
  0xc2   : > { %3367 = vmatpush3.bf16.msra.mxu0 %v3498_v28  ;;  %v833_v28 = vld [vmem:[#allocation2 + $0x182] sm:$0xff] }
  0xc3   : > { %3368 = vmatprep.subr.bf16.mxu0 %v3499_v36 }
  0xc4   : > { %2159 = vmatmul.mubr.bf16.gmra.mrb[60].mxu0 %v3768_v18  ;;  %2062 = vmatmul.mubr.bf16.gmra.mrb[60].mxu1 %v4078_v25 }
  0xc5   : > { %2166 = vmatprep.mubr.bf16.mxu0 %v4002_v42  ;;  %2069 = vmatprep.mubr.bf16.mxu1 %v3697_v27  ;;  %v639_v27 = vld [vmem:[#allocation2 + $0x152] sm:$0xff] }
  0xc6   : > { %3369 = vmatpush3.bf16.msra.mxu0 %v3499_v36  ;;  %v4099_v59 = vpack.c.bf16 %v640_v54, %v639_v27 }
  0xc7   : > { %3370 = vmatprep.subr.bf16.mxu0 %v3500_v51 }
  0xca   : > { %3371 = vmatpush3.bf16.msra.mxu0 %v3500_v51 }
  0xcc   : > { %2167 = vmatmul.mubr.bf16.gmra.mrb[64].mxu0 %v3803_v47  ;;  %2070 = vmatmul.mubr.bf16.gmra.mrb[64].mxu1 %v4087_v38 }
  0xcd   : > { %2174 = vmatprep.mubr.bf16.mxu0 %v4019_v49  ;;  %2077 = vmatprep.mubr.bf16.mxu1 %v3734_v57  ;;  %v641_v57 = vld [vmem:[#allocation2 + $0x16a] sm:$0xff] }
  0xce   : > { %v4107_v48 = vpack.c.bf16 %v642_v60, %v641_v57  ;;  %v999_v60 = vld [vmem:[#allocation2 + $0x52] sm:$0xff] }
  0xd4   : > { %2175 = vmatmul.mubr.bf16.gmra.mrb[68].mxu0 %v3848_v12  ;;  %2078 = vmatmul.mubr.bf16.gmra.mrb[68].mxu1 %v4093_v53 }
  0xd5   : > { %2182 = vmatprep.mubr.bf16.mxu0 %v4031_v3  ;;  %2085 = vmatprep.mubr.bf16.mxu1 %v3763_v15  ;;  %v933_v15 = vld [vmem:[#allocation2 + $0x39] sm:$0xff] }
  0xd6   : > { %v964_v61 = vpack.c.bf16 %v933_v15, %v932_v44 }
  0xdc   : > { %2183 = vmatmul.mubr.bf16.gmra.mrb[72].mxu0 %v3907_v26  ;;  %2086 = vmatmul.mubr.bf16.gmra.mrb[72].mxu1 %v4099_v59 }
  0xdd   : > { %2190 = vmatprep.mubr.bf16.mxu0 %v4039_v52  ;;  %2093 = vmatprep.mubr.bf16.mxu1 %v4101_v43 }
  0xe4   : > { %2191 = vmatmul.mubr.bf16.gmra.mrb[76].mxu0 %v3956_v21  ;;  %2094 = vmatmul.mubr.bf16.gmra.mrb[76].mxu1 %v4107_v48 }
  0xe5   : > { %2198 = vmatprep.mubr.bf16.mxu0 %v4052_v8  ;;  %2295 = vmatprep.mubr.bf16.mxu1 %v964_v61 }
  0xec   : > { %2199 = vmatmul.mubr.bf16.gmra.mrb[80].mxu0 %v3982_v32  ;;  %2296 = vmatmul.mubr.bf16.vlgmr.msra.gmra.mrb[80].mxu1 %v900_v6 }
  0xed   : > { %2206 = vmatprep.mubr.bf16.mxu0 %v4064_v33  ;;  %2303 = vmatprep.mubr.bf16.mxu1 %v965_v22 }
  0xf4   : > { %2207 = vmatmul.mubr.bf16.gmra.mrb[84].mxu0 %v4008_v45  ;;  %2304 = vmatmul.mubr.bf16.gmra.mrb[84].mxu1 %v901_v7 }
  0xf5   : > { %2214 = vmatprep.mubr.bf16.mxu0 %v4078_v25  ;;  %2311 = vmatprep.mubr.bf16.mxu1 %v3768_v18  ;;  %v764_v18 = vld [vmem:[#allocation2 + $0x141] sm:$0xff] }
  0xf6   : > { %v4127_v20 = vpack.c.bf16 %v764_v18, %v763_v19 }
  0xfc   : > { %2215 = vmatmul.mubr.bf16.gmra.mrb[88].mxu0 %v4023_v16  ;;  %2312 = vmatmul.mubr.bf16.gmra.mrb[88].mxu1 %v3807_v50  ;;  %v766_v50 = vld [vmem:[#allocation2 + $0x159] sm:$0xff] }
  0xfd   : > { %2222 = vmatprep.mubr.bf16.mxu0 %v4087_v38  ;;  %2319 = vmatprep.mubr.bf16.mxu1 %v3803_v47  ;;  %v765_v47 = vld [vmem:[#allocation2 + $0x151] sm:$0xff] }
  0xfe   : > { %v4133_v24 = vpack.c.bf16 %v766_v50, %v765_v47 }
 0x104   : > { %2223 = vmatmul.mubr.bf16.gmra.mrb[92].mxu0 %v4121_v4  ;;  %2320 = vmatmul.mubr.bf16.gmra.mrb[92].mxu1 %v3851_v17  ;;  %v768_v17 = vld [vmem:[#allocation2 + $0x171] sm:$0xff] }
 0x105   : > { %2230 = vmatprep.mubr.bf16.mxu0 %v4093_v53  ;;  %2327 = vmatprep.mubr.bf16.mxu1 %v3848_v12  ;;  %v767_v12 = vld [vmem:[#allocation2 + $0x169] sm:$0xff] }
 0x106   : > { %v4139_v13 = vpack.c.bf16 %v768_v17, %v767_v12 }
 0x10c   : > { %2231 = vmatmul.mubr.bf16.gmra.mrb[96].mxu0 %v4127_v20  ;;  %2328 = vmatmul.mubr.bf16.gmra.mrb[96].mxu1 %v3898_v10  ;;  %v834_v10 = vld [vmem:[#allocation2 + $0x18a] sm:$0xff] }
 0x10d   : > { %2238 = vmatprep.mubr.bf16.mxu0 %v4099_v59  ;;  %2335 = vmatprep.mubr.bf16.mxu1 %v3907_v26  ;;  %v4141_v35 = vpack.c.bf16 %v834_v10, %v833_v28  ;;  %v996_v26 = vld [vmem:[#allocation2 + $0x32] sm:$0xff] }
 0x114   : > { %2239 = vmatmul.mubr.bf16.gmra.mrb[100].mxu0 %v4133_v24  ;;  %2336 = vmatmul.mubr.bf16.gmra.mrb[100].mxu1 %v3943_v5  ;;  %v997_v5 = vld [vmem:[#allocation2 + $0x3a] sm:$0xff] }
 0x115   : > { %2246 = vmatprep.mubr.bf16.mxu0 %v4107_v48  ;;  %2343 = vmatprep.mubr.bf16.mxu1 %v3956_v21  ;;  %v1028_v54 = vpack.c.bf16 %v997_v5, %v996_v26 }
 0x11c   : > { %2247 = vmatmul.mubr.bf16.gmra.mrb[104].mxu0 %v4139_v13  ;;  %2344 = vmatmul.mubr.bf16.gmra.mrb[104].mxu1 %v3974_v29 }
 0x11d   : > { %2254 = vmatprep.mubr.bf16.mxu0 %v4141_v35  ;;  %2351 = vmatprep.mubr.bf16.mxu1 %v3982_v32  ;;  %v998_v32 = vld [vmem:[#allocation2 + $0x4a] sm:$0xff] }
 0x11e   : > { %v1029_v63 = vpack.c.bf16 %v999_v60, %v998_v32 }
 0x11f   : > { %v2900_v36 = vpop.f32.mrb[0].mxu0  ;;  %v2972_v51 = vpop.f32.mrb[0].mxu1 }
 0x120   : > { %v2901_v31 = vpop.f32.mrb[1].mxu0  ;;  %v2973_v21 = vpop.f32.mrb[1].mxu1 }
 0x121   : > { %v4147_v37 = vadd.f32 %v2901_v31, %v2900_v36  ;;  %v4149_v40 = vadd.f32 %v2973_v21, %v2972_v51  ;;  %v2903_v41 = vpop.f32.mrb[2].mxu0  ;;  %v2975_v27 = vpop.f32.mrb[2].mxu1 }
 0x122   : > { %v2904_v55 = vpop.f32.mrb[3].mxu0  ;;  %v2976_v56 = vpop.f32.mrb[3].mxu1 }
 0x123   : > { %v4151_v29 = vadd.f32 %v2904_v55, %v2903_v41  ;;  %v4153_v57 = vadd.f32 %v2976_v56, %v2975_v27 }
 0x124   : > { %2255 = vmatmul.mubr.bf16.gmra.mrb[108].mxu0 %v4033_v9  ;;  %2352 = vmatmul.mubr.bf16.gmra.mrb[108].mxu1 %v3998_v39 }
 0x125   : > { %3372 = vmatprep.mubr.bf16.mxu0 %v1028_v54  ;;  %2359 = vmatprep.mubr.bf16.mxu1 %v4008_v45 }
 0x127   : > { %v2906_v44 = vpop.f32.mrb[4].mxu0  ;;  %v2978_v15 = vpop.f32.mrb[4].mxu1 }
 0x128   : > { %v2907_v61 = vpop.f32.mrb[5].mxu0  ;;  %v2979_v62 = vpop.f32.mrb[5].mxu1 }
 0x129   : > { %v4158_v0 = vadd.f32 %v2907_v61, %v2906_v44  ;;  %v4160_v2 = vadd.f32 %v2979_v62, %v2978_v15  ;;  %v2909_v6 = vpop.f32.mrb[6].mxu0  ;;  %v2981_v22 = vpop.f32.mrb[6].mxu1 }
 0x12a   : > { %v2910_v11 = vpop.f32.mrb[7].mxu0  ;;  %v2982_v23 = vpop.f32.mrb[7].mxu1 }
 0x12b   : > { %v4162_v7 = vadd.f32 %v2910_v11, %v2909_v6  ;;  %v4164_v39 = vadd.f32 %v2982_v23, %v2981_v22  ;;  %v892_v22 = vld [vmem:[#allocation2 + $0x150] sm:$0xff]  ;;  %v893_v11 = vld [vmem:[#allocation2 + $0x158] sm:$0xff] }
 0x12c   : > { %3373 = vmatmul.mubr.bf16.vlgmr.msra.gmra.mrb[112].mxu0 %v1029_v63  ;;  %2360 = vmatmul.mubr.bf16.gmra.mrb[112].mxu1 %v4017_v14 }
 0x12d   : > { %3376 = vmatprep.mubr.bf16.mxu0 %v3976_v30  ;;  %2367 = vmatprep.mubr.bf16.mxu1 %v4023_v16 }
 0x12f   : > { %v2912_v45 = vpop.f32.mrb[8].mxu0  ;;  %v2984_v58 = vpop.f32.mrb[8].mxu1 }
 0x130   : > { %v2913_v46 = vpop.f32.mrb[9].mxu0  ;;  %v2985_v18 = vpop.f32.mrb[9].mxu1 }
 0x131   : > { %v4169_v19 = vadd.f32 %v2913_v46, %v2912_v45  ;;  %v2915_v47 = vpop.f32.mrb[10].mxu0  ;;  %v4171_v50 = vadd.f32 %v2985_v18, %v2984_v58  ;;  %v2987_v12 = vpop.f32.mrb[10].mxu1 }
 0x132   : > { %v2916_v17 = vpop.f32.mrb[11].mxu0  ;;  %v2988_v10 = vpop.f32.mrb[11].mxu1 }
 0x133   : > { %v4173_v28 = vadd.f32 %v2916_v17, %v2915_v47  ;;  %v4175_v26 = vadd.f32 %v2988_v10, %v2987_v12  ;;  %v912_v47 = vpack.c.bf16 %v893_v11, %v892_v22 }
 0x134   : > { %3377 = vmatmul.mubr.bf16.gmra.mrb[116].mxu0 %v4002_v42  ;;  %2368 = vmatmul.mubr.bf16.gmra.mrb[116].mxu1 %v4029_v1  ;;  %v891_v1 = vld [vmem:[#allocation2 + $0x140] sm:$0xff] }
 0x135   : > { %3380 = vmatprep.mubr.bf16.mxu0 %v4019_v49  ;;  %2375 = vmatprep.mubr.bf16.mxu1 %v4121_v4  ;;  %v890_v49 = vld [vmem:[#allocation2 + $0x138] sm:$0xff] }
 0x136   : > { %v911_v15 = vpack.c.bf16 %v891_v1, %v890_v49 }
 0x137   : > { %v2918_v30 = vpop.f32.mrb[12].mxu0  ;;  %v2990_v14 = vpop.f32.mrb[12].mxu1 }
 0x138   : > { %v2919_v16 = vpop.f32.mrb[13].mxu0  ;;  %v2991_v36 = vpop.f32.mrb[13].mxu1 }
 0x139   : > { %v4181_v5 = vadd.f32 %v2919_v16, %v2918_v30  ;;  %v2921_v51 = vpop.f32.mrb[14].mxu0  ;;  %v4183_v31 = vadd.f32 %v2991_v36, %v2990_v14  ;;  %v2993_v21 = vpop.f32.mrb[14].mxu1  ;;  %v894_v14 = vld [vmem:[#allocation2 + $0x168] sm:$0xff]  ;;  %v895_v16 = vld [vmem:[#allocation2 + $0x170] sm:$0xff] }
 0x13a   : > { %v2922_v41 = vpop.f32.mrb[15].mxu0  ;;  %v2994_v42 = vpop.f32.mrb[15].mxu1  ;;  %v913_v49 = vpack.c.bf16 %v895_v16, %v894_v14 }
 0x13b   : > { %v4185_v27 = vadd.f32 %v2922_v41, %v2921_v51  ;;  %v4187_v54 = vadd.f32 %v2994_v42, %v2993_v21 }
 0x13c   : > { %3381 = vmatmul.mubr.bf16.gmra.mrb[120].mxu0 %v4031_v3  ;;  %2376 = vmatmul.mubr.bf16.gmra.mrb[120].mxu1 %v4066_v34 }
 0x13d   : > { %3384 = vmatprep.mubr.bf16.mxu0 %v4039_v52  ;;  %2383 = vmatprep.mubr.bf16.mxu1 %v4127_v20 }
 0x13f   : > { %v2924_v4 = vpop.f32.mrb[16].mxu0  ;;  %v3012_v55 = vpop.f32.mrb[16].mxu1 }
 0x140   : > { %v2925_v56 = vpop.f32.mrb[17].mxu0  ;;  %v3013_v60 = vpop.f32.mrb[17].mxu1 }
 0x141   : > { %v4193_v32 = vadd.f32 %v2925_v56, %v2924_v4  ;;  %v2927_v44 = vpop.f32.mrb[18].mxu0  ;;  %v3014_v61 = vadd.f32 %v3013_v60, %v3012_v55  ;;  %v3015_v62 = vpop.f32.mrb[18].mxu1 }
 0x142   : > { %v2928_v63 = vpop.f32.mrb[19].mxu0  ;;  %v3016_v34 = vpop.f32.mrb[19].mxu1 }
 0x143   : > { %v4195_v3 = vadd.f32 %v2928_v63, %v2927_v44  ;;  %v4198_v52 = vadd.f32 %v3014_v61, %v4147_v37  ;;  %v3017_v20 = vadd.f32 %v3016_v34, %v3015_v62  ;;  %v962_v44 = vld [vmem:[#allocation2 + $0x199] sm:$0xff] }
 0x144   : > { %3385 = vmatmul.mubr.bf16.gmra.mrb[124].mxu0 %v4052_v8  ;;  %2384 = vmatmul.mubr.bf16.gmra.mrb[124].mxu1 %v911_v15  ;;  %v963_v15 = vld [vmem:[#allocation2 + $0x1a1] sm:$0xff] }
 0x145   : > { %3388 = vmatprep.mubr.bf16.mxu0 %v4064_v33  ;;  %v4203_v6 = vadd.f32 %v3017_v20, %v4151_v29  ;;  %2391 = vmatprep.mubr.bf16.mxu1 %v4133_v24  ;;  %v979_v11 = vpack.c.bf16 %v963_v15, %v962_v44 }
 0x147   : > { %v2930_v23 = vpop.f32.mrb[20].mxu0  ;;  %v3018_v45 = vpop.f32.mrb[20].mxu1 }
 0x148   : > { %v2931_v58 = vpop.f32.mrb[21].mxu0  ;;  %v3019_v37 = vpop.f32.mrb[21].mxu1 }
 0x149   : > { %v4206_v46 = vadd.f32 %v2931_v58, %v2930_v23  ;;  %v2933_v18 = vpop.f32.mrb[22].mxu0  ;;  %v3020_v12 = vadd.f32 %v3019_v37, %v3018_v45  ;;  %v3021_v8 = vpop.f32.mrb[22].mxu1  ;;  %v1026_v45 = vld [vmem:[#allocation2 + $0x19a] sm:$0xff]  ;;  %v1027_v58 = vld [vmem:[#allocation2 + $0x1a2] sm:$0xff] }
 0x14a   : > { %v2934_v17 = vpop.f32.mrb[23].mxu0  ;;  %v3022_v33 = vpop.f32.mrb[23].mxu1 }
 0x14b   : > { %v4208_v10 = vadd.f32 %v2934_v17, %v2933_v18  ;;  %v4211_v29 = vadd.f32 %v3020_v12, %v4158_v0  ;;  %v3023_v24 = vadd.f32 %v3022_v33, %v3021_v8  ;;  %v898_v18 = vld [vmem:[#allocation2 + $0x198] sm:$0xff] }
 0x14c   : > { %3389 = vmatmul.mubr.bf16.gmra.mrb[128].mxu0 %v4078_v25  ;;  %2392 = vmatmul.mubr.bf16.gmra.mrb[128].mxu1 %v912_v47  ;;  %v899_v47 = vld [vmem:[#allocation2 + $0x1a0] sm:$0xff] }
 0x14d   : > { %3392 = vmatprep.mubr.bf16.mxu0 %v4087_v38  ;;  %v4216_v30 = vadd.f32 %v3023_v24, %v4162_v7  ;;  %2399 = vmatprep.mubr.bf16.mxu1 %v4139_v13  ;;  %v915_v14 = vpack.c.bf16 %v899_v47, %v898_v18 }
 0x14f   : > { %v2936_v36 = vpop.f32.mrb[24].mxu0  ;;  %v3024_v51 = vpop.f32.mrb[24].mxu1 }
 0x150   : > { %v2937_v21 = vpop.f32.mrb[25].mxu0  ;;  %v3025_v0 = vpop.f32.mrb[25].mxu1 }
 0x151   : > { %v4219_v41 = vadd.f32 %v2937_v21, %v2936_v36  ;;  %v2939_v42 = vpop.f32.mrb[26].mxu0  ;;  %v3026_v1 = vadd.f32 %v3025_v0, %v3024_v51  ;;  %v3027_v25 = vpop.f32.mrb[26].mxu1 }
 0x152   : > { %v2940_v4 = vpop.f32.mrb[27].mxu0  ;;  %v3028_v38 = vpop.f32.mrb[27].mxu1 }
 0x153   : > { %v4221_v55 = vadd.f32 %v2940_v4, %v2939_v42  ;;  %v4224_v7 = vadd.f32 %v3026_v1, %v4169_v19  ;;  %v3029_v13 = vadd.f32 %v3028_v38, %v3027_v25 }
 0x154   : > { %3393 = vmatmul.mubr.bf16.gmra.mrb[132].mxu0 %v4093_v53  ;;  %2400 = vmatmul.mubr.bf16.gmra.mrb[132].mxu1 %v913_v49 }
 0x155   : > { %3396 = vmatprep.mubr.bf16.mxu0 %v4099_v59  ;;  %v4229_v56 = vadd.f32 %v3029_v13, %v4173_v28  ;;  %2407 = vmatprep.mubr.bf16.mxu1 %v4033_v9 }
 0x157   : > { %v2942_v60 = vpop.f32.mrb[28].mxu0  ;;  %v3030_v61 = vpop.f32.mrb[28].mxu1 }
 0x158   : > { %v2943_v62 = vpop.f32.mrb[29].mxu0  ;;  %v3031_v19 = vpop.f32.mrb[29].mxu1 }
 0x159   : > { %v4232_v63 = vadd.f32 %v2943_v62, %v2942_v60  ;;  %v2945_v34 = vpop.f32.mrb[30].mxu0  ;;  %v3032_v20 = vadd.f32 %v3031_v19, %v3030_v61  ;;  %v3033_v22 = vpop.f32.mrb[30].mxu1 }
 0x15a   : > { %v2946_v53 = vpop.f32.mrb[31].mxu0  ;;  %v3034_v59 = vpop.f32.mrb[31].mxu1 }
 0x15b   : > { %v4234_v23 = vadd.f32 %v2946_v53, %v2945_v34  ;;  %v4237_v28 = vadd.f32 %v3032_v20, %v4181_v5  ;;  %v3035_v9 = vadd.f32 %v3034_v59, %v3033_v22  ;;  %v1043_v5 = vpack.c.bf16 %v1027_v58, %v1026_v45 }
 0x15c   : > { %3397 = vmatmul.mubr.bf16.gmra.mrb[136].mxu0 %v4107_v48  ;;  %2408 = vmatmul.mubr.bf16.gmra.mrb[136].mxu1 %v4101_v43 }
 0x15d   : > { %3400 = vmatprep.mubr.bf16.mxu0 %v4141_v35  ;;  %v4243_v37 = vadd.f32 %v3035_v9, %v4185_v27  ;;  %2415 = vmatprep.mubr.bf16.mxu1 %v979_v11 }
 0x15f   : > { %v2948_v12 = vpop.f32.mrb[32].mxu0  ;;  %v3036_v8 = vpop.f32.mrb[32].mxu1 }
 0x160   : > { %v2949_v17 = vpop.f32.mrb[33].mxu0  ;;  %v3037_v24 = vpop.f32.mrb[33].mxu1 }
 0x161   : > { %v4245_v33 = vadd.f32 %v2949_v17, %v2948_v12  ;;  %v2951_v48 = vpop.f32.mrb[34].mxu0  ;;  %v3038_v43 = vadd.f32 %v3037_v24, %v3036_v8  ;;  %v3039_v16 = vpop.f32.mrb[34].mxu1 }
 0x162   : > { %v2952_v35 = vpop.f32.mrb[35].mxu0  ;;  %v3040_v51 = vpop.f32.mrb[35].mxu1 }
 0x163   : > { %v4247_v36 = vadd.f32 %v2952_v35, %v2951_v48  ;;  %v4250_v27 = vadd.f32 %v3038_v43, %v4193_v32  ;;  %v3041_v21 = vadd.f32 %v3040_v51, %v3039_v16 }
 0x164   : > { %3401 = vmatmul.mubr.bf16.gmra.mrb[140].mxu0 %v1043_v5  ;;  %2416 = vmatmul.mubr.bf16.gmra.mrb[140].mxu1 %v915_v14 }
 0x165   : > { %v4253_v0 = vadd.f32 %v3041_v21, %v4195_v3 }
 0x167   : > { %v2954_v42 = vpop.f32.mrb[36].mxu0  ;;  %v3042_v49 = vpop.f32.mrb[36].mxu1 }
 0x168   : > { %v2955_v1 = vpop.f32.mrb[37].mxu0  ;;  %v3043_v4 = vpop.f32.mrb[37].mxu1 }
 0x169   : > { %v4255_v25 = vadd.f32 %v2955_v1, %v2954_v42  ;;  %v2957_v38 = vpop.f32.mrb[38].mxu0  ;;  %v3044_v13 = vadd.f32 %v3043_v4, %v3042_v49  ;;  %v3045_v60 = vpop.f32.mrb[38].mxu1 }
 0x16a   : > { %v2958_v44 = vpop.f32.mrb[39].mxu0  ;;  %v3046_v32 = vpop.f32.mrb[39].mxu1 }
 0x16b   : > { %v4257_v15 = vadd.f32 %v2958_v44, %v2957_v38  ;;  %v4260_v61 = vadd.f32 %v3044_v13, %v4206_v46  ;;  %v3047_v62 = vadd.f32 %v3046_v32, %v3045_v60 }
 0x16d   : > { %v4263_v3 = vadd.f32 %v3047_v62, %v4208_v10 }
 0x16f   : > { %v2960_v19 = vpop.f32.mrb[40].mxu0  ;;  %v3048_v34 = vpop.f32.mrb[40].mxu1 }
 0x170   : > { %v2961_v20 = vpop.f32.mrb[41].mxu0  ;;  %v3049_v53 = vpop.f32.mrb[41].mxu1 }
 0x171   : > { %v4265_v22 = vadd.f32 %v2961_v20, %v2960_v19  ;;  %v2963_v11 = vpop.f32.mrb[42].mxu0  ;;  %v3050_v59 = vadd.f32 %v3049_v53, %v3048_v34  ;;  %v3051_v9 = vpop.f32.mrb[42].mxu1 }
 0x172   : > { %v2964_v45 = vpop.f32.mrb[43].mxu0  ;;  %v3052_v18 = vpop.f32.mrb[43].mxu1 }
 0x173   : > { %v4267_v58 = vadd.f32 %v2964_v45, %v2963_v11  ;;  %v4270_v46 = vadd.f32 %v3050_v59, %v4219_v41  ;;  %v3053_v47 = vadd.f32 %v3052_v18, %v3051_v9 }
 0x175   : > { %v4273_v10 = vadd.f32 %v3053_v47, %v4221_v55 }
 0x177   : > { %v2966_v12 = vpop.f32.mrb[44].mxu0  ;;  %v3054_v8 = vpop.f32.mrb[44].mxu1 }
 0x178   : > { %v2967_v17 = vpop.f32.mrb[45].mxu0  ;;  %v3055_v24 = vpop.f32.mrb[45].mxu1 }
 0x179   : > { %v4275_v5 = vadd.f32 %v2967_v17, %v2966_v12  ;;  %v2969_v48 = vpop.f32.mrb[46].mxu0  ;;  %v3056_v14 = vadd.f32 %v3055_v24, %v3054_v8  ;;  %v3057_v43 = vpop.f32.mrb[46].mxu1 }
 0x17a   : > { %v2970_v16 = vpop.f32.mrb[47].mxu0  ;;  %v3058_v51 = vpop.f32.mrb[47].mxu1 }
 0x17b   : > { %v4277_v35 = vadd.f32 %v2970_v16, %v2969_v48  ;;  %v4280_v41 = vadd.f32 %v3056_v14, %v4232_v63  ;;  %v3059_v21 = vadd.f32 %v3058_v51, %v3057_v43 }
 0x17d   : > { %v4283_v55 = vadd.f32 %v3059_v21, %v4234_v23 }
 0x17f   : > { %v3124_v42 = vpop.f32.mrb[48].mxu0  ;;  %v3060_v49 = vpop.f32.mrb[48].mxu1 }
 0x180   : > { %v3125_v1 = vpop.f32.mrb[49].mxu0  ;;  %v3061_v4 = vpop.f32.mrb[49].mxu1 }
 0x181   : > { %v3126_v38 = vadd.f32 %v3125_v1, %v3124_v42  ;;  %v3127_v13 = vpop.f32.mrb[50].mxu0  ;;  %v3062_v60 = vadd.f32 %v3061_v4, %v3060_v49  ;;  %v3063_v44 = vpop.f32.mrb[50].mxu1 }
 0x182   : > { %v3128_v32 = vpop.f32.mrb[51].mxu0  ;;  %v3064_v19 = vpop.f32.mrb[51].mxu1 }
 0x183   : > { %v4286_v62 = vadd.f32 %v3126_v38, %v4198_v52  ;;  %v3129_v34 = vadd.f32 %v3128_v32, %v3127_v13  ;;  %v4289_v63 = vadd.f32 %v3062_v60, %v4245_v33  ;;  %v3065_v20 = vadd.f32 %v3064_v19, %v3063_v44 }
 0x185   : > { %v4292_v23 = vadd.f32 %v3129_v34, %v4203_v6  ;;  %v4295_v53 = vadd.f32 %v3065_v20, %v4247_v36 }
 0x187   : > { %v3130_v11 = vpop.f32.mrb[52].mxu0  ;;  %v3066_v59 = vpop.f32.mrb[52].mxu1 }
 0x188   : > { %v3131_v9 = vpop.f32.mrb[53].mxu0  ;;  %v3067_v45 = vpop.f32.mrb[53].mxu1 }
 0x189   : > { %v3132_v18 = vadd.f32 %v3131_v9, %v3130_v11  ;;  %v3133_v47 = vpop.f32.mrb[54].mxu0  ;;  %v3068_v52 = vadd.f32 %v3067_v45, %v3066_v59  ;;  %v3069_v12 = vpop.f32.mrb[54].mxu1 }
 0x18a   : > { %v3134_v8 = vpop.f32.mrb[55].mxu0  ;;  %v3070_v33 = vpop.f32.mrb[55].mxu1 }
 0x18b   : > { %v4298_v17 = vadd.f32 %v3132_v18, %v4211_v29  ;;  %v3135_v24 = vadd.f32 %v3134_v8, %v3133_v47  ;;  %v4301_v6 = vadd.f32 %v3068_v52, %v4255_v25  ;;  %v3071_v48 = vadd.f32 %v3070_v33, %v3069_v12 }
 0x18d   : > { %v4304_v36 = vadd.f32 %v3135_v24, %v4216_v30  ;;  %v4307_v14 = vadd.f32 %v3071_v48, %v4257_v15 }
 0x18f   : > { %v3136_v43 = vpop.f32.mrb[56].mxu0  ;;  %v3072_v16 = vpop.f32.mrb[56].mxu1 }
 0x190   : > { %v3137_v51 = vpop.f32.mrb[57].mxu0  ;;  %v3073_v21 = vpop.f32.mrb[57].mxu1 }
 0x191   : > { %v3138_v42 = vadd.f32 %v3137_v51, %v3136_v43  ;;  %v3139_v49 = vpop.f32.mrb[58].mxu0  ;;  %v3074_v29 = vadd.f32 %v3073_v21, %v3072_v16  ;;  %v3075_v1 = vpop.f32.mrb[58].mxu1 }
 0x192   : > { %v3140_v4 = vpop.f32.mrb[59].mxu0  ;;  %v3076_v25 = vpop.f32.mrb[59].mxu1 }
 0x193   : > { %v4310_v38 = vadd.f32 %v3138_v42, %v4224_v7  ;;  %v3141_v13 = vadd.f32 %v3140_v4, %v3139_v49  ;;  %v4313_v30 = vadd.f32 %v3074_v29, %v4265_v22  ;;  %v3077_v60 = vadd.f32 %v3076_v25, %v3075_v1 }
 0x195   : > { %v4316_v15 = vadd.f32 %v3141_v13, %v4229_v56  ;;  %v4319_v44 = vadd.f32 %v3077_v60, %v4267_v58 }
 0x197   : > { %v3142_v32 = vpop.f32.mrb[60].mxu0  ;;  %v3078_v19 = vpop.f32.mrb[60].mxu1 }
 0x198   : > { %v3143_v34 = vpop.f32.mrb[61].mxu0  ;;  %v3079_v20 = vpop.f32.mrb[61].mxu1 }
 0x199   : > { %v3144_v11 = vadd.f32 %v3143_v34, %v3142_v32  ;;  %v3145_v59 = vpop.f32.mrb[62].mxu0  ;;  %v3080_v7 = vadd.f32 %v3079_v20, %v3078_v19  ;;  %v3081_v9 = vpop.f32.mrb[62].mxu1 }
 0x19a   : > { %v3146_v45 = vpop.f32.mrb[63].mxu0  ;;  %v3082_v22 = vpop.f32.mrb[63].mxu1 }
 0x19b   : > { %v4322_v18 = vadd.f32 %v3144_v11, %v4237_v28  ;;  %v3147_v47 = vadd.f32 %v3146_v45, %v3145_v59  ;;  %v4325_v56 = vadd.f32 %v3080_v7, %v4275_v5  ;;  %v3083_v52 = vadd.f32 %v3082_v22, %v3081_v9 }
 0x19d   : > { %v4328_v58 = vadd.f32 %v3147_v47, %v4243_v37  ;;  %v4331_v12 = vadd.f32 %v3083_v52, %v4277_v35 }
 0x19f   : > { %v3148_v8 = vpop.f32.mrb[64].mxu0  ;;  %v3084_v33 = vpop.f32.mrb[64].mxu1 }
 0x1a0   : > { %v3149_v24 = vpop.f32.mrb[65].mxu0  ;;  %v3085_v48 = vpop.f32.mrb[65].mxu1 }
 0x1a1   : > { %v3150_v43 = vadd.f32 %v3149_v24, %v3148_v8  ;;  %v3151_v16 = vpop.f32.mrb[66].mxu0  ;;  %v3086_v28 = vadd.f32 %v3085_v48, %v3084_v33  ;;  %v3087_v51 = vpop.f32.mrb[66].mxu1 }
 0x1a2   : > { %v3152_v21 = vpop.f32.mrb[67].mxu0  ;;  %v3088_v5 = vpop.f32.mrb[67].mxu1 }
 0x1a3   : > { %v4334_v42 = vadd.f32 %v3150_v43, %v4250_v27  ;;  %v3153_v49 = vadd.f32 %v3152_v21, %v3151_v16  ;;  %v4337_v37 = vadd.f32 %v3086_v28, %v4149_v40  ;;  %v3089_v29 = vadd.f32 %v3088_v5, %v3087_v51 }
 0x1a5   : > { %v4340_v35 = vadd.f32 %v3153_v49, %v4253_v0  ;;  %v4343_v1 = vadd.f32 %v3089_v29, %v4153_v57 }
 0x1a7   : > { %v3154_v4 = vpop.f32.mrb[68].mxu0  ;;  %v3090_v25 = vpop.f32.mrb[68].mxu1 }
 0x1a8   : > { %v3155_v13 = vpop.f32.mrb[69].mxu0  ;;  %v3091_v60 = vpop.f32.mrb[69].mxu1 }
 0x1a9   : > { %v3156_v32 = vadd.f32 %v3155_v13, %v3154_v4  ;;  %v3157_v19 = vpop.f32.mrb[70].mxu0  ;;  %v3092_v27 = vadd.f32 %v3091_v60, %v3090_v25  ;;  %v3093_v34 = vpop.f32.mrb[70].mxu1 }
 0x1aa   : > { %v3158_v20 = vpop.f32.mrb[71].mxu0  ;;  %v3094_v40 = vpop.f32.mrb[71].mxu1 }
 0x1ab   : > { %v4346_v11 = vadd.f32 %v3156_v32, %v4260_v61  ;;  %v3159_v59 = vadd.f32 %v3158_v20, %v3157_v19  ;;  %v4349_v0 = vadd.f32 %v3092_v27, %v4160_v2  ;;  %v3095_v7 = vadd.f32 %v3094_v40, %v3093_v34 }
 0x1ad   : > { %v4352_v57 = vadd.f32 %v3159_v59, %v4263_v3  ;;  %v4355_v9 = vadd.f32 %v3095_v7, %v4164_v39 }
 0x1af   : > { %v3160_v45 = vpop.f32.mrb[72].mxu0  ;;  %v3096_v22 = vpop.f32.mrb[72].mxu1 }
 0x1b0   : > { %v3161_v47 = vpop.f32.mrb[73].mxu0  ;;  %v3097_v52 = vpop.f32.mrb[73].mxu1 }
 0x1b1   : > { %v3162_v8 = vadd.f32 %v3161_v47, %v3160_v45  ;;  %v3163_v33 = vpop.f32.mrb[74].mxu0  ;;  %v3098_v61 = vadd.f32 %v3097_v52, %v3096_v22  ;;  %v3099_v24 = vpop.f32.mrb[74].mxu1 }
 0x1b2   : > { %v3164_v48 = vpop.f32.mrb[75].mxu0  ;;  %v3100_v2 = vpop.f32.mrb[75].mxu1 }
 0x1b3   : > { %v4358_v43 = vadd.f32 %v3162_v8, %v4270_v46  ;;  %v3165_v16 = vadd.f32 %v3164_v48, %v3163_v33  ;;  %v4361_v3 = vadd.f32 %v3098_v61, %v4171_v50  ;;  %v3101_v28 = vadd.f32 %v3100_v2, %v3099_v24 }
 0x1b5   : > { %v4364_v39 = vadd.f32 %v3165_v16, %v4273_v10  ;;  %v4367_v51 = vadd.f32 %v3101_v28, %v4175_v26 }
 0x1b7   : > { %v3166_v21 = vpop.f32.mrb[76].mxu0  ;;  %v3102_v5 = vpop.f32.mrb[76].mxu1 }
 0x1b8   : > { %v3167_v49 = vpop.f32.mrb[77].mxu0  ;;  %v3103_v29 = vpop.f32.mrb[77].mxu1 }
 0x1b9   : > { %v3168_v4 = vadd.f32 %v3167_v49, %v3166_v21  ;;  %v3169_v25 = vpop.f32.mrb[78].mxu0  ;;  %v3104_v46 = vadd.f32 %v3103_v29, %v3102_v5  ;;  %v3105_v13 = vpop.f32.mrb[78].mxu1 }
 0x1ba   : > { %v3170_v60 = vpop.f32.mrb[79].mxu0  ;;  %v3106_v50 = vpop.f32.mrb[79].mxu1 }
 0x1bb   : > { %v4370_v32 = vadd.f32 %v3168_v4, %v4280_v41  ;;  %v3171_v19 = vadd.f32 %v3170_v60, %v3169_v25  ;;  %v4373_v10 = vadd.f32 %v3104_v46, %v4183_v31  ;;  %v3107_v27 = vadd.f32 %v3106_v50, %v3105_v13 }
 0x1bd   : > { %v4376_v26 = vadd.f32 %v3171_v19, %v4283_v55  ;;  %v4379_v34 = vadd.f32 %v3107_v27, %v4187_v54 }
 0x1bf   : > { %v3172_v20 = vpop.f32.mrb[80].mxu0  ;;  %v3236_v40 = vpop.f32.mrb[80].mxu1 }
 0x1c0   : > { %v3173_v59 = vpop.f32.mrb[81].mxu0  ;;  %v3237_v45 = vpop.f32.mrb[81].mxu1 }
 0x1c1   : > { %v3174_v7 = vadd.f32 %v3173_v59, %v3172_v20  ;;  %v3175_v22 = vpop.f32.mrb[82].mxu0  ;;  %v3238_v41 = vadd.f32 %v3237_v45, %v3236_v40  ;;  %v3239_v47 = vpop.f32.mrb[82].mxu1 }
 0x1c2   : > { %v3176_v52 = vpop.f32.mrb[83].mxu0  ;;  %v3240_v33 = vpop.f32.mrb[83].mxu1 }
 0x1c3   : > { %v4382_v8 = vadd.f32 %v3174_v7, %v4289_v63  ;;  %v3177_v31 = vadd.f32 %v3176_v52, %v3175_v22  ;;  %v3241_v61 = vadd.f32 %v3240_v33, %v3239_v47  ;;  %v4385_v55 = vadd.f32 %v3238_v41, %v4286_v62 }
 0x1c5   : > { %v4388_v54 = vadd.f32 %v3177_v31, %v4295_v53  ;;  %v4391_v24 = vadd.f32 %v3241_v61, %v4292_v23 }
 0x1c7   : > { %v3178_v48 = vpop.f32.mrb[84].mxu0  ;;  %v3242_v2 = vpop.f32.mrb[84].mxu1 }
 0x1c8   : > { %v3179_v16 = vpop.f32.mrb[85].mxu0  ;;  %v3243_v21 = vpop.f32.mrb[85].mxu1 }
 0x1c9   : > { %v3180_v28 = vadd.f32 %v3179_v16, %v3178_v48  ;;  %v3181_v5 = vpop.f32.mrb[86].mxu0  ;;  %v3244_v63 = vadd.f32 %v3243_v21, %v3242_v2  ;;  %v3245_v49 = vpop.f32.mrb[86].mxu1 }
 0x1ca   : > { %v3182_v29 = vpop.f32.mrb[87].mxu0  ;;  %v3246_v25 = vpop.f32.mrb[87].mxu1 }
 0x1cb   : > { %v4394_v4 = vadd.f32 %v3180_v28, %v4301_v6  ;;  %v3183_v62 = vadd.f32 %v3182_v29, %v3181_v5  ;;  %v3247_v46 = vadd.f32 %v3246_v25, %v3245_v49  ;;  %v4397_v53 = vadd.f32 %v3244_v63, %v4298_v17 }
 0x1cd   : > { %v4400_v23 = vadd.f32 %v3183_v62, %v4307_v14  ;;  %v4403_v13 = vadd.f32 %v3247_v46, %v4304_v36 }
 0x1cf   : > { %v3184_v60 = vpop.f32.mrb[88].mxu0  ;;  %v3248_v50 = vpop.f32.mrb[88].mxu1 }
 0x1d0   : > { %v3185_v19 = vpop.f32.mrb[89].mxu0  ;;  %v3249_v20 = vpop.f32.mrb[89].mxu1 }
 0x1d1   : > { %v3186_v27 = vadd.f32 %v3185_v19, %v3184_v60  ;;  %v3187_v40 = vpop.f32.mrb[90].mxu0  ;;  %v3250_v6 = vadd.f32 %v3249_v20, %v3248_v50  ;;  %v3251_v59 = vpop.f32.mrb[90].mxu1 }
 0x1d2   : > { %v3188_v7 = vpop.f32.mrb[91].mxu0  ;;  %v3252_v22 = vpop.f32.mrb[91].mxu1 }
 0x1d3   : > { %v4406_v45 = vadd.f32 %v3186_v27, %v4313_v30  ;;  %v3189_v17 = vadd.f32 %v3188_v7, %v3187_v40  ;;  %v3253_v41 = vadd.f32 %v3252_v22, %v3251_v59  ;;  %v4409_v14 = vadd.f32 %v3250_v6, %v4310_v38 }
 0x1d5   : > { %v4412_v36 = vadd.f32 %v3189_v17, %v4319_v44  ;;  %v4415_v47 = vadd.f32 %v3253_v41, %v4316_v15 }
 0x1d7   : > { %v3190_v52 = vpop.f32.mrb[92].mxu0  ;;  %v3254_v31 = vpop.f32.mrb[92].mxu1 }
 0x1d8   : > { %v3191_v33 = vpop.f32.mrb[93].mxu0  ;;  %v3255_v48 = vpop.f32.mrb[93].mxu1 }
 0x1d9   : > { %v3192_v61 = vadd.f32 %v3191_v33, %v3190_v52  ;;  %v3193_v2 = vpop.f32.mrb[94].mxu0  ;;  %v3256_v30 = vadd.f32 %v3255_v48, %v3254_v31  ;;  %v3257_v16 = vpop.f32.mrb[94].mxu1 }
 0x1da   : > { %v3194_v28 = vpop.f32.mrb[95].mxu0  ;;  %v3258_v5 = vpop.f32.mrb[95].mxu1 }
 0x1db   : > { %v4418_v21 = vadd.f32 %v3192_v61, %v4325_v56  ;;  %v3195_v38 = vadd.f32 %v3194_v28, %v3193_v2  ;;  %v3259_v63 = vadd.f32 %v3258_v5, %v3257_v16  ;;  %v4421_v44 = vadd.f32 %v3256_v30, %v4322_v18 }
 0x1dd   : > { %v4424_v15 = vadd.f32 %v3195_v38, %v4331_v12  ;;  %v4427_v49 = vadd.f32 %v3259_v63, %v4328_v58 }
 0x1df   : > { %v3196_v29 = vpop.f32.mrb[96].mxu0  ;;  %v3260_v62 = vpop.f32.mrb[96].mxu1 }
 0x1e0   : > { %v3197_v25 = vpop.f32.mrb[97].mxu0  ;;  %v3261_v60 = vpop.f32.mrb[97].mxu1 }
 0x1e1   : > { %v3198_v46 = vadd.f32 %v3197_v25, %v3196_v29  ;;  %v3199_v50 = vpop.f32.mrb[98].mxu0  ;;  %v3262_v56 = vadd.f32 %v3261_v60, %v3260_v62  ;;  %v3263_v19 = vpop.f32.mrb[98].mxu1 }
 0x1e2   : > { %v3200_v27 = vpop.f32.mrb[99].mxu0  ;;  %v3264_v40 = vpop.f32.mrb[99].mxu1 }
 0x1e3   : > { %v4430_v20 = vadd.f32 %v3198_v46, %v4337_v37  ;;  %v3201_v18 = vadd.f32 %v3200_v27, %v3199_v50  ;;  %v3265_v6 = vadd.f32 %v3264_v40, %v3263_v19  ;;  %v4433_v12 = vadd.f32 %v3262_v56, %v4334_v42 }
 0x1e5   : > { %v4436_v58 = vadd.f32 %v3201_v18, %v4343_v1  ;;  %v4439_v59 = vadd.f32 %v3265_v6, %v4340_v35 }
 0x1e7   : > { %v3202_v7 = vpop.f32.mrb[100].mxu0  ;;  %v3266_v17 = vpop.f32.mrb[100].mxu1 }
 0x1e8   : > { %v3203_v22 = vpop.f32.mrb[101].mxu0  ;;  %v3267_v52 = vpop.f32.mrb[101].mxu1 }
 0x1e9   : > { %v3204_v41 = vadd.f32 %v3203_v22, %v3202_v7  ;;  %v3205_v31 = vpop.f32.mrb[102].mxu0  ;;  %v3268_v37 = vadd.f32 %v3267_v52, %v3266_v17  ;;  %v3269_v33 = vpop.f32.mrb[102].mxu1 }
 0x1ea   : > { %v3206_v61 = vpop.f32.mrb[103].mxu0  ;;  %v3270_v2 = vpop.f32.mrb[103].mxu1 }
 0x1eb   : > { %v4442_v48 = vadd.f32 %v3204_v41, %v4349_v0  ;;  %v3207_v42 = vadd.f32 %v3206_v61, %v3205_v31  ;;  %v3271_v30 = vadd.f32 %v3270_v2, %v3269_v33  ;;  %v4445_v1 = vadd.f32 %v3268_v37, %v4346_v11 }
 0x1ed   : > { %v4448_v35 = vadd.f32 %v3207_v42, %v4355_v9  ;;  %v4451_v16 = vadd.f32 %v3271_v30, %v4352_v57 }
 0x1ef   : > { %v3208_v28 = vpop.f32.mrb[104].mxu0  ;;  %v3272_v38 = vpop.f32.mrb[104].mxu1 }
 0x1f0   : > { %v3209_v5 = vpop.f32.mrb[105].mxu0  ;;  %v3273_v29 = vpop.f32.mrb[105].mxu1 }
 0x1f1   : > { %v3210_v63 = vadd.f32 %v3209_v5, %v3208_v28  ;;  %v3211_v62 = vpop.f32.mrb[106].mxu0  ;;  %v3274_v0 = vadd.f32 %v3273_v29, %v3272_v38  ;;  %v3275_v25 = vpop.f32.mrb[106].mxu1 }
 0x1f2   : > { %v3212_v46 = vpop.f32.mrb[107].mxu0  ;;  %v3276_v50 = vpop.f32.mrb[107].mxu1 }
 0x1f3   : > { %v4454_v60 = vadd.f32 %v3210_v63, %v4361_v3  ;;  %v3213_v11 = vadd.f32 %v3212_v46, %v3211_v62  ;;  %v3277_v56 = vadd.f32 %v3276_v50, %v3275_v25  ;;  %v4457_v9 = vadd.f32 %v3274_v0, %v4358_v43 }
 0x1f5   : > { %v4460_v57 = vadd.f32 %v3213_v11, %v4367_v51  ;;  %v4463_v19 = vadd.f32 %v3277_v56, %v4364_v39 }
 0x1f7   : > { %v3214_v27 = vpop.f32.mrb[108].mxu0  ;;  %v3278_v18 = vpop.f32.mrb[108].mxu1 }
 0x1f8   : > { %v3215_v40 = vpop.f32.mrb[109].mxu0  ;;  %v3279_v7 = vpop.f32.mrb[109].mxu1 }
 0x1f9   : > { %v3216_v6 = vadd.f32 %v3215_v40, %v3214_v27  ;;  %v3217_v17 = vpop.f32.mrb[110].mxu0  ;;  %v3280_v3 = vadd.f32 %v3279_v7, %v3278_v18  ;;  %v3281_v22 = vpop.f32.mrb[110].mxu1 }
 0x1fa   : > { %v3218_v41 = vpop.f32.mrb[111].mxu0  ;;  %v3282_v31 = vpop.f32.mrb[111].mxu1 }
 0x1fb   : > { %v4466_v52 = vadd.f32 %v3216_v6, %v4373_v10  ;;  %v3219_v43 = vadd.f32 %v3218_v41, %v3217_v17  ;;  %v3283_v51 = vadd.f32 %v3282_v31, %v3281_v22  ;;  %v4469_v39 = vadd.f32 %v3280_v3, %v4370_v32 }
 0x1fd   : > { %v4472_v37 = vadd.f32 %v3219_v43, %v4379_v34  ;;  %v4475_v33 = vadd.f32 %v3283_v51, %v4376_v26 }
 0x1ff   : > { %v3374_v61 = vpop.f32.mrb[112].mxu0  ;;  %v3284_v42 = vpop.f32.mrb[112].mxu1 }
 0x200   : > { %v2467_v2 = vadd.f32 %v3374_v61, %v4397_v53  ;;  %v2458_v10 = vpop.f32.mrb[113].mxu0  ;;  %v3285_v30 = vpop.f32.mrb[113].mxu1 }
 0x201   : > { %v2459_v28 = vadd.f32 %v2458_v10, %v4385_v55  ;;  %v3375_v38 = vpop.f32.mrb[114].mxu0  ;;  %v3286_v32 = vadd.f32 %v3285_v30, %v3284_v42  ;;  %v3287_v5 = vpop.f32.mrb[114].mxu1 }
 0x202   : > { %2587 = vst [vmem:[%s3561_s30 + $0x10] sm:$0xff] %v2467_v2  ;;  %v2470_v34 = vadd.f32 %v3375_v38, %v4403_v13  ;;  %v2461_v63 = vpop.f32.mrb[115].mxu0  ;;  %v3288_v26 = vpop.f32.mrb[115].mxu1  ;;  %v2660_v11 = vmul.f32 %v2467_v2, %v2467_v2 }
 0x203   : > { %2585 = vst [vmem:[%s3561_s30] sm:$0xff] %v2459_v28  ;;  %v2462_v29 = vadd.f32 %v2461_v63, %v4391_v24  ;;  %v3289_v62 = vadd.f32 %v3288_v26, %v3287_v5  ;;  %v4485_v53 = vadd.f32 %v3286_v32, %v4382_v8  ;;  %v2658_v0 = vmul.f32 %v2459_v28, %v2459_v28 }
 0x204   : > { %2588 = vst [vmem:[%s3561_s30 + $0x18] sm:$0xff] %v2470_v34  ;;  %v2661_v40 = vmul.f32 %v2470_v34, %v2470_v34 }
 0x205   : > { %2586 = vst [vmem:[%s3561_s30 + $0x8] sm:$0xff] %v2462_v29  ;;  %v2618_v25 = vadd.f32 %v2462_v29, %v2459_v28  ;;  %v2659_v55 = vmul.f32 %v2462_v29, %v2462_v29  ;;  %v4489_v46 = vadd.f32 %v3289_v62, %v4388_v54 }
 0x207   : > { %v2619_v13 = vadd.f32 %v2618_v25, %v2467_v2  ;;  %v2690_v50 = vadd.f32 %v2659_v55, %v2658_v0  ;;  %v3378_v56 = vpop.f32.mrb[116].mxu0  ;;  %v3290_v27 = vpop.f32.mrb[116].mxu1 }
 0x208   : > { %v2483_v24 = vadd.f32 %v3378_v56, %v4421_v44  ;;  %v2474_v18 = vpop.f32.mrb[117].mxu0  ;;  %v3291_v6 = vpop.f32.mrb[117].mxu1 }
 0x209   : > { %v2691_v8 = vadd.f32 %v2690_v50, %v2660_v11  ;;  %v2475_v7 = vadd.f32 %v2474_v18, %v4409_v14  ;;  %v2620_v17 = vadd.f32 %v2619_v13, %v2470_v34  ;;  %v3379_v3 = vpop.f32.mrb[118].mxu0  ;;  %v3292_v54 = vadd.f32 %v3291_v6, %v3290_v27  ;;  %v3293_v22 = vpop.f32.mrb[118].mxu1 }
 0x20a   : > { %2591 = vst [vmem:[%s3561_s30 + $0x30] sm:$0xff] %v2483_v24  ;;  %v2486_v41 = vadd.f32 %v3379_v3, %v4427_v49  ;;  %v2477_v43 = vpop.f32.mrb[119].mxu0  ;;  %v3294_v61 = vpop.f32.mrb[119].mxu1  ;;  %v2664_v38 = vmul.f32 %v2483_v24, %v2483_v24 }
 0x20b   : > { %2589 = vst [vmem:[%s3561_s30 + $0x20] sm:$0xff] %v2475_v7  ;;  %v2621_v31 = vadd.f32 %v2620_v17, %v2475_v7  ;;  %v2662_v51 = vmul.f32 %v2475_v7, %v2475_v7  ;;  %v2692_v44 = vadd.f32 %v2691_v8, %v2661_v40  ;;  %v2478_v42 = vadd.f32 %v2477_v43, %v4415_v47 }
 0x20c   : > { %2592 = vst [vmem:[%s3561_s30 + $0x38] sm:$0xff] %v2486_v41  ;;  %v3295_v2 = vadd.f32 %v3294_v61, %v3293_v22  ;;  %v4499_v14 = vadd.f32 %v3292_v54, %v4394_v4  ;;  %v2665_v29 = vmul.f32 %v2486_v41, %v2486_v41 }
 0x20d   : > { %v2693_v10 = vadd.f32 %v2692_v44, %v2662_v51  ;;  %2590 = vst [vmem:[%s3561_s30 + $0x28] sm:$0xff] %v2478_v42  ;;  %v2622_v30 = vadd.f32 %v2621_v31, %v2478_v42  ;;  %v2663_v28 = vmul.f32 %v2478_v42, %v2478_v42 }
 0x20e   : > { %v4503_v49 = vadd.f32 %v3295_v2, %v4400_v23 }
 0x20f   : > { %v2623_v32 = vadd.f32 %v2622_v30, %v2483_v24  ;;  %v2694_v5 = vadd.f32 %v2693_v10, %v2663_v28  ;;  %v3382_v34 = vpop.f32.mrb[120].mxu0  ;;  %v3296_v63 = vpop.f32.mrb[120].mxu1 }
 0x210   : > { %v2499_v47 = vadd.f32 %v3382_v34, %v4445_v1  ;;  %v2490_v26 = vpop.f32.mrb[121].mxu0  ;;  %v3297_v62 = vpop.f32.mrb[121].mxu1 }
 0x211   : > { %v2695_v4 = vadd.f32 %v2694_v5, %v2664_v38  ;;  %v2491_v0 = vadd.f32 %v2490_v26, %v4433_v12  ;;  %v2624_v25 = vadd.f32 %v2623_v32, %v2486_v41  ;;  %v3383_v55 = vpop.f32.mrb[122].mxu0  ;;  %v3298_v23 = vadd.f32 %v3297_v62, %v3296_v63  ;;  %v3299_v11 = vpop.f32.mrb[122].mxu1 }
 0x212   : > { %2595 = vst [vmem:[%s3561_s30 + $0x50] sm:$0xff] %v2499_v47  ;;  %v2502_v13 = vadd.f32 %v3383_v55, %v4451_v16  ;;  %v2493_v50 = vpop.f32.mrb[123].mxu0  ;;  %v3300_v24 = vpop.f32.mrb[123].mxu1  ;;  %v2668_v17 = vmul.f32 %v2499_v47, %v2499_v47 }
 0x213   : > { %2593 = vst [vmem:[%s3561_s30 + $0x40] sm:$0xff] %v2491_v0  ;;  %v2625_v56 = vadd.f32 %v2624_v25, %v2491_v0  ;;  %v2666_v27 = vmul.f32 %v2491_v0, %v2491_v0  ;;  %v2696_v1 = vadd.f32 %v2695_v4, %v2665_v29  ;;  %v2494_v18 = vadd.f32 %v2493_v50, %v4439_v59 }
 0x214   : > { %2596 = vst [vmem:[%s3561_s30 + $0x58] sm:$0xff] %v2502_v13  ;;  %v3301_v40 = vadd.f32 %v3300_v24, %v3299_v11  ;;  %v4513_v12 = vadd.f32 %v3298_v23, %v4406_v45  ;;  %v2669_v31 = vmul.f32 %v2502_v13, %v2502_v13 }
 0x215   : > { %v2697_v8 = vadd.f32 %v2696_v1, %v2666_v27  ;;  %2594 = vst [vmem:[%s3561_s30 + $0x48] sm:$0xff] %v2494_v18  ;;  %v2626_v6 = vadd.f32 %v2625_v56, %v2494_v18  ;;  %v2667_v7 = vmul.f32 %v2494_v18, %v2494_v18 }
 0x216   : > { %v4517_v16 = vadd.f32 %v3301_v40, %v4412_v36 }
 0x217   : > { %v2627_v3 = vadd.f32 %v2626_v6, %v2499_v47  ;;  %v2698_v54 = vadd.f32 %v2697_v8, %v2667_v7  ;;  %v3386_v22 = vpop.f32.mrb[124].mxu0  ;;  %v3302_v41 = vpop.f32.mrb[124].mxu1 }
 0x218   : > { %v2515_v59 = vadd.f32 %v3386_v22, %v4469_v39  ;;  %v2506_v43 = vpop.f32.mrb[125].mxu0  ;;  %v3303_v51 = vpop.f32.mrb[125].mxu1 }
 0x219   : > { %v2699_v45 = vadd.f32 %v2698_v54, %v2668_v17  ;;  %v2507_v44 = vadd.f32 %v2506_v43, %v4457_v9  ;;  %v2628_v61 = vadd.f32 %v2627_v3, %v2502_v13  ;;  %v3387_v42 = vpop.f32.mrb[126].mxu0  ;;  %v3304_v36 = vadd.f32 %v3303_v51, %v3302_v41  ;;  %v3305_v2 = vpop.f32.mrb[126].mxu1 }
 0x21a   : > { %2599 = vst [vmem:[%s3561_s30 + $0x70] sm:$0xff] %v2515_v59  ;;  %v2518_v10 = vadd.f32 %v3387_v42, %v4475_v33  ;;  %v2509_v30 = vpop.f32.mrb[127].mxu0  ;;  %v3306_v32 = vpop.f32.mrb[127].mxu1  ;;  %v2672_v33 = vmul.f32 %v2515_v59, %v2515_v59 }
 0x21b   : > { %2597 = vst [vmem:[%s3561_s30 + $0x60] sm:$0xff] %v2507_v44  ;;  %v2629_v28 = vadd.f32 %v2628_v61, %v2507_v44  ;;  %v2670_v38 = vmul.f32 %v2507_v44, %v2507_v44  ;;  %v2700_v39 = vadd.f32 %v2699_v45, %v2669_v31  ;;  %v2510_v5 = vadd.f32 %v2509_v30, %v4463_v19 }
 0x21c   : > { %2600 = vst [vmem:[%s3561_s30 + $0x78] sm:$0xff] %v2518_v10  ;;  %v3307_v34 = vadd.f32 %v3306_v32, %v3305_v2  ;;  %v2386_v9 = vadd.f32 %v3304_v36, %v4418_v21  ;;  %v2673_v23 = vmul.f32 %v2518_v10, %v2518_v10 }
 0x21d   : > { %v2701_v63 = vadd.f32 %v2700_v39, %v2670_v38  ;;  %2598 = vst [vmem:[%s3561_s30 + $0x68] sm:$0xff] %v2510_v5  ;;  %v2630_v47 = vadd.f32 %v2629_v28, %v2510_v5  ;;  %v2671_v26 = vmul.f32 %v2510_v5, %v2510_v5 }
 0x21e   : > { %v2389_v29 = vadd.f32 %v3307_v34, %v4424_v15 }
 0x21f   : > { %v2631_v4 = vadd.f32 %v2630_v47, %v2515_v59  ;;  %v2702_v62 = vadd.f32 %v2701_v63, %v2671_v26  ;;  %v3390_v0 = vpop.f32.mrb[128].mxu0  ;;  %v3308_v25 = vpop.f32.mrb[128].mxu1 }
 0x220   : > { %v2531_v55 = vadd.f32 %v3390_v0, %v4499_v14  ;;  %v2522_v19 = vpop.f32.mrb[129].mxu0  ;;  %v3309_v21 = vpop.f32.mrb[129].mxu1 }
 0x221   : > { %v2703_v11 = vadd.f32 %v2702_v62, %v2672_v33  ;;  %v2523_v13 = vadd.f32 %v2522_v19, %v4485_v53  ;;  %v2632_v50 = vadd.f32 %v2631_v4, %v2518_v10  ;;  %v3391_v56 = vpop.f32.mrb[130].mxu0  ;;  %v3310_v15 = vadd.f32 %v3309_v21, %v3308_v25  ;;  %v3311_v27 = vpop.f32.mrb[130].mxu1 }
 0x222   : > { %2603 = vst [vmem:[%s3561_s30 + $0x90] sm:$0xff] %v2531_v55  ;;  %v2534_v1 = vadd.f32 %v3391_v56, %v4503_v49  ;;  %v2525_v24 = vpop.f32.mrb[131].mxu0  ;;  %v3312_v8 = vpop.f32.mrb[131].mxu1  ;;  %v2676_v49 = vmul.f32 %v2531_v55, %v2531_v55 }
 0x223   : > { %2601 = vst [vmem:[%s3561_s30 + $0x80] sm:$0xff] %v2523_v13  ;;  %v2633_v18 = vadd.f32 %v2632_v50, %v2523_v13  ;;  %v2674_v40 = vmul.f32 %v2523_v13, %v2523_v13  ;;  %v2704_v14 = vadd.f32 %v2703_v11, %v2673_v23  ;;  %v2526_v6 = vadd.f32 %v2525_v24, %v4489_v46 }
 0x224   : > { %2604 = vst [vmem:[%s3561_s30 + $0x98] sm:$0xff] %v2534_v1  ;;  %v3313_v7 = vadd.f32 %v3312_v8, %v3311_v27  ;;  %v2394_v53 = vadd.f32 %v3310_v15, %v4430_v20  ;;  %v2677_v46 = vmul.f32 %v2534_v1, %v2534_v1 }
 0x225   : > { %v2705_v17 = vadd.f32 %v2704_v14, %v2674_v40  ;;  %2602 = vst [vmem:[%s3561_s30 + $0x88] sm:$0xff] %v2526_v6  ;;  %v2634_v3 = vadd.f32 %v2633_v18, %v2526_v6  ;;  %v2675_v54 = vmul.f32 %v2526_v6, %v2526_v6 }
 0x226   : > { %v2397_v22 = vadd.f32 %v3313_v7, %v4436_v58 }
 0x227   : > { %v2635_v41 = vadd.f32 %v2634_v3, %v2531_v55  ;;  %v2706_v59 = vadd.f32 %v2705_v17, %v2675_v54  ;;  %v3394_v43 = vpop.f32.mrb[132].mxu0  ;;  %v3314_v31 = vpop.f32.mrb[132].mxu1 }
 0x228   : > { %v2547_v45 = vadd.f32 %v3394_v43, %v2386_v9  ;;  %v2538_v51 = vpop.f32.mrb[133].mxu0  ;;  %v3315_v61 = vpop.f32.mrb[133].mxu1 }
 0x229   : > { %v2707_v44 = vadd.f32 %v2706_v59, %v2676_v49  ;;  %v2539_v20 = vadd.f32 %v2538_v51, %v4513_v12  ;;  %v2636_v42 = vadd.f32 %v2635_v41, %v2534_v1  ;;  %v3395_v36 = vpop.f32.mrb[134].mxu0  ;;  %v3316_v2 = vadd.f32 %v3315_v61, %v3314_v31  ;;  %v3317_v58 = vpop.f32.mrb[134].mxu1 }
 0x22a   : > { %2607 = vst [vmem:[%s3561_s30 + $0xb0] sm:$0xff] %v2547_v45  ;;  %v2550_v10 = vadd.f32 %v3395_v36, %v2389_v29  ;;  %v2541_v30 = vpop.f32.mrb[135].mxu0  ;;  %v3318_v32 = vpop.f32.mrb[135].mxu1  ;;  %v2680_v29 = vmul.f32 %v2547_v45, %v2547_v45 }
 0x22b   : > { %2605 = vst [vmem:[%s3561_s30 + $0xa0] sm:$0xff] %v2539_v20  ;;  %v2637_v28 = vadd.f32 %v2636_v42, %v2539_v20  ;;  %v2678_v38 = vmul.f32 %v2539_v20, %v2539_v20  ;;  %v2708_v39 = vadd.f32 %v2707_v44, %v2677_v46  ;;  %v2542_v5 = vadd.f32 %v2541_v30, %v4517_v16 }
 0x22c   : > { %2608 = vst [vmem:[%s3561_s30 + $0xb8] sm:$0xff] %v2550_v10  ;;  %v3319_v34 = vadd.f32 %v3318_v32, %v3317_v58  ;;  %v2402_v9 = vadd.f32 %v3316_v2, %v4442_v48  ;;  %v2681_v16 = vmul.f32 %v2550_v10, %v2550_v10 }
 0x22d   : > { %v2709_v12 = vadd.f32 %v2708_v39, %v2678_v38  ;;  %2606 = vst [vmem:[%s3561_s30 + $0xa8] sm:$0xff] %v2542_v5  ;;  %v2638_v63 = vadd.f32 %v2637_v28, %v2542_v5  ;;  %v2679_v47 = vmul.f32 %v2542_v5, %v2542_v5 }
 0x22e   : > { %v2405_v26 = vadd.f32 %v3319_v34, %v4448_v35 }
 0x22f   : > { %v2639_v33 = vadd.f32 %v2638_v63, %v2547_v45  ;;  %v2710_v4 = vadd.f32 %v2709_v12, %v2679_v47  ;;  %v3398_v62 = vpop.f32.mrb[136].mxu0  ;;  %v3320_v0 = vpop.f32.mrb[136].mxu1 }
 0x230   : > { %v2563_v25 = vadd.f32 %v3398_v62, %v2402_v9  ;;  %v2554_v55 = vpop.f32.mrb[137].mxu0  ;;  %v3321_v23 = vpop.f32.mrb[137].mxu1 }
 0x231   : > { %v2711_v19 = vadd.f32 %v2710_v4, %v2680_v29  ;;  %v2555_v48 = vadd.f32 %v2554_v55, %v2394_v53  ;;  %v2640_v11 = vadd.f32 %v2639_v33, %v2550_v10  ;;  %v3399_v21 = vpop.f32.mrb[138].mxu0  ;;  %v3322_v13 = vadd.f32 %v3321_v23, %v3320_v0  ;;  %v3323_v50 = vpop.f32.mrb[138].mxu1 }
 0x232   : > { %2611 = vst [vmem:[%s3561_s30 + $0xd0] sm:$0xff] %v2563_v25  ;;  %v2566_v35 = vadd.f32 %v3399_v21, %v2405_v26  ;;  %v2557_v56 = vpop.f32.mrb[139].mxu0  ;;  %v3324_v24 = vpop.f32.mrb[139].mxu1  ;;  %v2684_v17 = vmul.f32 %v2563_v25, %v2563_v25 }
 0x233   : > { %2609 = vst [vmem:[%s3561_s30 + $0xc0] sm:$0xff] %v2555_v48  ;;  %v2641_v15 = vadd.f32 %v2640_v11, %v2555_v48  ;;  %v2682_v27 = vmul.f32 %v2555_v48, %v2555_v48  ;;  %v2712_v1 = vadd.f32 %v2711_v19, %v2681_v16  ;;  %v2558_v18 = vadd.f32 %v2557_v56, %v2397_v22  ;;  %v2657_v11 = vld [vmem:[%s4580_s6] sm:$0x1] }
 0x234   : > { %2612 = vst [vmem:[%s3561_s30 + $0xd8] sm:$0xff] %v2566_v35  ;;  %v3325_v40 = vadd.f32 %v3324_v24, %v3323_v50  ;;  %v2410_v14 = vadd.f32 %v3322_v13, %v4454_v60  ;;  %v2685_v43 = vmul.f32 %v2566_v35, %v2566_v35 }
 0x235   : > { %v2713_v8 = vadd.f32 %v2712_v1, %v2682_v27  ;;  %2610 = vst [vmem:[%s3561_s30 + $0xc8] sm:$0xff] %v2558_v18  ;;  %v2642_v6 = vadd.f32 %v2641_v15, %v2558_v18  ;;  %v2683_v7 = vmul.f32 %v2558_v18, %v2558_v18 }
 0x236   : > { %v2413_v53 = vadd.f32 %v3325_v40, %v4460_v57 }
 0x237   : > { %v2643_v3 = vadd.f32 %v2642_v6, %v2563_v25  ;;  %v2714_v54 = vadd.f32 %v2713_v8, %v2683_v7  ;;  %v3402_v49 = vpop.f32.mrb[140].mxu0  ;;  %v3326_v41 = vpop.f32.mrb[140].mxu1 }
 0x238   : > { %v2570_v59 = vpop.f32.mrb[141].mxu0  ;;  %v3327_v22 = vpop.f32.mrb[141].mxu1 }
 0x239   : > { %v2715_v31 = vadd.f32 %v2714_v54, %v2684_v17  ;;  %v2571_v45 = vadd.f32 %v2570_v59, %v2410_v14  ;;  %v2644_v51 = vadd.f32 %v2643_v3, %v2566_v35  ;;  %v3403_v60 = vpop.f32.mrb[142].mxu0  ;;  %v3328_v46 = vadd.f32 %v3327_v22, %v3326_v41  ;;  %v3329_v44 = vpop.f32.mrb[142].mxu1 }
 0x23a   : > { %v2573_v61 = vpop.f32.mrb[143].mxu0  ;;  %v3330_v36 = vpop.f32.mrb[143].mxu1 }
 0x23b   : > { %2613 = vst [vmem:[%s3561_s30 + $0xe0] sm:$0xff] %v2571_v45  ;;  %v2645_v57 = vadd.f32 %v2644_v51, %v2571_v45  ;;  %v2686_v20 = vmul.f32 %v2571_v45, %v2571_v45  ;;  %v2716_v42 = vadd.f32 %v2715_v31, %v2685_v43  ;;  %v2574_v2 = vadd.f32 %v2573_v61, %v2413_v53 }
 0x23c   : > { %v2418_v58 = vadd.f32 %v3328_v46, %v4466_v52  ;;  %v3331_v10 = vadd.f32 %v3330_v36, %v3329_v44 }
 0x23d   : > { %v2717_v30 = vadd.f32 %v2716_v42, %v2686_v20  ;;  %2614 = vst [vmem:[%s3561_s30 + $0xe8] sm:$0xff] %v2574_v2  ;;  %v2646_v28 = vadd.f32 %v2645_v57, %v2574_v2  ;;  %v2687_v38 = vmul.f32 %v2574_v2, %v2574_v2 }
 0x23e   : > { %v2579_v39 = vadd.f32 %v3402_v49, %v2418_v58  ;;  %v2421_v32 = vadd.f32 %v3331_v10, %v4472_v37  ;;  %v2617_v37 = vld [vmem:[%s4579_s5] sm:$0x1] }
 0x23f   : > { %v2718_v5 = vadd.f32 %v2717_v30, %v2687_v38 }
 0x240   : > { %2615 = vst [vmem:[%s3561_s30 + $0xf0] sm:$0xff] %v2579_v39  ;;  %v2688_v34 = vmul.f32 %v2579_v39, %v2579_v39  ;;  %v2582_v9 = vadd.f32 %v3403_v60, %v2421_v32  ;;  %v2647_v12 = vadd.f32 %v2646_v28, %v2579_v39 }
 0x242   : > { %2616 = vst [vmem:[%s3561_s30 + $0xf8] sm:$0xff] %v2582_v9  ;;  %v2689_v63 = vmul.f32 %v2582_v9, %v2582_v9  ;;  %v2648_v47 = vadd.f32 %v2647_v12, %v2582_v9  ;;  %v2719_v26 = vadd.f32 %v2718_v5, %v2688_v34 }
 0x244   : > { %v2649_v29 = vrot.slane %v2648_v47, 4  ;;  %v2720_v33 = vadd.f32 %v2719_v26, %v2689_v63 }
 0x246   : > { %v2650_v52 = vadd.f32 %v2649_v29, %v2648_v47  ;;  %v2721_v4 = vrot.slane %v2720_v33, 4 }
 0x248   : > { %v2651_v62 = vrot.slane %v2650_v52, 2  ;;  %v2722_v0 = vadd.f32 %v2721_v4, %v2720_v33 }
 0x24a   : > { %v2652_v25 = vadd.f32 %v2651_v62, %v2650_v52  ;;  %v2723_v55 = vrot.slane %v2722_v0, 2 }
 0x24c   : > { %v2653_v16 = vrot.slane %v2652_v25, 1  ;;  %v2724_v19 = vadd.f32 %v2723_v55, %v2722_v0 }
 0x24e   : > { %v2654_v23 = vadd.f32 %v2653_v16, %v2652_v25  ;;  %v2725_v48 = vrot.slane %v2724_v19, 1 }
 0x250   : > { %v2655_v21 = vadd.f32 %v2654_v23, %v2617_v37  ;;  %v2726_v13 = vadd.f32 %v2725_v48, %v2724_v19 }
 0x252   : > { %2656 = vst [vmem:[%s4579_s5] sm:$0x1] %v2655_v21  ;;  %v2727_v50 = vadd.f32 %v2726_v13, %v2657_v11 }
 0x254   : > { %2728 = vst [vmem:[%s4580_s6] sm:$0x1] %v2727_v50 }
 0x255 PF: > { %s17_s21 = sadd.s32 1, %s3507_s21  }
 0x256   : > { %p14_p5 = scmp.ge.s32.totalorder %s17_s21, 4  }
 0x258   :  { %16 = sbr.rel (!%p14_p5) target bundleno = 1 (0x1), region = 88 }

</bundles_post_ra>
